<compile_context>
chip_gen: v7x
topology: tpu7x:2x2x1
jax: 0.10.0
libtpu: 0.0.40
codegen_flags: <defaults>
</compile_context>

<pallas_src>
import jax
import jax.numpy as jnp
from jax.experimental import pallas as pl
from jax.experimental.pallas import tpu as pltpu

# ---- hyper-parameters (args.* in the original script) -----------------------
INPUT_SIZE = 28                  # args.in_size  -> time_window = 784 // 28 = 28
CFG_FC = (32, 32, 32)            # args.fc
OUTPUT_SIZE = 10                 # args.out_size
DECAY = 0.2                      # args.decay
THRESH = 0.5                     # args.thresh
TIME_WINDOW = 784 // INPUT_SIZE
OUT_PAD = 128                    # lane-dense readout width


def _round_up(x, m):
    return ((x + m - 1) // m) * m


def _make_kernel(T, Bt, in_sz):
    inv_T = 1.0 / float(T)

    def ffsnn_kernel(x_ref,                       # (T, Bt, in_sz) f32
                     w1_ref, b1_ref,              # (in, h1) bf16, (1, h1) f32
                     w2_ref, b2_ref,
                     w3_ref, b3_ref,
                     w4_ref, b4_ref,              # (h3, OUT_PAD) f32, (1, OUT_PAD) f32
                     out_ref,                     # (Bt, OUT_PAD) f32
                     s1_buf, s2_buf):             # (T*Bt, h1), (T*Bt, h2) bf16 spike trains
        # ---------- layer 1: one time-batched MXU matmul over all T*Bt rows ----------
        x2d = x_ref[...].reshape(T * Bt, in_sz).astype(jnp.bfloat16)
        cur1 = jnp.dot(x2d, w1_ref[...],
                       preferred_element_type=jnp.float32) + b1_ref[...]
        n1 = w1_ref.shape[1]
        mem = jnp.zeros((Bt, n1), jnp.float32)
        spk = jnp.zeros((Bt, n1), jnp.bool_)
        for t in range(T):                        # VPU-only LIF scan, state in vregs
            mem = jnp.where(spk, 0.0, mem) * DECAY + cur1[t * Bt:(t + 1) * Bt, :]
            spk = mem > THRESH
            s1_buf[t * Bt:(t + 1) * Bt, :] = jnp.where(spk, 1.0, 0.0).astype(jnp.bfloat16)

        # ---------- layer 2 ----------
        cur2 = jnp.dot(s1_buf[...], w2_ref[...],
                       preferred_element_type=jnp.float32) + b2_ref[...]
        n2 = w2_ref.shape[1]
        mem = jnp.zeros((Bt, n2), jnp.float32)
        spk = jnp.zeros((Bt, n2), jnp.bool_)
        for t in range(T):
            mem = jnp.where(spk, 0.0, mem) * DECAY + cur2[t * Bt:(t + 1) * Bt, :]
            spk = mem > THRESH
            s2_buf[t * Bt:(t + 1) * Bt, :] = jnp.where(spk, 1.0, 0.0).astype(jnp.bfloat16)

        # ---------- layer 3: only the running spike sum feeds the readout ----------
        cur3 = jnp.dot(s2_buf[...], w3_ref[...],
                       preferred_element_type=jnp.float32) + b3_ref[...]
        n3 = w3_ref.shape[1]
        mem = jnp.zeros((Bt, n3), jnp.float32)
        spk = jnp.zeros((Bt, n3), jnp.bool_)
        s3_sum = jnp.zeros((Bt, n3), jnp.float32)
        for t in range(T):
            mem = jnp.where(spk, 0.0, mem) * DECAY + cur3[t * Bt:(t + 1) * Bt, :]
            spk = mem > THRESH
            s3_sum = s3_sum + jnp.where(spk, 1.0, 0.0)

        # ---------- readout, algebraically folded over time ----------
        # sum_t (s3_t @ W4 + b4) / T  ==  (mean_t s3_t) @ W4 + b4   (lane-dense store)
        out_ref[...] = jnp.dot(s3_sum * inv_T, w4_ref[...],
                               preferred_element_type=jnp.float32) + b4_ref[...]

    return ffsnn_kernel


def ffsnn_forward(x_bit, params, *, block_b=64):
    """x_bit: (B, input_size, T) float32, i.e. the torch `input.view(B, input_size, -1)`.

    params: dict of transposed weights (in, out) and biases (1, out)."""
    B, in_sz, T = x_bit.shape
    h1, h2, h3 = CFG_FC
    out_sz = OUTPUT_SIZE

    # Batch tile: multiple of 16 rows (bf16 sublane packing), at most block_b rows.
    Bt = min(_round_up(B, 16), _round_up(block_b, 16))
    B_pad = _round_up(B, Bt)
    # Prefer >= 2 independent tiles so the "parallel" axis can span both v7x TCs.
    if B_pad // Bt == 1 and Bt >= 32:
        Bt //= 2
        B_pad = _round_up(B, Bt)
    n_tiles = B_pad // Bt

    # Single layout pass: (B, in, T) -> (T, B_pad, in).  The 3-D BlockSpec slices
    # the batch dim per tile, so no extra per-tile re-tiling HBM pass is needed.
    x = jnp.transpose(x_bit, (2, 0, 1))
    if B_pad != B:
        x = jnp.pad(x, ((0, 0), (0, B_pad - B), (0, 0)))

    # bf16 MXU operands for the hidden layers; readout weight zero-padded to 128 lanes.
    w1 = params["w1"].astype(jnp.bfloat16)
    w2 = params["w2"].astype(jnp.bfloat16)
    w3 = params["w3"].astype(jnp.bfloat16)
    w4p = jnp.pad(params["w4"].astype(jnp.float32), ((0, 0), (0, OUT_PAD - out_sz)))
    b4p = jnp.pad(params["b4"].astype(jnp.float32), ((0, 0), (0, OUT_PAD - out_sz)))

    def full2d(shape):
        return pl.BlockSpec(shape, lambda i: (0, 0))

    grid_spec = pltpu.PrefetchScalarGridSpec(
        num_scalar_prefetch=0,
        grid=(n_tiles,),
        in_specs=[
            pl.BlockSpec((T, Bt, in_sz), lambda i: (0, i, 0)),   # all T steps per batch tile
            full2d((in_sz, h1)), full2d((1, h1)),
            full2d((h1, h2)),    full2d((1, h2)),
            full2d((h2, h3)),    full2d((1, h3)),
            full2d((h3, OUT_PAD)), full2d((1, OUT_PAD)),
        ],
        out_specs=pl.BlockSpec((Bt, OUT_PAD), lambda i: (i, 0)),
        scratch_shapes=[
            pltpu.VMEM((T * Bt, h1), jnp.bfloat16),   # layer-1 spike train
            pltpu.VMEM((T * Bt, h2), jnp.bfloat16),   # layer-2 spike train
        ],
    )

    out = pl.pallas_call(
        _make_kernel(T, Bt, in_sz),
        out_shape=jax.ShapeDtypeStruct((B_pad, OUT_PAD), jnp.float32),
        grid_spec=grid_spec,
        compiler_params=pltpu.CompilerParams(
            # batch tiles are independent -> megacore sharding on v7x
            dimension_semantics=("parallel",)),
    )(x,
      w1, params["b1"],
      w2, params["b2"],
      w3, params["b3"],
      w4p, b4p)

    return out[:B, :out_sz]


# -------------------- pure-JAX reference (mirrors the PyTorch loop) ----------
def ffsnn_reference(x_bit, params):
    """x_bit: (B, input_size, T).  Mirrors the kernel's bf16-matmul / f32-accumulate
    precision so the discontinuous spike thresholds are computed identically."""
    B, in_sz, T = x_bit.shape
    w1 = params["w1"].astype(jnp.bfloat16)
    w2 = params["w2"].astype(jnp.bfloat16)
    w3 = params["w3"].astype(jnp.bfloat16)

    h1m = h1s = jnp.zeros((B, CFG_FC[0]), jnp.float32)
    h2m = h2s = jnp.zeros((B, CFG_FC[1]), jnp.float32)
    h3m = h3s = jnp.zeros((B, CFG_FC[2]), jnp.float32)
    out_sum = jnp.zeros((B, OUTPUT_SIZE), jnp.float32)

    def mem_update(w, b, x, mem, spk):
        cur = jnp.dot(x.astype(jnp.bfloat16), w,
                      preferred_element_type=jnp.float32) + b
        mem = mem * DECAY * (1.0 - spk) + cur
        return mem, (mem > THRESH).astype(jnp.float32)

    for t in range(T):
        xt = x_bit[:, :, t]
        h1m, h1s = mem_update(w1, params["b1"], xt, h1m, h1s)
        h2m, h2s = mem_update(w2, params["b2"], h1s, h2m, h2s)
        h3m, h3s = mem_update(w3, params["b3"], h2s, h3m, h3s)
        out_sum = out_sum + jnp.dot(h3s, params["w4"]) + params["b4"]
    return out_sum / T


def init_params(key):
    """Deterministic torch.nn.Linear-style init; weights stored transposed (in, out)."""
    sizes = [(INPUT_SIZE, CFG_FC[0]), (CFG_FC[0], CFG_FC[1]),
             (CFG_FC[1], CFG_FC[2]), (CFG_FC[2], OUTPUT_SIZE)]
    params = {}
    for i, (fan_in, fan_out) in enumerate(sizes, start=1):
        key, kw, kb = jax.random.split(key, 3)
        bound = 1.0 / (fan_in ** 0.5)
        params[f"w{i}"] = jax.random.uniform(kw, (fan_in, fan_out), jnp.float32,
                                             -bound, bound)
        params[f"b{i}"] = jax.random.uniform(kb, (1, fan_out), jnp.float32,
                                             -bound, bound)
    return params


# TODO(synk): only the forward pass is implemented; the surrogate-gradient
# backward (ActFun.backward / gradient / fire_rate) is out of scope here.

if __name__ == "__main__":
    key = jax.random.PRNGKey(0)
    k_x, k_p = jax.random.split(key)

    B = 2
    # PyTorch-style NCHW MNIST input (B, 1, 28, 28)
    x_nchw = jax.random.uniform(k_x, (B, 1, 28, 28), jnp.float32)

    # np.squeeze + view(B, input_size, -1) in the original forward:
    x_bit = x_nchw.reshape(B, INPUT_SIZE, TIME_WINDOW)        # (B, input_size, T)

    params = init_params(k_p)

    out = ffsnn_forward(x_bit, params)
    out = jax.block_until_ready(out)

    ref = ffsnn_reference(x_bit, params)
    assert out.shape == (B, OUTPUT_SIZE)
    assert jnp.allclose(out, ref, atol=1e-4, rtol=1e-4), "mismatch vs reference"

    print("KERNEL_OK")
</pallas_src>

<mosaic_0001>
module attributes {stable_mosaic.version = 11 : i64} {
  func.func @ffsnn_kernel(%arg0: i32, %arg1: memref<28x16x28xf32, #tpu.memory_space<vmem>>, %arg2: memref<28x32xbf16, #tpu.memory_space<vmem>>, %arg3: memref<1x32xf32, #tpu.memory_space<vmem>>, %arg4: memref<32x32xbf16, #tpu.memory_space<vmem>>, %arg5: memref<1x32xf32, #tpu.memory_space<vmem>>, %arg6: memref<32x32xbf16, #tpu.memory_space<vmem>>, %arg7: memref<1x32xf32, #tpu.memory_space<vmem>>, %arg8: memref<32x128xf32, #tpu.memory_space<vmem>>, %arg9: memref<1x128xf32, #tpu.memory_space<vmem>>, %arg10: memref<16x128xf32, #tpu.memory_space<vmem>>, %arg11: memref<448x32xbf16, #tpu.memory_space<vmem>>, %arg12: memref<448x32xbf16, #tpu.memory_space<vmem>>) attributes {dimension_semantics = [#tpu.dimension_semantics<parallel>], iteration_bounds = array<i64: 1>, scalar_prefetch = 0 : i64, scratch_operands = 2 : i64, tpu.core_type = #tpu.core_type<tc>, window_params = [{transform_indices = @transform_0, window_bounds = array<i64: 28, 16, 28>}, {pipeline_mode = #tpu.pipeline_mode<synchronous>, transform_indices = @transform_1, window_bounds = array<i64: 28, 32>}, {pipeline_mode = #tpu.pipeline_mode<synchronous>, transform_indices = @transform_2, window_bounds = array<i64: 1, 32>}, {pipeline_mode = #tpu.pipeline_mode<synchronous>, transform_indices = @transform_3, window_bounds = array<i64: 32, 32>}, {pipeline_mode = #tpu.pipeline_mode<synchronous>, transform_indices = @transform_4, window_bounds = array<i64: 1, 32>}, {pipeline_mode = #tpu.pipeline_mode<synchronous>, transform_indices = @transform_5, window_bounds = array<i64: 32, 32>}, {pipeline_mode = #tpu.pipeline_mode<synchronous>, transform_indices = @transform_6, window_bounds = array<i64: 1, 32>}, {pipeline_mode = #tpu.pipeline_mode<synchronous>, transform_indices = @transform_7, window_bounds = array<i64: 32, 128>}, {pipeline_mode = #tpu.pipeline_mode<synchronous>, transform_indices = @transform_8, window_bounds = array<i64: 1, 128>}, {transform_indices = @transform_9, window_bounds = array<i64: 16, 128>}]} {
    %c0 = arith.constant 0 : index
    %c0_0 = arith.constant 0 : index
    %c0_1 = arith.constant 0 : index
    %0 = vector.load %arg1[%c0, %c0_0, %c0_1] : memref<28x16x28xf32, #tpu.memory_space<vmem>>, vector<28x16x28xf32>
    %1 = vector.shape_cast %0 : vector<28x16x28xf32> to vector<448x28xf32>
    %2 = arith.truncf %1 : vector<448x28xf32> to vector<448x28xbf16>
    %c0_2 = arith.constant 0 : index
    %c0_3 = arith.constant 0 : index
    %3 = vector.load %arg2[%c0_2, %c0_3] : memref<28x32xbf16, #tpu.memory_space<vmem>>, vector<28x32xbf16>
    %cst = arith.constant dense<0.000000e+00> : vector<448x32xf32>
    %4 = tpu.matmul %2, %3, %cst {dimension_numbers = #tpu.dot_dimension_numbers<[1], [0], [0], [1], [0, 0, 1, 1], [], []>} : vector<448x28xbf16>, vector<28x32xbf16>, vector<448x32xf32> -> vector<448x32xf32>
    %c0_4 = arith.constant 0 : index
    %c0_5 = arith.constant 0 : index
    %5 = vector.load %arg3[%c0_4, %c0_5] : memref<1x32xf32, #tpu.memory_space<vmem>>, vector<1x32xf32>
    %6 = vector.broadcast %5 : vector<1x32xf32> to vector<448x32xf32>
    %7 = arith.addf %4, %6 : vector<448x32xf32>
    %cst_6 = arith.constant 0.000000e+00 : f32
    %8 = vector.broadcast %cst_6 : f32 to vector<16x32xf32>
    %false = arith.constant false
    %9 = vector.broadcast %false : i1 to vector<16x32xi1>
    %cst_7 = arith.constant 0.000000e+00 : f32
    %10 = vector.broadcast %cst_7 : f32 to vector<16x32xf32>
    %11 = arith.select %9, %10, %8 : vector<16x32xi1>, vector<16x32xf32>
    %cst_8 = arith.constant 2.000000e-01 : f32
    %12 = vector.broadcast %cst_8 : f32 to vector<16x32xf32>
    %13 = arith.mulf %11, %12 : vector<16x32xf32>
    %14 = vector.extract_strided_slice %7 {offsets = [0, 0], sizes = [16, 32], strides = [1, 1]} : vector<448x32xf32> to vector<16x32xf32>
    %15 = arith.addf %13, %14 : vector<16x32xf32>
    %cst_9 = arith.constant 5.000000e-01 : f32
    %16 = vector.broadcast %cst_9 : f32 to vector<16x32xf32>
    %17 = arith.cmpf ogt, %15, %16 : vector<16x32xf32>
    %cst_10 = arith.constant 1.000000e+00 : f32
    %cst_11 = arith.constant 0.000000e+00 : f32
    %18 = vector.broadcast %cst_10 : f32 to vector<16x32xf32>
    %19 = vector.broadcast %cst_11 : f32 to vector<16x32xf32>
    %20 = arith.select %17, %18, %19 : vector<16x32xi1>, vector<16x32xf32>
    %21 = arith.truncf %20 : vector<16x32xf32> to vector<16x32xbf16>
    %c0_12 = arith.constant 0 : index
    %c0_13 = arith.constant 0 : index
    %22 = vector.load %arg11[%c0_12, %c0_13] : memref<448x32xbf16, #tpu.memory_space<vmem>>, vector<16x32xbf16>
    tpu.vector_store %arg11[%c0_12, %c0_13], %21 {strides = array<i32>} : memref<448x32xbf16, #tpu.memory_space<vmem>>, vector<16x32xbf16>,
    %cst_14 = arith.constant 0.000000e+00 : f32
    %23 = vector.broadcast %cst_14 : f32 to vector<16x32xf32>
    %24 = arith.select %17, %23, %15 : vector<16x32xi1>, vector<16x32xf32>
    %cst_15 = arith.constant 2.000000e-01 : f32
    %25 = vector.broadcast %cst_15 : f32 to vector<16x32xf32>
    %26 = arith.mulf %24, %25 : vector<16x32xf32>
    %27 = vector.extract_strided_slice %7 {offsets = [16, 0], sizes = [16, 32], strides = [1, 1]} : vector<448x32xf32> to vector<16x32xf32>
    %28 = arith.addf %26, %27 : vector<16x32xf32>
    %cst_16 = arith.constant 5.000000e-01 : f32
    %29 = vector.broadcast %cst_16 : f32 to vector<16x32xf32>
    %30 = arith.cmpf ogt, %28, %29 : vector<16x32xf32>
    %cst_17 = arith.constant 1.000000e+00 : f32
    %cst_18 = arith.constant 0.000000e+00 : f32
    %31 = vector.broadcast %cst_17 : f32 to vector<16x32xf32>
    %32 = vector.broadcast %cst_18 : f32 to vector<16x32xf32>
    %33 = arith.select %30, %31, %32 : vector<16x32xi1>, vector<16x32xf32>
    %34 = arith.truncf %33 : vector<16x32xf32> to vector<16x32xbf16>
    %c16 = arith.constant 16 : index
    %c0_19 = arith.constant 0 : index
    %35 = vector.load %arg11[%c16, %c0_19] : memref<448x32xbf16, #tpu.memory_space<vmem>>, vector<16x32xbf16>
    tpu.vector_store %arg11[%c16, %c0_19], %34 {strides = array<i32>} : memref<448x32xbf16, #tpu.memory_space<vmem>>, vector<16x32xbf16>,
    %cst_20 = arith.constant 0.000000e+00 : f32
    %36 = vector.broadcast %cst_20 : f32 to vector<16x32xf32>
    %37 = arith.select %30, %36, %28 : vector<16x32xi1>, vector<16x32xf32>
    %cst_21 = arith.constant 2.000000e-01 : f32
    %38 = vector.broadcast %cst_21 : f32 to vector<16x32xf32>
    %39 = arith.mulf %37, %38 : vector<16x32xf32>
    %40 = vector.extract_strided_slice %7 {offsets = [32, 0], sizes = [16, 32], strides = [1, 1]} : vector<448x32xf32> to vector<16x32xf32>
    %41 = arith.addf %39, %40 : vector<16x32xf32>
    %cst_22 = arith.constant 5.000000e-01 : f32
    %42 = vector.broadcast %cst_22 : f32 to vector<16x32xf32>
    %43 = arith.cmpf ogt, %41, %42 : vector<16x32xf32>
    %cst_23 = arith.constant 1.000000e+00 : f32
    %cst_24 = arith.constant 0.000000e+00 : f32
    %44 = vector.broadcast %cst_23 : f32 to vector<16x32xf32>
    %45 = vector.broadcast %cst_24 : f32 to vector<16x32xf32>
    %46 = arith.select %43, %44, %45 : vector<16x32xi1>, vector<16x32xf32>
    %47 = arith.truncf %46 : vector<16x32xf32> to vector<16x32xbf16>
    %c32 = arith.constant 32 : index
    %c0_25 = arith.constant 0 : index
    %48 = vector.load %arg11[%c32, %c0_25] : memref<448x32xbf16, #tpu.memory_space<vmem>>, vector<16x32xbf16>
    tpu.vector_store %arg11[%c32, %c0_25], %47 {strides = array<i32>} : memref<448x32xbf16, #tpu.memory_space<vmem>>, vector<16x32xbf16>,
    %cst_26 = arith.constant 0.000000e+00 : f32
    %49 = vector.broadcast %cst_26 : f32 to vector<16x32xf32>
    %50 = arith.select %43, %49, %41 : vector<16x32xi1>, vector<16x32xf32>
    %cst_27 = arith.constant 2.000000e-01 : f32
    %51 = vector.broadcast %cst_27 : f32 to vector<16x32xf32>
    %52 = arith.mulf %50, %51 : vector<16x32xf32>
    %53 = vector.extract_strided_slice %7 {offsets = [48, 0], sizes = [16, 32], strides = [1, 1]} : vector<448x32xf32> to vector<16x32xf32>
    %54 = arith.addf %52, %53 : vector<16x32xf32>
    %cst_28 = arith.constant 5.000000e-01 : f32
    %55 = vector.broadcast %cst_28 : f32 to vector<16x32xf32>
    %56 = arith.cmpf ogt, %54, %55 : vector<16x32xf32>
    %cst_29 = arith.constant 1.000000e+00 : f32
    %cst_30 = arith.constant 0.000000e+00 : f32
    %57 = vector.broadcast %cst_29 : f32 to vector<16x32xf32>
    %58 = vector.broadcast %cst_30 : f32 to vector<16x32xf32>
    %59 = arith.select %56, %57, %58 : vector<16x32xi1>, vector<16x32xf32>
    %60 = arith.truncf %59 : vector<16x32xf32> to vector<16x32xbf16>
    %c48 = arith.constant 48 : index
    %c0_31 = arith.constant 0 : index
    %61 = vector.load %arg11[%c48, %c0_31] : memref<448x32xbf16, #tpu.memory_space<vmem>>, vector<16x32xbf16>
    tpu.vector_store %arg11[%c48, %c0_31], %60 {strides = array<i32>} : memref<448x32xbf16, #tpu.memory_space<vmem>>, vector<16x32xbf16>,
    %cst_32 = arith.constant 0.000000e+00 : f32
    %62 = vector.broadcast %cst_32 : f32 to vector<16x32xf32>
    %63 = arith.select %56, %62, %54 : vector<16x32xi1>, vector<16x32xf32>
    %cst_33 = arith.constant 2.000000e-01 : f32
    %64 = vector.broadcast %cst_33 : f32 to vector<16x32xf32>
    %65 = arith.mulf %63, %64 : vector<16x32xf32>
    %66 = vector.extract_strided_slice %7 {offsets = [64, 0], sizes = [16, 32], strides = [1, 1]} : vector<448x32xf32> to vector<16x32xf32>
    %67 = arith.addf %65, %66 : vector<16x32xf32>
    %cst_34 = arith.constant 5.000000e-01 : f32
    %68 = vector.broadcast %cst_34 : f32 to vector<16x32xf32>
    %69 = arith.cmpf ogt, %67, %68 : vector<16x32xf32>
    %cst_35 = arith.constant 1.000000e+00 : f32
    %cst_36 = arith.constant 0.000000e+00 : f32
    %70 = vector.broadcast %cst_35 : f32 to vector<16x32xf32>
    %71 = vector.broadcast %cst_36 : f32 to vector<16x32xf32>
    %72 = arith.select %69, %70, %71 : vector<16x32xi1>, vector<16x32xf32>
    %73 = arith.truncf %72 : vector<16x32xf32> to vector<16x32xbf16>
    %c64 = arith.constant 64 : index
    %c0_37 = arith.constant 0 : index
    %74 = vector.load %arg11[%c64, %c0_37] : memref<448x32xbf16, #tpu.memory_space<vmem>>, vector<16x32xbf16>
    tpu.vector_store %arg11[%c64, %c0_37], %73 {strides = array<i32>} : memref<448x32xbf16, #tpu.memory_space<vmem>>, vector<16x32xbf16>,
    %cst_38 = arith.constant 0.000000e+00 : f32
    %75 = vector.broadcast %cst_38 : f32 to vector<16x32xf32>
    %76 = arith.select %69, %75, %67 : vector<16x32xi1>, vector<16x32xf32>
    %cst_39 = arith.constant 2.000000e-01 : f32
    %77 = vector.broadcast %cst_39 : f32 to vector<16x32xf32>
    %78 = arith.mulf %76, %77 : vector<16x32xf32>
    %79 = vector.extract_strided_slice %7 {offsets = [80, 0], sizes = [16, 32], strides = [1, 1]} : vector<448x32xf32> to vector<16x32xf32>
    %80 = arith.addf %78, %79 : vector<16x32xf32>
    %cst_40 = arith.constant 5.000000e-01 : f32
    %81 = vector.broadcast %cst_40 : f32 to vector<16x32xf32>
    %82 = arith.cmpf ogt, %80, %81 : vector<16x32xf32>
    %cst_41 = arith.constant 1.000000e+00 : f32
    %cst_42 = arith.constant 0.000000e+00 : f32
    %83 = vector.broadcast %cst_41 : f32 to vector<16x32xf32>
    %84 = vector.broadcast %cst_42 : f32 to vector<16x32xf32>
    %85 = arith.select %82, %83, %84 : vector<16x32xi1>, vector<16x32xf32>
    %86 = arith.truncf %85 : vector<16x32xf32> to vector<16x32xbf16>
    %c80 = arith.constant 80 : index
    %c0_43 = arith.constant 0 : index
    %87 = vector.load %arg11[%c80, %c0_43] : memref<448x32xbf16, #tpu.memory_space<vmem>>, vector<16x32xbf16>
    tpu.vector_store %arg11[%c80, %c0_43], %86 {strides = array<i32>} : memref<448x32xbf16, #tpu.memory_space<vmem>>, vector<16x32xbf16>,
    %cst_44 = arith.constant 0.000000e+00 : f32
    %88 = vector.broadcast %cst_44 : f32 to vector<16x32xf32>
    %89 = arith.select %82, %88, %80 : vector<16x32xi1>, vector<16x32xf32>
    %cst_45 = arith.constant 2.000000e-01 : f32
    %90 = vector.broadcast %cst_45 : f32 to vector<16x32xf32>
    %91 = arith.mulf %89, %90 : vector<16x32xf32>
    %92 = vector.extract_strided_slice %7 {offsets = [96, 0], sizes = [16, 32], strides = [1, 1]} : vector<448x32xf32> to vector<16x32xf32>
    %93 = arith.addf %91, %92 : vector<16x32xf32>
    %cst_46 = arith.constant 5.000000e-01 : f32
    %94 = vector.broadcast %cst_46 : f32 to vector<16x32xf32>
    %95 = arith.cmpf ogt, %93, %94 : vector<16x32xf32>
    %cst_47 = arith.constant 1.000000e+00 : f32
    %cst_48 = arith.constant 0.000000e+00 : f32
    %96 = vector.broadcast %cst_47 : f32 to vector<16x32xf32>
    %97 = vector.broadcast %cst_48 : f32 to vector<16x32xf32>
    %98 = arith.select %95, %96, %97 : vector<16x32xi1>, vector<16x32xf32>
    %99 = arith.truncf %98 : vector<16x32xf32> to vector<16x32xbf16>
    %c96 = arith.constant 96 : index
    %c0_49 = arith.constant 0 : index
    %100 = vector.load %arg11[%c96, %c0_49] : memref<448x32xbf16, #tpu.memory_space<vmem>>, vector<16x32xbf16>
    tpu.vector_store %arg11[%c96, %c0_49], %99 {strides = array<i32>} : memref<448x32xbf16, #tpu.memory_space<vmem>>, vector<16x32xbf16>,
    %cst_50 = arith.constant 0.000000e+00 : f32
    %101 = vector.broadcast %cst_50 : f32 to vector<16x32xf32>
    %102 = arith.select %95, %101, %93 : vector<16x32xi1>, vector<16x32xf32>
    %cst_51 = arith.constant 2.000000e-01 : f32
    %103 = vector.broadcast %cst_51 : f32 to vector<16x32xf32>
    %104 = arith.mulf %102, %103 : vector<16x32xf32>
    %105 = vector.extract_strided_slice %7 {offsets = [112, 0], sizes = [16, 32], strides = [1, 1]} : vector<448x32xf32> to vector<16x32xf32>
    %106 = arith.addf %104, %105 : vector<16x32xf32>
    %cst_52 = arith.constant 5.000000e-01 : f32
    %107 = vector.broadcast %cst_52 : f32 to vector<16x32xf32>
    %108 = arith.cmpf ogt, %106, %107 : vector<16x32xf32>
    %cst_53 = arith.constant 1.000000e+00 : f32
    %cst_54 = arith.constant 0.000000e+00 : f32
    %109 = vector.broadcast %cst_53 : f32 to vector<16x32xf32>
    %110 = vector.broadcast %cst_54 : f32 to vector<16x32xf32>
    %111 = arith.select %108, %109, %110 : vector<16x32xi1>, vector<16x32xf32>
    %112 = arith.truncf %111 : vector<16x32xf32> to vector<16x32xbf16>
    %c112 = arith.constant 112 : index
    %c0_55 = arith.constant 0 : index
    %113 = vector.load %arg11[%c112, %c0_55] : memref<448x32xbf16, #tpu.memory_space<vmem>>, vector<16x32xbf16>
    tpu.vector_store %arg11[%c112, %c0_55], %112 {strides = array<i32>} : memref<448x32xbf16, #tpu.memory_space<vmem>>, vector<16x32xbf16>,
    %cst_56 = arith.constant 0.000000e+00 : f32
    %114 = vector.broadcast %cst_56 : f32 to vector<16x32xf32>
    %115 = arith.select %108, %114, %106 : vector<16x32xi1>, vector<16x32xf32>
    %cst_57 = arith.constant 2.000000e-01 : f32
    %116 = vector.broadcast %cst_57 : f32 to vector<16x32xf32>
    %117 = arith.mulf %115, %116 : vector<16x32xf32>
    %118 = vector.extract_strided_slice %7 {offsets = [128, 0], sizes = [16, 32], strides = [1, 1]} : vector<448x32xf32> to vector<16x32xf32>
    %119 = arith.addf %117, %118 : vector<16x32xf32>
    %cst_58 = arith.constant 5.000000e-01 : f32
    %120 = vector.broadcast %cst_58 : f32 to vector<16x32xf32>
    %121 = arith.cmpf ogt, %119, %120 : vector<16x32xf32>
    %cst_59 = arith.constant 1.000000e+00 : f32
    %cst_60 = arith.constant 0.000000e+00 : f32
    %122 = vector.broadcast %cst_59 : f32 to vector<16x32xf32>
    %123 = vector.broadcast %cst_60 : f32 to vector<16x32xf32>
    %124 = arith.select %121, %122, %123 : vector<16x32xi1>, vector<16x32xf32>
    %125 = arith.truncf %124 : vector<16x32xf32> to vector<16x32xbf16>
    %c128 = arith.constant 128 : index
    %c0_61 = arith.constant 0 : index
    %126 = vector.load %arg11[%c128, %c0_61] : memref<448x32xbf16, #tpu.memory_space<vmem>>, vector<16x32xbf16>
    tpu.vector_store %arg11[%c128, %c0_61], %125 {strides = array<i32>} : memref<448x32xbf16, #tpu.memory_space<vmem>>, vector<16x32xbf16>,
    %cst_62 = arith.constant 0.000000e+00 : f32
    %127 = vector.broadcast %cst_62 : f32 to vector<16x32xf32>
    %128 = arith.select %121, %127, %119 : vector<16x32xi1>, vector<16x32xf32>
    %cst_63 = arith.constant 2.000000e-01 : f32
    %129 = vector.broadcast %cst_63 : f32 to vector<16x32xf32>
    %130 = arith.mulf %128, %129 : vector<16x32xf32>
    %131 = vector.extract_strided_slice %7 {offsets = [144, 0], sizes = [16, 32], strides = [1, 1]} : vector<448x32xf32> to vector<16x32xf32>
    %132 = arith.addf %130, %131 : vector<16x32xf32>
    %cst_64 = arith.constant 5.000000e-01 : f32
    %133 = vector.broadcast %cst_64 : f32 to vector<16x32xf32>
    %134 = arith.cmpf ogt, %132, %133 : vector<16x32xf32>
    %cst_65 = arith.constant 1.000000e+00 : f32
    %cst_66 = arith.constant 0.000000e+00 : f32
    %135 = vector.broadcast %cst_65 : f32 to vector<16x32xf32>
    %136 = vector.broadcast %cst_66 : f32 to vector<16x32xf32>
    %137 = arith.select %134, %135, %136 : vector<16x32xi1>, vector<16x32xf32>
    %138 = arith.truncf %137 : vector<16x32xf32> to vector<16x32xbf16>
    %c144 = arith.constant 144 : index
    %c0_67 = arith.constant 0 : index
    %139 = vector.load %arg11[%c144, %c0_67] : memref<448x32xbf16, #tpu.memory_space<vmem>>, vector<16x32xbf16>
    tpu.vector_store %arg11[%c144, %c0_67], %138 {strides = array<i32>} : memref<448x32xbf16, #tpu.memory_space<vmem>>, vector<16x32xbf16>,
    %cst_68 = arith.constant 0.000000e+00 : f32
    %140 = vector.broadcast %cst_68 : f32 to vector<16x32xf32>
    %141 = arith.select %134, %140, %132 : vector<16x32xi1>, vector<16x32xf32>
    %cst_69 = arith.constant 2.000000e-01 : f32
    %142 = vector.broadcast %cst_69 : f32 to vector<16x32xf32>
    %143 = arith.mulf %141, %142 : vector<16x32xf32>
    %144 = vector.extract_strided_slice %7 {offsets = [160, 0], sizes = [16, 32], strides = [1, 1]} : vector<448x32xf32> to vector<16x32xf32>
    %145 = arith.addf %143, %144 : vector<16x32xf32>
    %cst_70 = arith.constant 5.000000e-01 : f32
    %146 = vector.broadcast %cst_70 : f32 to vector<16x32xf32>
    %147 = arith.cmpf ogt, %145, %146 : vector<16x32xf32>
    %cst_71 = arith.constant 1.000000e+00 : f32
    %cst_72 = arith.constant 0.000000e+00 : f32
    %148 = vector.broadcast %cst_71 : f32 to vector<16x32xf32>
    %149 = vector.broadcast %cst_72 : f32 to vector<16x32xf32>
    %150 = arith.select %147, %148, %149 : vector<16x32xi1>, vector<16x32xf32>
    %151 = arith.truncf %150 : vector<16x32xf32> to vector<16x32xbf16>
    %c160 = arith.constant 160 : index
    %c0_73 = arith.constant 0 : index
    %152 = vector.load %arg11[%c160, %c0_73] : memref<448x32xbf16, #tpu.memory_space<vmem>>, vector<16x32xbf16>
    tpu.vector_store %arg11[%c160, %c0_73], %151 {strides = array<i32>} : memref<448x32xbf16, #tpu.memory_space<vmem>>, vector<16x32xbf16>,
    %cst_74 = arith.constant 0.000000e+00 : f32
    %153 = vector.broadcast %cst_74 : f32 to vector<16x32xf32>
    %154 = arith.select %147, %153, %145 : vector<16x32xi1>, vector<16x32xf32>
    %cst_75 = arith.constant 2.000000e-01 : f32
    %155 = vector.broadcast %cst_75 : f32 to vector<16x32xf32>
    %156 = arith.mulf %154, %155 : vector<16x32xf32>
    %157 = vector.extract_strided_slice %7 {offsets = [176, 0], sizes = [16, 32], strides = [1, 1]} : vector<448x32xf32> to vector<16x32xf32>
    %158 = arith.addf %156, %157 : vector<16x32xf32>
    %cst_76 = arith.constant 5.000000e-01 : f32
    %159 = vector.broadcast %cst_76 : f32 to vector<16x32xf32>
    %160 = arith.cmpf ogt, %158, %159 : vector<16x32xf32>
    %cst_77 = arith.constant 1.000000e+00 : f32
    %cst_78 = arith.constant 0.000000e+00 : f32
    %161 = vector.broadcast %cst_77 : f32 to vector<16x32xf32>
    %162 = vector.broadcast %cst_78 : f32 to vector<16x32xf32>
    %163 = arith.select %160, %161, %162 : vector<16x32xi1>, vector<16x32xf32>
    %164 = arith.truncf %163 : vector<16x32xf32> to vector<16x32xbf16>
    %c176 = arith.constant 176 : index
    %c0_79 = arith.constant 0 : index
    %165 = vector.load %arg11[%c176, %c0_79] : memref<448x32xbf16, #tpu.memory_space<vmem>>, vector<16x32xbf16>
    tpu.vector_store %arg11[%c176, %c0_79], %164 {strides = array<i32>} : memref<448x32xbf16, #tpu.memory_space<vmem>>, vector<16x32xbf16>,
    %cst_80 = arith.constant 0.000000e+00 : f32
    %166 = vector.broadcast %cst_80 : f32 to vector<16x32xf32>
    %167 = arith.select %160, %166, %158 : vector<16x32xi1>, vector<16x32xf32>
    %cst_81 = arith.constant 2.000000e-01 : f32
    %168 = vector.broadcast %cst_81 : f32 to vector<16x32xf32>
    %169 = arith.mulf %167, %168 : vector<16x32xf32>
    %170 = vector.extract_strided_slice %7 {offsets = [192, 0], sizes = [16, 32], strides = [1, 1]} : vector<448x32xf32> to vector<16x32xf32>
    %171 = arith.addf %169, %170 : vector<16x32xf32>
    %cst_82 = arith.constant 5.000000e-01 : f32
    %172 = vector.broadcast %cst_82 : f32 to vector<16x32xf32>
    %173 = arith.cmpf ogt, %171, %172 : vector<16x32xf32>
    %cst_83 = arith.constant 1.000000e+00 : f32
    %cst_84 = arith.constant 0.000000e+00 : f32
    %174 = vector.broadcast %cst_83 : f32 to vector<16x32xf32>
    %175 = vector.broadcast %cst_84 : f32 to vector<16x32xf32>
    %176 = arith.select %173, %174, %175 : vector<16x32xi1>, vector<16x32xf32>
    %177 = arith.truncf %176 : vector<16x32xf32> to vector<16x32xbf16>
    %c192 = arith.constant 192 : index
    %c0_85 = arith.constant 0 : index
    %178 = vector.load %arg11[%c192, %c0_85] : memref<448x32xbf16, #tpu.memory_space<vmem>>, vector<16x32xbf16>
    tpu.vector_store %arg11[%c192, %c0_85], %177 {strides = array<i32>} : memref<448x32xbf16, #tpu.memory_space<vmem>>, vector<16x32xbf16>,
    %cst_86 = arith.constant 0.000000e+00 : f32
    %179 = vector.broadcast %cst_86 : f32 to vector<16x32xf32>
    %180 = arith.select %173, %179, %171 : vector<16x32xi1>, vector<16x32xf32>
    %cst_87 = arith.constant 2.000000e-01 : f32
    %181 = vector.broadcast %cst_87 : f32 to vector<16x32xf32>
    %182 = arith.mulf %180, %181 : vector<16x32xf32>
    %183 = vector.extract_strided_slice %7 {offsets = [208, 0], sizes = [16, 32], strides = [1, 1]} : vector<448x32xf32> to vector<16x32xf32>
    %184 = arith.addf %182, %183 : vector<16x32xf32>
    %cst_88 = arith.constant 5.000000e-01 : f32
    %185 = vector.broadcast %cst_88 : f32 to vector<16x32xf32>
    %186 = arith.cmpf ogt, %184, %185 : vector<16x32xf32>
    %cst_89 = arith.constant 1.000000e+00 : f32
    %cst_90 = arith.constant 0.000000e+00 : f32
    %187 = vector.broadcast %cst_89 : f32 to vector<16x32xf32>
    %188 = vector.broadcast %cst_90 : f32 to vector<16x32xf32>
    %189 = arith.select %186, %187, %188 : vector<16x32xi1>, vector<16x32xf32>
    %190 = arith.truncf %189 : vector<16x32xf32> to vector<16x32xbf16>
    %c208 = arith.constant 208 : index
    %c0_91 = arith.constant 0 : index
    %191 = vector.load %arg11[%c208, %c0_91] : memref<448x32xbf16, #tpu.memory_space<vmem>>, vector<16x32xbf16>
    tpu.vector_store %arg11[%c208, %c0_91], %190 {strides = array<i32>} : memref<448x32xbf16, #tpu.memory_space<vmem>>, vector<16x32xbf16>,
    %cst_92 = arith.constant 0.000000e+00 : f32
    %192 = vector.broadcast %cst_92 : f32 to vector<16x32xf32>
    %193 = arith.select %186, %192, %184 : vector<16x32xi1>, vector<16x32xf32>
    %cst_93 = arith.constant 2.000000e-01 : f32
    %194 = vector.broadcast %cst_93 : f32 to vector<16x32xf32>
    %195 = arith.mulf %193, %194 : vector<16x32xf32>
    %196 = vector.extract_strided_slice %7 {offsets = [224, 0], sizes = [16, 32], strides = [1, 1]} : vector<448x32xf32> to vector<16x32xf32>
    %197 = arith.addf %195, %196 : vector<16x32xf32>
    %cst_94 = arith.constant 5.000000e-01 : f32
    %198 = vector.broadcast %cst_94 : f32 to vector<16x32xf32>
    %199 = arith.cmpf ogt, %197, %198 : vector<16x32xf32>
    %cst_95 = arith.constant 1.000000e+00 : f32
    %cst_96 = arith.constant 0.000000e+00 : f32
    %200 = vector.broadcast %cst_95 : f32 to vector<16x32xf32>
    %201 = vector.broadcast %cst_96 : f32 to vector<16x32xf32>
    %202 = arith.select %199, %200, %201 : vector<16x32xi1>, vector<16x32xf32>
    %203 = arith.truncf %202 : vector<16x32xf32> to vector<16x32xbf16>
    %c224 = arith.constant 224 : index
    %c0_97 = arith.constant 0 : index
    %204 = vector.load %arg11[%c224, %c0_97] : memref<448x32xbf16, #tpu.memory_space<vmem>>, vector<16x32xbf16>
    tpu.vector_store %arg11[%c224, %c0_97], %203 {strides = array<i32>} : memref<448x32xbf16, #tpu.memory_space<vmem>>, vector<16x32xbf16>,
    %cst_98 = arith.constant 0.000000e+00 : f32
    %205 = vector.broadcast %cst_98 : f32 to vector<16x32xf32>
    %206 = arith.select %199, %205, %197 : vector<16x32xi1>, vector<16x32xf32>
    %cst_99 = arith.constant 2.000000e-01 : f32
    %207 = vector.broadcast %cst_99 : f32 to vector<16x32xf32>
    %208 = arith.mulf %206, %207 : vector<16x32xf32>
    %209 = vector.extract_strided_slice %7 {offsets = [240, 0], sizes = [16, 32], strides = [1, 1]} : vector<448x32xf32> to vector<16x32xf32>
    %210 = arith.addf %208, %209 : vector<16x32xf32>
    %cst_100 = arith.constant 5.000000e-01 : f32
    %211 = vector.broadcast %cst_100 : f32 to vector<16x32xf32>
    %212 = arith.cmpf ogt, %210, %211 : vector<16x32xf32>
    %cst_101 = arith.constant 1.000000e+00 : f32
    %cst_102 = arith.constant 0.000000e+00 : f32
    %213 = vector.broadcast %cst_101 : f32 to vector<16x32xf32>
    %214 = vector.broadcast %cst_102 : f32 to vector<16x32xf32>
    %215 = arith.select %212, %213, %214 : vector<16x32xi1>, vector<16x32xf32>
    %216 = arith.truncf %215 : vector<16x32xf32> to vector<16x32xbf16>
    %c240 = arith.constant 240 : index
    %c0_103 = arith.constant 0 : index
    %217 = vector.load %arg11[%c240, %c0_103] : memref<448x32xbf16, #tpu.memory_space<vmem>>, vector<16x32xbf16>
    tpu.vector_store %arg11[%c240, %c0_103], %216 {strides = array<i32>} : memref<448x32xbf16, #tpu.memory_space<vmem>>, vector<16x32xbf16>,
    %cst_104 = arith.constant 0.000000e+00 : f32
    %218 = vector.broadcast %cst_104 : f32 to vector<16x32xf32>
    %219 = arith.select %212, %218, %210 : vector<16x32xi1>, vector<16x32xf32>
    %cst_105 = arith.constant 2.000000e-01 : f32
    %220 = vector.broadcast %cst_105 : f32 to vector<16x32xf32>
    %221 = arith.mulf %219, %220 : vector<16x32xf32>
    %222 = vector.extract_strided_slice %7 {offsets = [256, 0], sizes = [16, 32], strides = [1, 1]} : vector<448x32xf32> to vector<16x32xf32>
    %223 = arith.addf %221, %222 : vector<16x32xf32>
    %cst_106 = arith.constant 5.000000e-01 : f32
    %224 = vector.broadcast %cst_106 : f32 to vector<16x32xf32>
    %225 = arith.cmpf ogt, %223, %224 : vector<16x32xf32>
    %cst_107 = arith.constant 1.000000e+00 : f32
    %cst_108 = arith.constant 0.000000e+00 : f32
    %226 = vector.broadcast %cst_107 : f32 to vector<16x32xf32>
    %227 = vector.broadcast %cst_108 : f32 to vector<16x32xf32>
    %228 = arith.select %225, %226, %227 : vector<16x32xi1>, vector<16x32xf32>
    %229 = arith.truncf %228 : vector<16x32xf32> to vector<16x32xbf16>
    %c256 = arith.constant 256 : index
    %c0_109 = arith.constant 0 : index
    %230 = vector.load %arg11[%c256, %c0_109] : memref<448x32xbf16, #tpu.memory_space<vmem>>, vector<16x32xbf16>
    tpu.vector_store %arg11[%c256, %c0_109], %229 {strides = array<i32>} : memref<448x32xbf16, #tpu.memory_space<vmem>>, vector<16x32xbf16>,
    %cst_110 = arith.constant 0.000000e+00 : f32
    %231 = vector.broadcast %cst_110 : f32 to vector<16x32xf32>
    %232 = arith.select %225, %231, %223 : vector<16x32xi1>, vector<16x32xf32>
    %cst_111 = arith.constant 2.000000e-01 : f32
    %233 = vector.broadcast %cst_111 : f32 to vector<16x32xf32>
    %234 = arith.mulf %232, %233 : vector<16x32xf32>
    %235 = vector.extract_strided_slice %7 {offsets = [272, 0], sizes = [16, 32], strides = [1, 1]} : vector<448x32xf32> to vector<16x32xf32>
    %236 = arith.addf %234, %235 : vector<16x32xf32>
    %cst_112 = arith.constant 5.000000e-01 : f32
    %237 = vector.broadcast %cst_112 : f32 to vector<16x32xf32>
    %238 = arith.cmpf ogt, %236, %237 : vector<16x32xf32>
    %cst_113 = arith.constant 1.000000e+00 : f32
    %cst_114 = arith.constant 0.000000e+00 : f32
    %239 = vector.broadcast %cst_113 : f32 to vector<16x32xf32>
    %240 = vector.broadcast %cst_114 : f32 to vector<16x32xf32>
    %241 = arith.select %238, %239, %240 : vector<16x32xi1>, vector<16x32xf32>
    %242 = arith.truncf %241 : vector<16x32xf32> to vector<16x32xbf16>
    %c272 = arith.constant 272 : index
    %c0_115 = arith.constant 0 : index
    %243 = vector.load %arg11[%c272, %c0_115] : memref<448x32xbf16, #tpu.memory_space<vmem>>, vector<16x32xbf16>
    tpu.vector_store %arg11[%c272, %c0_115], %242 {strides = array<i32>} : memref<448x32xbf16, #tpu.memory_space<vmem>>, vector<16x32xbf16>,
    %cst_116 = arith.constant 0.000000e+00 : f32
    %244 = vector.broadcast %cst_116 : f32 to vector<16x32xf32>
    %245 = arith.select %238, %244, %236 : vector<16x32xi1>, vector<16x32xf32>
    %cst_117 = arith.constant 2.000000e-01 : f32
    %246 = vector.broadcast %cst_117 : f32 to vector<16x32xf32>
    %247 = arith.mulf %245, %246 : vector<16x32xf32>
    %248 = vector.extract_strided_slice %7 {offsets = [288, 0], sizes = [16, 32], strides = [1, 1]} : vector<448x32xf32> to vector<16x32xf32>
    %249 = arith.addf %247, %248 : vector<16x32xf32>
    %cst_118 = arith.constant 5.000000e-01 : f32
    %250 = vector.broadcast %cst_118 : f32 to vector<16x32xf32>
    %251 = arith.cmpf ogt, %249, %250 : vector<16x32xf32>
    %cst_119 = arith.constant 1.000000e+00 : f32
    %cst_120 = arith.constant 0.000000e+00 : f32
    %252 = vector.broadcast %cst_119 : f32 to vector<16x32xf32>
    %253 = vector.broadcast %cst_120 : f32 to vector<16x32xf32>
    %254 = arith.select %251, %252, %253 : vector<16x32xi1>, vector<16x32xf32>
    %255 = arith.truncf %254 : vector<16x32xf32> to vector<16x32xbf16>
    %c288 = arith.constant 288 : index
    %c0_121 = arith.constant 0 : index
    %256 = vector.load %arg11[%c288, %c0_121] : memref<448x32xbf16, #tpu.memory_space<vmem>>, vector<16x32xbf16>
    tpu.vector_store %arg11[%c288, %c0_121], %255 {strides = array<i32>} : memref<448x32xbf16, #tpu.memory_space<vmem>>, vector<16x32xbf16>,
    %cst_122 = arith.constant 0.000000e+00 : f32
    %257 = vector.broadcast %cst_122 : f32 to vector<16x32xf32>
    %258 = arith.select %251, %257, %249 : vector<16x32xi1>, vector<16x32xf32>
    %cst_123 = arith.constant 2.000000e-01 : f32
    %259 = vector.broadcast %cst_123 : f32 to vector<16x32xf32>
    %260 = arith.mulf %258, %259 : vector<16x32xf32>
    %261 = vector.extract_strided_slice %7 {offsets = [304, 0], sizes = [16, 32], strides = [1, 1]} : vector<448x32xf32> to vector<16x32xf32>
    %262 = arith.addf %260, %261 : vector<16x32xf32>
    %cst_124 = arith.constant 5.000000e-01 : f32
    %263 = vector.broadcast %cst_124 : f32 to vector<16x32xf32>
    %264 = arith.cmpf ogt, %262, %263 : vector<16x32xf32>
    %cst_125 = arith.constant 1.000000e+00 : f32
    %cst_126 = arith.constant 0.000000e+00 : f32
    %265 = vector.broadcast %cst_125 : f32 to vector<16x32xf32>
    %266 = vector.broadcast %cst_126 : f32 to vector<16x32xf32>
    %267 = arith.select %264, %265, %266 : vector<16x32xi1>, vector<16x32xf32>
    %268 = arith.truncf %267 : vector<16x32xf32> to vector<16x32xbf16>
    %c304 = arith.constant 304 : index
    %c0_127 = arith.constant 0 : index
    %269 = vector.load %arg11[%c304, %c0_127] : memref<448x32xbf16, #tpu.memory_space<vmem>>, vector<16x32xbf16>
    tpu.vector_store %arg11[%c304, %c0_127], %268 {strides = array<i32>} : memref<448x32xbf16, #tpu.memory_space<vmem>>, vector<16x32xbf16>,
    %cst_128 = arith.constant 0.000000e+00 : f32
    %270 = vector.broadcast %cst_128 : f32 to vector<16x32xf32>
    %271 = arith.select %264, %270, %262 : vector<16x32xi1>, vector<16x32xf32>
    %cst_129 = arith.constant 2.000000e-01 : f32
    %272 = vector.broadcast %cst_129 : f32 to vector<16x32xf32>
    %273 = arith.mulf %271, %272 : vector<16x32xf32>
    %274 = vector.extract_strided_slice %7 {offsets = [320, 0], sizes = [16, 32], strides = [1, 1]} : vector<448x32xf32> to vector<16x32xf32>
    %275 = arith.addf %273, %274 : vector<16x32xf32>
    %cst_130 = arith.constant 5.000000e-01 : f32
    %276 = vector.broadcast %cst_130 : f32 to vector<16x32xf32>
    %277 = arith.cmpf ogt, %275, %276 : vector<16x32xf32>
    %cst_131 = arith.constant 1.000000e+00 : f32
    %cst_132 = arith.constant 0.000000e+00 : f32
    %278 = vector.broadcast %cst_131 : f32 to vector<16x32xf32>
    %279 = vector.broadcast %cst_132 : f32 to vector<16x32xf32>
    %280 = arith.select %277, %278, %279 : vector<16x32xi1>, vector<16x32xf32>
    %281 = arith.truncf %280 : vector<16x32xf32> to vector<16x32xbf16>
    %c320 = arith.constant 320 : index
    %c0_133 = arith.constant 0 : index
    %282 = vector.load %arg11[%c320, %c0_133] : memref<448x32xbf16, #tpu.memory_space<vmem>>, vector<16x32xbf16>
    tpu.vector_store %arg11[%c320, %c0_133], %281 {strides = array<i32>} : memref<448x32xbf16, #tpu.memory_space<vmem>>, vector<16x32xbf16>,
    %cst_134 = arith.constant 0.000000e+00 : f32
    %283 = vector.broadcast %cst_134 : f32 to vector<16x32xf32>
    %284 = arith.select %277, %283, %275 : vector<16x32xi1>, vector<16x32xf32>
    %cst_135 = arith.constant 2.000000e-01 : f32
    %285 = vector.broadcast %cst_135 : f32 to vector<16x32xf32>
    %286 = arith.mulf %284, %285 : vector<16x32xf32>
    %287 = vector.extract_strided_slice %7 {offsets = [336, 0], sizes = [16, 32], strides = [1, 1]} : vector<448x32xf32> to vector<16x32xf32>
    %288 = arith.addf %286, %287 : vector<16x32xf32>
    %cst_136 = arith.constant 5.000000e-01 : f32
    %289 = vector.broadcast %cst_136 : f32 to vector<16x32xf32>
    %290 = arith.cmpf ogt, %288, %289 : vector<16x32xf32>
    %cst_137 = arith.constant 1.000000e+00 : f32
    %cst_138 = arith.constant 0.000000e+00 : f32
    %291 = vector.broadcast %cst_137 : f32 to vector<16x32xf32>
    %292 = vector.broadcast %cst_138 : f32 to vector<16x32xf32>
    %293 = arith.select %290, %291, %292 : vector<16x32xi1>, vector<16x32xf32>
    %294 = arith.truncf %293 : vector<16x32xf32> to vector<16x32xbf16>
    %c336 = arith.constant 336 : index
    %c0_139 = arith.constant 0 : index
    %295 = vector.load %arg11[%c336, %c0_139] : memref<448x32xbf16, #tpu.memory_space<vmem>>, vector<16x32xbf16>
    tpu.vector_store %arg11[%c336, %c0_139], %294 {strides = array<i32>} : memref<448x32xbf16, #tpu.memory_space<vmem>>, vector<16x32xbf16>,
    %cst_140 = arith.constant 0.000000e+00 : f32
    %296 = vector.broadcast %cst_140 : f32 to vector<16x32xf32>
    %297 = arith.select %290, %296, %288 : vector<16x32xi1>, vector<16x32xf32>
    %cst_141 = arith.constant 2.000000e-01 : f32
    %298 = vector.broadcast %cst_141 : f32 to vector<16x32xf32>
    %299 = arith.mulf %297, %298 : vector<16x32xf32>
    %300 = vector.extract_strided_slice %7 {offsets = [352, 0], sizes = [16, 32], strides = [1, 1]} : vector<448x32xf32> to vector<16x32xf32>
    %301 = arith.addf %299, %300 : vector<16x32xf32>
    %cst_142 = arith.constant 5.000000e-01 : f32
    %302 = vector.broadcast %cst_142 : f32 to vector<16x32xf32>
    %303 = arith.cmpf ogt, %301, %302 : vector<16x32xf32>
    %cst_143 = arith.constant 1.000000e+00 : f32
    %cst_144 = arith.constant 0.000000e+00 : f32
    %304 = vector.broadcast %cst_143 : f32 to vector<16x32xf32>
    %305 = vector.broadcast %cst_144 : f32 to vector<16x32xf32>
    %306 = arith.select %303, %304, %305 : vector<16x32xi1>, vector<16x32xf32>
    %307 = arith.truncf %306 : vector<16x32xf32> to vector<16x32xbf16>
    %c352 = arith.constant 352 : index
    %c0_145 = arith.constant 0 : index
    %308 = vector.load %arg11[%c352, %c0_145] : memref<448x32xbf16, #tpu.memory_space<vmem>>, vector<16x32xbf16>
    tpu.vector_store %arg11[%c352, %c0_145], %307 {strides = array<i32>} : memref<448x32xbf16, #tpu.memory_space<vmem>>, vector<16x32xbf16>,
    %cst_146 = arith.constant 0.000000e+00 : f32
    %309 = vector.broadcast %cst_146 : f32 to vector<16x32xf32>
    %310 = arith.select %303, %309, %301 : vector<16x32xi1>, vector<16x32xf32>
    %cst_147 = arith.constant 2.000000e-01 : f32
    %311 = vector.broadcast %cst_147 : f32 to vector<16x32xf32>
    %312 = arith.mulf %310, %311 : vector<16x32xf32>
    %313 = vector.extract_strided_slice %7 {offsets = [368, 0], sizes = [16, 32], strides = [1, 1]} : vector<448x32xf32> to vector<16x32xf32>
    %314 = arith.addf %312, %313 : vector<16x32xf32>
    %cst_148 = arith.constant 5.000000e-01 : f32
    %315 = vector.broadcast %cst_148 : f32 to vector<16x32xf32>
    %316 = arith.cmpf ogt, %314, %315 : vector<16x32xf32>
    %cst_149 = arith.constant 1.000000e+00 : f32
    %cst_150 = arith.constant 0.000000e+00 : f32
    %317 = vector.broadcast %cst_149 : f32 to vector<16x32xf32>
    %318 = vector.broadcast %cst_150 : f32 to vector<16x32xf32>
    %319 = arith.select %316, %317, %318 : vector<16x32xi1>, vector<16x32xf32>
    %320 = arith.truncf %319 : vector<16x32xf32> to vector<16x32xbf16>
    %c368 = arith.constant 368 : index
    %c0_151 = arith.constant 0 : index
    %321 = vector.load %arg11[%c368, %c0_151] : memref<448x32xbf16, #tpu.memory_space<vmem>>, vector<16x32xbf16>
    tpu.vector_store %arg11[%c368, %c0_151], %320 {strides = array<i32>} : memref<448x32xbf16, #tpu.memory_space<vmem>>, vector<16x32xbf16>,
    %cst_152 = arith.constant 0.000000e+00 : f32
    %322 = vector.broadcast %cst_152 : f32 to vector<16x32xf32>
    %323 = arith.select %316, %322, %314 : vector<16x32xi1>, vector<16x32xf32>
    %cst_153 = arith.constant 2.000000e-01 : f32
    %324 = vector.broadcast %cst_153 : f32 to vector<16x32xf32>
    %325 = arith.mulf %323, %324 : vector<16x32xf32>
    %326 = vector.extract_strided_slice %7 {offsets = [384, 0], sizes = [16, 32], strides = [1, 1]} : vector<448x32xf32> to vector<16x32xf32>
    %327 = arith.addf %325, %326 : vector<16x32xf32>
    %cst_154 = arith.constant 5.000000e-01 : f32
    %328 = vector.broadcast %cst_154 : f32 to vector<16x32xf32>
    %329 = arith.cmpf ogt, %327, %328 : vector<16x32xf32>
    %cst_155 = arith.constant 1.000000e+00 : f32
    %cst_156 = arith.constant 0.000000e+00 : f32
    %330 = vector.broadcast %cst_155 : f32 to vector<16x32xf32>
    %331 = vector.broadcast %cst_156 : f32 to vector<16x32xf32>
    %332 = arith.select %329, %330, %331 : vector<16x32xi1>, vector<16x32xf32>
    %333 = arith.truncf %332 : vector<16x32xf32> to vector<16x32xbf16>
    %c384 = arith.constant 384 : index
    %c0_157 = arith.constant 0 : index
    %334 = vector.load %arg11[%c384, %c0_157] : memref<448x32xbf16, #tpu.memory_space<vmem>>, vector<16x32xbf16>
    tpu.vector_store %arg11[%c384, %c0_157], %333 {strides = array<i32>} : memref<448x32xbf16, #tpu.memory_space<vmem>>, vector<16x32xbf16>,
    %cst_158 = arith.constant 0.000000e+00 : f32
    %335 = vector.broadcast %cst_158 : f32 to vector<16x32xf32>
    %336 = arith.select %329, %335, %327 : vector<16x32xi1>, vector<16x32xf32>
    %cst_159 = arith.constant 2.000000e-01 : f32
    %337 = vector.broadcast %cst_159 : f32 to vector<16x32xf32>
    %338 = arith.mulf %336, %337 : vector<16x32xf32>
    %339 = vector.extract_strided_slice %7 {offsets = [400, 0], sizes = [16, 32], strides = [1, 1]} : vector<448x32xf32> to vector<16x32xf32>
    %340 = arith.addf %338, %339 : vector<16x32xf32>
    %cst_160 = arith.constant 5.000000e-01 : f32
    %341 = vector.broadcast %cst_160 : f32 to vector<16x32xf32>
    %342 = arith.cmpf ogt, %340, %341 : vector<16x32xf32>
    %cst_161 = arith.constant 1.000000e+00 : f32
    %cst_162 = arith.constant 0.000000e+00 : f32
    %343 = vector.broadcast %cst_161 : f32 to vector<16x32xf32>
    %344 = vector.broadcast %cst_162 : f32 to vector<16x32xf32>
    %345 = arith.select %342, %343, %344 : vector<16x32xi1>, vector<16x32xf32>
    %346 = arith.truncf %345 : vector<16x32xf32> to vector<16x32xbf16>
    %c400 = arith.constant 400 : index
    %c0_163 = arith.constant 0 : index
    %347 = vector.load %arg11[%c400, %c0_163] : memref<448x32xbf16, #tpu.memory_space<vmem>>, vector<16x32xbf16>
    tpu.vector_store %arg11[%c400, %c0_163], %346 {strides = array<i32>} : memref<448x32xbf16, #tpu.memory_space<vmem>>, vector<16x32xbf16>,
    %cst_164 = arith.constant 0.000000e+00 : f32
    %348 = vector.broadcast %cst_164 : f32 to vector<16x32xf32>
    %349 = arith.select %342, %348, %340 : vector<16x32xi1>, vector<16x32xf32>
    %cst_165 = arith.constant 2.000000e-01 : f32
    %350 = vector.broadcast %cst_165 : f32 to vector<16x32xf32>
    %351 = arith.mulf %349, %350 : vector<16x32xf32>
    %352 = vector.extract_strided_slice %7 {offsets = [416, 0], sizes = [16, 32], strides = [1, 1]} : vector<448x32xf32> to vector<16x32xf32>
    %353 = arith.addf %351, %352 : vector<16x32xf32>
    %cst_166 = arith.constant 5.000000e-01 : f32
    %354 = vector.broadcast %cst_166 : f32 to vector<16x32xf32>
    %355 = arith.cmpf ogt, %353, %354 : vector<16x32xf32>
    %cst_167 = arith.constant 1.000000e+00 : f32
    %cst_168 = arith.constant 0.000000e+00 : f32
    %356 = vector.broadcast %cst_167 : f32 to vector<16x32xf32>
    %357 = vector.broadcast %cst_168 : f32 to vector<16x32xf32>
    %358 = arith.select %355, %356, %357 : vector<16x32xi1>, vector<16x32xf32>
    %359 = arith.truncf %358 : vector<16x32xf32> to vector<16x32xbf16>
    %c416 = arith.constant 416 : index
    %c0_169 = arith.constant 0 : index
    %360 = vector.load %arg11[%c416, %c0_169] : memref<448x32xbf16, #tpu.memory_space<vmem>>, vector<16x32xbf16>
    tpu.vector_store %arg11[%c416, %c0_169], %359 {strides = array<i32>} : memref<448x32xbf16, #tpu.memory_space<vmem>>, vector<16x32xbf16>,
    %cst_170 = arith.constant 0.000000e+00 : f32
    %361 = vector.broadcast %cst_170 : f32 to vector<16x32xf32>
    %362 = arith.select %355, %361, %353 : vector<16x32xi1>, vector<16x32xf32>
    %cst_171 = arith.constant 2.000000e-01 : f32
    %363 = vector.broadcast %cst_171 : f32 to vector<16x32xf32>
    %364 = arith.mulf %362, %363 : vector<16x32xf32>
    %365 = vector.extract_strided_slice %7 {offsets = [432, 0], sizes = [16, 32], strides = [1, 1]} : vector<448x32xf32> to vector<16x32xf32>
    %366 = arith.addf %364, %365 : vector<16x32xf32>
    %cst_172 = arith.constant 5.000000e-01 : f32
    %367 = vector.broadcast %cst_172 : f32 to vector<16x32xf32>
    %368 = arith.cmpf ogt, %366, %367 : vector<16x32xf32>
    %cst_173 = arith.constant 1.000000e+00 : f32
    %cst_174 = arith.constant 0.000000e+00 : f32
    %369 = vector.broadcast %cst_173 : f32 to vector<16x32xf32>
    %370 = vector.broadcast %cst_174 : f32 to vector<16x32xf32>
    %371 = arith.select %368, %369, %370 : vector<16x32xi1>, vector<16x32xf32>
    %372 = arith.truncf %371 : vector<16x32xf32> to vector<16x32xbf16>
    %c432 = arith.constant 432 : index
    %c0_175 = arith.constant 0 : index
    %373 = vector.load %arg11[%c432, %c0_175] : memref<448x32xbf16, #tpu.memory_space<vmem>>, vector<16x32xbf16>
    tpu.vector_store %arg11[%c432, %c0_175], %372 {strides = array<i32>} : memref<448x32xbf16, #tpu.memory_space<vmem>>, vector<16x32xbf16>,
    %c0_176 = arith.constant 0 : index
    %c0_177 = arith.constant 0 : index
    %374 = vector.load %arg11[%c0_176, %c0_177] : memref<448x32xbf16, #tpu.memory_space<vmem>>, vector<448x32xbf16>
    %c0_178 = arith.constant 0 : index
    %c0_179 = arith.constant 0 : index
    %375 = vector.load %arg4[%c0_178, %c0_179] : memref<32x32xbf16, #tpu.memory_space<vmem>>, vector<32x32xbf16>
    %cst_180 = arith.constant dense<0.000000e+00> : vector<448x32xf32>
    %376 = tpu.matmul %374, %375, %cst_180 {dimension_numbers = #tpu.dot_dimension_numbers<[1], [0], [0], [1], [0, 0, 1, 1], [], []>} : vector<448x32xbf16>, vector<32x32xbf16>, vector<448x32xf32> -> vector<448x32xf32>
    %c0_181 = arith.constant 0 : index
    %c0_182 = arith.constant 0 : index
    %377 = vector.load %arg5[%c0_181, %c0_182] : memref<1x32xf32, #tpu.memory_space<vmem>>, vector<1x32xf32>
    %378 = vector.broadcast %377 : vector<1x32xf32> to vector<448x32xf32>
    %379 = arith.addf %376, %378 : vector<448x32xf32>
    %cst_183 = arith.constant 0.000000e+00 : f32
    %380 = vector.broadcast %cst_183 : f32 to vector<16x32xf32>
    %false_184 = arith.constant false
    %381 = vector.broadcast %false_184 : i1 to vector<16x32xi1>
    %cst_185 = arith.constant 0.000000e+00 : f32
    %382 = vector.broadcast %cst_185 : f32 to vector<16x32xf32>
    %383 = arith.select %381, %382, %380 : vector<16x32xi1>, vector<16x32xf32>
    %cst_186 = arith.constant 2.000000e-01 : f32
    %384 = vector.broadcast %cst_186 : f32 to vector<16x32xf32>
    %385 = arith.mulf %383, %384 : vector<16x32xf32>
    %386 = vector.extract_strided_slice %379 {offsets = [0, 0], sizes = [16, 32], strides = [1, 1]} : vector<448x32xf32> to vector<16x32xf32>
    %387 = arith.addf %385, %386 : vector<16x32xf32>
    %cst_187 = arith.constant 5.000000e-01 : f32
    %388 = vector.broadcast %cst_187 : f32 to vector<16x32xf32>
    %389 = arith.cmpf ogt, %387, %388 : vector<16x32xf32>
    %cst_188 = arith.constant 1.000000e+00 : f32
    %cst_189 = arith.constant 0.000000e+00 : f32
    %390 = vector.broadcast %cst_188 : f32 to vector<16x32xf32>
    %391 = vector.broadcast %cst_189 : f32 to vector<16x32xf32>
    %392 = arith.select %389, %390, %391 : vector<16x32xi1>, vector<16x32xf32>
    %393 = arith.truncf %392 : vector<16x32xf32> to vector<16x32xbf16>
    %c0_190 = arith.constant 0 : index
    %c0_191 = arith.constant 0 : index
    %394 = vector.load %arg12[%c0_190, %c0_191] : memref<448x32xbf16, #tpu.memory_space<vmem>>, vector<16x32xbf16>
    tpu.vector_store %arg12[%c0_190, %c0_191], %393 {strides = array<i32>} : memref<448x32xbf16, #tpu.memory_space<vmem>>, vector<16x32xbf16>,
    %cst_192 = arith.constant 0.000000e+00 : f32
    %395 = vector.broadcast %cst_192 : f32 to vector<16x32xf32>
    %396 = arith.select %389, %395, %387 : vector<16x32xi1>, vector<16x32xf32>
    %cst_193 = arith.constant 2.000000e-01 : f32
    %397 = vector.broadcast %cst_193 : f32 to vector<16x32xf32>
    %398 = arith.mulf %396, %397 : vector<16x32xf32>
    %399 = vector.extract_strided_slice %379 {offsets = [16, 0], sizes = [16, 32], strides = [1, 1]} : vector<448x32xf32> to vector<16x32xf32>
    %400 = arith.addf %398, %399 : vector<16x32xf32>
    %cst_194 = arith.constant 5.000000e-01 : f32
    %401 = vector.broadcast %cst_194 : f32 to vector<16x32xf32>
    %402 = arith.cmpf ogt, %400, %401 : vector<16x32xf32>
    %cst_195 = arith.constant 1.000000e+00 : f32
    %cst_196 = arith.constant 0.000000e+00 : f32
    %403 = vector.broadcast %cst_195 : f32 to vector<16x32xf32>
    %404 = vector.broadcast %cst_196 : f32 to vector<16x32xf32>
    %405 = arith.select %402, %403, %404 : vector<16x32xi1>, vector<16x32xf32>
    %406 = arith.truncf %405 : vector<16x32xf32> to vector<16x32xbf16>
    %c16_197 = arith.constant 16 : index
    %c0_198 = arith.constant 0 : index
    %407 = vector.load %arg12[%c16_197, %c0_198] : memref<448x32xbf16, #tpu.memory_space<vmem>>, vector<16x32xbf16>
    tpu.vector_store %arg12[%c16_197, %c0_198], %406 {strides = array<i32>} : memref<448x32xbf16, #tpu.memory_space<vmem>>, vector<16x32xbf16>,
    %cst_199 = arith.constant 0.000000e+00 : f32
    %408 = vector.broadcast %cst_199 : f32 to vector<16x32xf32>
    %409 = arith.select %402, %408, %400 : vector<16x32xi1>, vector<16x32xf32>
    %cst_200 = arith.constant 2.000000e-01 : f32
    %410 = vector.broadcast %cst_200 : f32 to vector<16x32xf32>
    %411 = arith.mulf %409, %410 : vector<16x32xf32>
    %412 = vector.extract_strided_slice %379 {offsets = [32, 0], sizes = [16, 32], strides = [1, 1]} : vector<448x32xf32> to vector<16x32xf32>
    %413 = arith.addf %411, %412 : vector<16x32xf32>
    %cst_201 = arith.constant 5.000000e-01 : f32
    %414 = vector.broadcast %cst_201 : f32 to vector<16x32xf32>
    %415 = arith.cmpf ogt, %413, %414 : vector<16x32xf32>
    %cst_202 = arith.constant 1.000000e+00 : f32
    %cst_203 = arith.constant 0.000000e+00 : f32
    %416 = vector.broadcast %cst_202 : f32 to vector<16x32xf32>
    %417 = vector.broadcast %cst_203 : f32 to vector<16x32xf32>
    %418 = arith.select %415, %416, %417 : vector<16x32xi1>, vector<16x32xf32>
    %419 = arith.truncf %418 : vector<16x32xf32> to vector<16x32xbf16>
    %c32_204 = arith.constant 32 : index
    %c0_205 = arith.constant 0 : index
    %420 = vector.load %arg12[%c32_204, %c0_205] : memref<448x32xbf16, #tpu.memory_space<vmem>>, vector<16x32xbf16>
    tpu.vector_store %arg12[%c32_204, %c0_205], %419 {strides = array<i32>} : memref<448x32xbf16, #tpu.memory_space<vmem>>, vector<16x32xbf16>,
    %cst_206 = arith.constant 0.000000e+00 : f32
    %421 = vector.broadcast %cst_206 : f32 to vector<16x32xf32>
    %422 = arith.select %415, %421, %413 : vector<16x32xi1>, vector<16x32xf32>
    %cst_207 = arith.constant 2.000000e-01 : f32
    %423 = vector.broadcast %cst_207 : f32 to vector<16x32xf32>
    %424 = arith.mulf %422, %423 : vector<16x32xf32>
    %425 = vector.extract_strided_slice %379 {offsets = [48, 0], sizes = [16, 32], strides = [1, 1]} : vector<448x32xf32> to vector<16x32xf32>
    %426 = arith.addf %424, %425 : vector<16x32xf32>
    %cst_208 = arith.constant 5.000000e-01 : f32
    %427 = vector.broadcast %cst_208 : f32 to vector<16x32xf32>
    %428 = arith.cmpf ogt, %426, %427 : vector<16x32xf32>
    %cst_209 = arith.constant 1.000000e+00 : f32
    %cst_210 = arith.constant 0.000000e+00 : f32
    %429 = vector.broadcast %cst_209 : f32 to vector<16x32xf32>
    %430 = vector.broadcast %cst_210 : f32 to vector<16x32xf32>
    %431 = arith.select %428, %429, %430 : vector<16x32xi1>, vector<16x32xf32>
    %432 = arith.truncf %431 : vector<16x32xf32> to vector<16x32xbf16>
    %c48_211 = arith.constant 48 : index
    %c0_212 = arith.constant 0 : index
    %433 = vector.load %arg12[%c48_211, %c0_212] : memref<448x32xbf16, #tpu.memory_space<vmem>>, vector<16x32xbf16>
    tpu.vector_store %arg12[%c48_211, %c0_212], %432 {strides = array<i32>} : memref<448x32xbf16, #tpu.memory_space<vmem>>, vector<16x32xbf16>,
    %cst_213 = arith.constant 0.000000e+00 : f32
    %434 = vector.broadcast %cst_213 : f32 to vector<16x32xf32>
    %435 = arith.select %428, %434, %426 : vector<16x32xi1>, vector<16x32xf32>
    %cst_214 = arith.constant 2.000000e-01 : f32
    %436 = vector.broadcast %cst_214 : f32 to vector<16x32xf32>
    %437 = arith.mulf %435, %436 : vector<16x32xf32>
    %438 = vector.extract_strided_slice %379 {offsets = [64, 0], sizes = [16, 32], strides = [1, 1]} : vector<448x32xf32> to vector<16x32xf32>
    %439 = arith.addf %437, %438 : vector<16x32xf32>
    %cst_215 = arith.constant 5.000000e-01 : f32
    %440 = vector.broadcast %cst_215 : f32 to vector<16x32xf32>
    %441 = arith.cmpf ogt, %439, %440 : vector<16x32xf32>
    %cst_216 = arith.constant 1.000000e+00 : f32
    %cst_217 = arith.constant 0.000000e+00 : f32
    %442 = vector.broadcast %cst_216 : f32 to vector<16x32xf32>
    %443 = vector.broadcast %cst_217 : f32 to vector<16x32xf32>
    %444 = arith.select %441, %442, %443 : vector<16x32xi1>, vector<16x32xf32>
    %445 = arith.truncf %444 : vector<16x32xf32> to vector<16x32xbf16>
    %c64_218 = arith.constant 64 : index
    %c0_219 = arith.constant 0 : index
    %446 = vector.load %arg12[%c64_218, %c0_219] : memref<448x32xbf16, #tpu.memory_space<vmem>>, vector<16x32xbf16>
    tpu.vector_store %arg12[%c64_218, %c0_219], %445 {strides = array<i32>} : memref<448x32xbf16, #tpu.memory_space<vmem>>, vector<16x32xbf16>,
    %cst_220 = arith.constant 0.000000e+00 : f32
    %447 = vector.broadcast %cst_220 : f32 to vector<16x32xf32>
    %448 = arith.select %441, %447, %439 : vector<16x32xi1>, vector<16x32xf32>
    %cst_221 = arith.constant 2.000000e-01 : f32
    %449 = vector.broadcast %cst_221 : f32 to vector<16x32xf32>
    %450 = arith.mulf %448, %449 : vector<16x32xf32>
    %451 = vector.extract_strided_slice %379 {offsets = [80, 0], sizes = [16, 32], strides = [1, 1]} : vector<448x32xf32> to vector<16x32xf32>
    %452 = arith.addf %450, %451 : vector<16x32xf32>
    %cst_222 = arith.constant 5.000000e-01 : f32
    %453 = vector.broadcast %cst_222 : f32 to vector<16x32xf32>
    %454 = arith.cmpf ogt, %452, %453 : vector<16x32xf32>
    %cst_223 = arith.constant 1.000000e+00 : f32
    %cst_224 = arith.constant 0.000000e+00 : f32
    %455 = vector.broadcast %cst_223 : f32 to vector<16x32xf32>
    %456 = vector.broadcast %cst_224 : f32 to vector<16x32xf32>
    %457 = arith.select %454, %455, %456 : vector<16x32xi1>, vector<16x32xf32>
    %458 = arith.truncf %457 : vector<16x32xf32> to vector<16x32xbf16>
    %c80_225 = arith.constant 80 : index
    %c0_226 = arith.constant 0 : index
    %459 = vector.load %arg12[%c80_225, %c0_226] : memref<448x32xbf16, #tpu.memory_space<vmem>>, vector<16x32xbf16>
    tpu.vector_store %arg12[%c80_225, %c0_226], %458 {strides = array<i32>} : memref<448x32xbf16, #tpu.memory_space<vmem>>, vector<16x32xbf16>,
    %cst_227 = arith.constant 0.000000e+00 : f32
    %460 = vector.broadcast %cst_227 : f32 to vector<16x32xf32>
    %461 = arith.select %454, %460, %452 : vector<16x32xi1>, vector<16x32xf32>
    %cst_228 = arith.constant 2.000000e-01 : f32
    %462 = vector.broadcast %cst_228 : f32 to vector<16x32xf32>
    %463 = arith.mulf %461, %462 : vector<16x32xf32>
    %464 = vector.extract_strided_slice %379 {offsets = [96, 0], sizes = [16, 32], strides = [1, 1]} : vector<448x32xf32> to vector<16x32xf32>
    %465 = arith.addf %463, %464 : vector<16x32xf32>
    %cst_229 = arith.constant 5.000000e-01 : f32
    %466 = vector.broadcast %cst_229 : f32 to vector<16x32xf32>
    %467 = arith.cmpf ogt, %465, %466 : vector<16x32xf32>
    %cst_230 = arith.constant 1.000000e+00 : f32
    %cst_231 = arith.constant 0.000000e+00 : f32
    %468 = vector.broadcast %cst_230 : f32 to vector<16x32xf32>
    %469 = vector.broadcast %cst_231 : f32 to vector<16x32xf32>
    %470 = arith.select %467, %468, %469 : vector<16x32xi1>, vector<16x32xf32>
    %471 = arith.truncf %470 : vector<16x32xf32> to vector<16x32xbf16>
    %c96_232 = arith.constant 96 : index
    %c0_233 = arith.constant 0 : index
    %472 = vector.load %arg12[%c96_232, %c0_233] : memref<448x32xbf16, #tpu.memory_space<vmem>>, vector<16x32xbf16>
    tpu.vector_store %arg12[%c96_232, %c0_233], %471 {strides = array<i32>} : memref<448x32xbf16, #tpu.memory_space<vmem>>, vector<16x32xbf16>,
    %cst_234 = arith.constant 0.000000e+00 : f32
    %473 = vector.broadcast %cst_234 : f32 to vector<16x32xf32>
    %474 = arith.select %467, %473, %465 : vector<16x32xi1>, vector<16x32xf32>
    %cst_235 = arith.constant 2.000000e-01 : f32
    %475 = vector.broadcast %cst_235 : f32 to vector<16x32xf32>
    %476 = arith.mulf %474, %475 : vector<16x32xf32>
    %477 = vector.extract_strided_slice %379 {offsets = [112, 0], sizes = [16, 32], strides = [1, 1]} : vector<448x32xf32> to vector<16x32xf32>
    %478 = arith.addf %476, %477 : vector<16x32xf32>
    %cst_236 = arith.constant 5.000000e-01 : f32
    %479 = vector.broadcast %cst_236 : f32 to vector<16x32xf32>
    %480 = arith.cmpf ogt, %478, %479 : vector<16x32xf32>
    %cst_237 = arith.constant 1.000000e+00 : f32
    %cst_238 = arith.constant 0.000000e+00 : f32
    %481 = vector.broadcast %cst_237 : f32 to vector<16x32xf32>
    %482 = vector.broadcast %cst_238 : f32 to vector<16x32xf32>
    %483 = arith.select %480, %481, %482 : vector<16x32xi1>, vector<16x32xf32>
    %484 = arith.truncf %483 : vector<16x32xf32> to vector<16x32xbf16>
    %c112_239 = arith.constant 112 : index
    %c0_240 = arith.constant 0 : index
    %485 = vector.load %arg12[%c112_239, %c0_240] : memref<448x32xbf16, #tpu.memory_space<vmem>>, vector<16x32xbf16>
    tpu.vector_store %arg12[%c112_239, %c0_240], %484 {strides = array<i32>} : memref<448x32xbf16, #tpu.memory_space<vmem>>, vector<16x32xbf16>,
    %cst_241 = arith.constant 0.000000e+00 : f32
    %486 = vector.broadcast %cst_241 : f32 to vector<16x32xf32>
    %487 = arith.select %480, %486, %478 : vector<16x32xi1>, vector<16x32xf32>
    %cst_242 = arith.constant 2.000000e-01 : f32
    %488 = vector.broadcast %cst_242 : f32 to vector<16x32xf32>
    %489 = arith.mulf %487, %488 : vector<16x32xf32>
    %490 = vector.extract_strided_slice %379 {offsets = [128, 0], sizes = [16, 32], strides = [1, 1]} : vector<448x32xf32> to vector<16x32xf32>
    %491 = arith.addf %489, %490 : vector<16x32xf32>
    %cst_243 = arith.constant 5.000000e-01 : f32
    %492 = vector.broadcast %cst_243 : f32 to vector<16x32xf32>
    %493 = arith.cmpf ogt, %491, %492 : vector<16x32xf32>
    %cst_244 = arith.constant 1.000000e+00 : f32
    %cst_245 = arith.constant 0.000000e+00 : f32
    %494 = vector.broadcast %cst_244 : f32 to vector<16x32xf32>
    %495 = vector.broadcast %cst_245 : f32 to vector<16x32xf32>
    %496 = arith.select %493, %494, %495 : vector<16x32xi1>, vector<16x32xf32>
    %497 = arith.truncf %496 : vector<16x32xf32> to vector<16x32xbf16>
    %c128_246 = arith.constant 128 : index
    %c0_247 = arith.constant 0 : index
    %498 = vector.load %arg12[%c128_246, %c0_247] : memref<448x32xbf16, #tpu.memory_space<vmem>>, vector<16x32xbf16>
    tpu.vector_store %arg12[%c128_246, %c0_247], %497 {strides = array<i32>} : memref<448x32xbf16, #tpu.memory_space<vmem>>, vector<16x32xbf16>,
    %cst_248 = arith.constant 0.000000e+00 : f32
    %499 = vector.broadcast %cst_248 : f32 to vector<16x32xf32>
    %500 = arith.select %493, %499, %491 : vector<16x32xi1>, vector<16x32xf32>
    %cst_249 = arith.constant 2.000000e-01 : f32
    %501 = vector.broadcast %cst_249 : f32 to vector<16x32xf32>
    %502 = arith.mulf %500, %501 : vector<16x32xf32>
    %503 = vector.extract_strided_slice %379 {offsets = [144, 0], sizes = [16, 32], strides = [1, 1]} : vector<448x32xf32> to vector<16x32xf32>
    %504 = arith.addf %502, %503 : vector<16x32xf32>
    %cst_250 = arith.constant 5.000000e-01 : f32
    %505 = vector.broadcast %cst_250 : f32 to vector<16x32xf32>
    %506 = arith.cmpf ogt, %504, %505 : vector<16x32xf32>
    %cst_251 = arith.constant 1.000000e+00 : f32
    %cst_252 = arith.constant 0.000000e+00 : f32
    %507 = vector.broadcast %cst_251 : f32 to vector<16x32xf32>
    %508 = vector.broadcast %cst_252 : f32 to vector<16x32xf32>
    %509 = arith.select %506, %507, %508 : vector<16x32xi1>, vector<16x32xf32>
    %510 = arith.truncf %509 : vector<16x32xf32> to vector<16x32xbf16>
    %c144_253 = arith.constant 144 : index
    %c0_254 = arith.constant 0 : index
    %511 = vector.load %arg12[%c144_253, %c0_254] : memref<448x32xbf16, #tpu.memory_space<vmem>>, vector<16x32xbf16>
    tpu.vector_store %arg12[%c144_253, %c0_254], %510 {strides = array<i32>} : memref<448x32xbf16, #tpu.memory_space<vmem>>, vector<16x32xbf16>,
    %cst_255 = arith.constant 0.000000e+00 : f32
    %512 = vector.broadcast %cst_255 : f32 to vector<16x32xf32>
    %513 = arith.select %506, %512, %504 : vector<16x32xi1>, vector<16x32xf32>
    %cst_256 = arith.constant 2.000000e-01 : f32
    %514 = vector.broadcast %cst_256 : f32 to vector<16x32xf32>
    %515 = arith.mulf %513, %514 : vector<16x32xf32>
    %516 = vector.extract_strided_slice %379 {offsets = [160, 0], sizes = [16, 32], strides = [1, 1]} : vector<448x32xf32> to vector<16x32xf32>
    %517 = arith.addf %515, %516 : vector<16x32xf32>
    %cst_257 = arith.constant 5.000000e-01 : f32
    %518 = vector.broadcast %cst_257 : f32 to vector<16x32xf32>
    %519 = arith.cmpf ogt, %517, %518 : vector<16x32xf32>
    %cst_258 = arith.constant 1.000000e+00 : f32
    %cst_259 = arith.constant 0.000000e+00 : f32
    %520 = vector.broadcast %cst_258 : f32 to vector<16x32xf32>
    %521 = vector.broadcast %cst_259 : f32 to vector<16x32xf32>
    %522 = arith.select %519, %520, %521 : vector<16x32xi1>, vector<16x32xf32>
    %523 = arith.truncf %522 : vector<16x32xf32> to vector<16x32xbf16>
    %c160_260 = arith.constant 160 : index
    %c0_261 = arith.constant 0 : index
    %524 = vector.load %arg12[%c160_260, %c0_261] : memref<448x32xbf16, #tpu.memory_space<vmem>>, vector<16x32xbf16>
    tpu.vector_store %arg12[%c160_260, %c0_261], %523 {strides = array<i32>} : memref<448x32xbf16, #tpu.memory_space<vmem>>, vector<16x32xbf16>,
    %cst_262 = arith.constant 0.000000e+00 : f32
    %525 = vector.broadcast %cst_262 : f32 to vector<16x32xf32>
    %526 = arith.select %519, %525, %517 : vector<16x32xi1>, vector<16x32xf32>
    %cst_263 = arith.constant 2.000000e-01 : f32
    %527 = vector.broadcast %cst_263 : f32 to vector<16x32xf32>
    %528 = arith.mulf %526, %527 : vector<16x32xf32>
    %529 = vector.extract_strided_slice %379 {offsets = [176, 0], sizes = [16, 32], strides = [1, 1]} : vector<448x32xf32> to vector<16x32xf32>
    %530 = arith.addf %528, %529 : vector<16x32xf32>
    %cst_264 = arith.constant 5.000000e-01 : f32
    %531 = vector.broadcast %cst_264 : f32 to vector<16x32xf32>
    %532 = arith.cmpf ogt, %530, %531 : vector<16x32xf32>
    %cst_265 = arith.constant 1.000000e+00 : f32
    %cst_266 = arith.constant 0.000000e+00 : f32
    %533 = vector.broadcast %cst_265 : f32 to vector<16x32xf32>
    %534 = vector.broadcast %cst_266 : f32 to vector<16x32xf32>
    %535 = arith.select %532, %533, %534 : vector<16x32xi1>, vector<16x32xf32>
    %536 = arith.truncf %535 : vector<16x32xf32> to vector<16x32xbf16>
    %c176_267 = arith.constant 176 : index
    %c0_268 = arith.constant 0 : index
    %537 = vector.load %arg12[%c176_267, %c0_268] : memref<448x32xbf16, #tpu.memory_space<vmem>>, vector<16x32xbf16>
    tpu.vector_store %arg12[%c176_267, %c0_268], %536 {strides = array<i32>} : memref<448x32xbf16, #tpu.memory_space<vmem>>, vector<16x32xbf16>,
    %cst_269 = arith.constant 0.000000e+00 : f32
    %538 = vector.broadcast %cst_269 : f32 to vector<16x32xf32>
    %539 = arith.select %532, %538, %530 : vector<16x32xi1>, vector<16x32xf32>
    %cst_270 = arith.constant 2.000000e-01 : f32
    %540 = vector.broadcast %cst_270 : f32 to vector<16x32xf32>
    %541 = arith.mulf %539, %540 : vector<16x32xf32>
    %542 = vector.extract_strided_slice %379 {offsets = [192, 0], sizes = [16, 32], strides = [1, 1]} : vector<448x32xf32> to vector<16x32xf32>
    %543 = arith.addf %541, %542 : vector<16x32xf32>
    %cst_271 = arith.constant 5.000000e-01 : f32
    %544 = vector.broadcast %cst_271 : f32 to vector<16x32xf32>
    %545 = arith.cmpf ogt, %543, %544 : vector<16x32xf32>
    %cst_272 = arith.constant 1.000000e+00 : f32
    %cst_273 = arith.constant 0.000000e+00 : f32
    %546 = vector.broadcast %cst_272 : f32 to vector<16x32xf32>
    %547 = vector.broadcast %cst_273 : f32 to vector<16x32xf32>
    %548 = arith.select %545, %546, %547 : vector<16x32xi1>, vector<16x32xf32>
    %549 = arith.truncf %548 : vector<16x32xf32> to vector<16x32xbf16>
    %c192_274 = arith.constant 192 : index
    %c0_275 = arith.constant 0 : index
    %550 = vector.load %arg12[%c192_274, %c0_275] : memref<448x32xbf16, #tpu.memory_space<vmem>>, vector<16x32xbf16>
    tpu.vector_store %arg12[%c192_274, %c0_275], %549 {strides = array<i32>} : memref<448x32xbf16, #tpu.memory_space<vmem>>, vector<16x32xbf16>,
    %cst_276 = arith.constant 0.000000e+00 : f32
    %551 = vector.broadcast %cst_276 : f32 to vector<16x32xf32>
    %552 = arith.select %545, %551, %543 : vector<16x32xi1>, vector<16x32xf32>
    %cst_277 = arith.constant 2.000000e-01 : f32
    %553 = vector.broadcast %cst_277 : f32 to vector<16x32xf32>
    %554 = arith.mulf %552, %553 : vector<16x32xf32>
    %555 = vector.extract_strided_slice %379 {offsets = [208, 0], sizes = [16, 32], strides = [1, 1]} : vector<448x32xf32> to vector<16x32xf32>
    %556 = arith.addf %554, %555 : vector<16x32xf32>
    %cst_278 = arith.constant 5.000000e-01 : f32
    %557 = vector.broadcast %cst_278 : f32 to vector<16x32xf32>
    %558 = arith.cmpf ogt, %556, %557 : vector<16x32xf32>
    %cst_279 = arith.constant 1.000000e+00 : f32
    %cst_280 = arith.constant 0.000000e+00 : f32
    %559 = vector.broadcast %cst_279 : f32 to vector<16x32xf32>
    %560 = vector.broadcast %cst_280 : f32 to vector<16x32xf32>
    %561 = arith.select %558, %559, %560 : vector<16x32xi1>, vector<16x32xf32>
    %562 = arith.truncf %561 : vector<16x32xf32> to vector<16x32xbf16>
    %c208_281 = arith.constant 208 : index
    %c0_282 = arith.constant 0 : index
    %563 = vector.load %arg12[%c208_281, %c0_282] : memref<448x32xbf16, #tpu.memory_space<vmem>>, vector<16x32xbf16>
    tpu.vector_store %arg12[%c208_281, %c0_282], %562 {strides = array<i32>} : memref<448x32xbf16, #tpu.memory_space<vmem>>, vector<16x32xbf16>,
    %cst_283 = arith.constant 0.000000e+00 : f32
    %564 = vector.broadcast %cst_283 : f32 to vector<16x32xf32>
    %565 = arith.select %558, %564, %556 : vector<16x32xi1>, vector<16x32xf32>
    %cst_284 = arith.constant 2.000000e-01 : f32
    %566 = vector.broadcast %cst_284 : f32 to vector<16x32xf32>
    %567 = arith.mulf %565, %566 : vector<16x32xf32>
    %568 = vector.extract_strided_slice %379 {offsets = [224, 0], sizes = [16, 32], strides = [1, 1]} : vector<448x32xf32> to vector<16x32xf32>
    %569 = arith.addf %567, %568 : vector<16x32xf32>
    %cst_285 = arith.constant 5.000000e-01 : f32
    %570 = vector.broadcast %cst_285 : f32 to vector<16x32xf32>
    %571 = arith.cmpf ogt, %569, %570 : vector<16x32xf32>
    %cst_286 = arith.constant 1.000000e+00 : f32
    %cst_287 = arith.constant 0.000000e+00 : f32
    %572 = vector.broadcast %cst_286 : f32 to vector<16x32xf32>
    %573 = vector.broadcast %cst_287 : f32 to vector<16x32xf32>
    %574 = arith.select %571, %572, %573 : vector<16x32xi1>, vector<16x32xf32>
    %575 = arith.truncf %574 : vector<16x32xf32> to vector<16x32xbf16>
    %c224_288 = arith.constant 224 : index
    %c0_289 = arith.constant 0 : index
    %576 = vector.load %arg12[%c224_288, %c0_289] : memref<448x32xbf16, #tpu.memory_space<vmem>>, vector<16x32xbf16>
    tpu.vector_store %arg12[%c224_288, %c0_289], %575 {strides = array<i32>} : memref<448x32xbf16, #tpu.memory_space<vmem>>, vector<16x32xbf16>,
    %cst_290 = arith.constant 0.000000e+00 : f32
    %577 = vector.broadcast %cst_290 : f32 to vector<16x32xf32>
    %578 = arith.select %571, %577, %569 : vector<16x32xi1>, vector<16x32xf32>
    %cst_291 = arith.constant 2.000000e-01 : f32
    %579 = vector.broadcast %cst_291 : f32 to vector<16x32xf32>
    %580 = arith.mulf %578, %579 : vector<16x32xf32>
    %581 = vector.extract_strided_slice %379 {offsets = [240, 0], sizes = [16, 32], strides = [1, 1]} : vector<448x32xf32> to vector<16x32xf32>
    %582 = arith.addf %580, %581 : vector<16x32xf32>
    %cst_292 = arith.constant 5.000000e-01 : f32
    %583 = vector.broadcast %cst_292 : f32 to vector<16x32xf32>
    %584 = arith.cmpf ogt, %582, %583 : vector<16x32xf32>
    %cst_293 = arith.constant 1.000000e+00 : f32
    %cst_294 = arith.constant 0.000000e+00 : f32
    %585 = vector.broadcast %cst_293 : f32 to vector<16x32xf32>
    %586 = vector.broadcast %cst_294 : f32 to vector<16x32xf32>
    %587 = arith.select %584, %585, %586 : vector<16x32xi1>, vector<16x32xf32>
    %588 = arith.truncf %587 : vector<16x32xf32> to vector<16x32xbf16>
    %c240_295 = arith.constant 240 : index
    %c0_296 = arith.constant 0 : index
    %589 = vector.load %arg12[%c240_295, %c0_296] : memref<448x32xbf16, #tpu.memory_space<vmem>>, vector<16x32xbf16>
    tpu.vector_store %arg12[%c240_295, %c0_296], %588 {strides = array<i32>} : memref<448x32xbf16, #tpu.memory_space<vmem>>, vector<16x32xbf16>,
    %cst_297 = arith.constant 0.000000e+00 : f32
    %590 = vector.broadcast %cst_297 : f32 to vector<16x32xf32>
    %591 = arith.select %584, %590, %582 : vector<16x32xi1>, vector<16x32xf32>
    %cst_298 = arith.constant 2.000000e-01 : f32
    %592 = vector.broadcast %cst_298 : f32 to vector<16x32xf32>
    %593 = arith.mulf %591, %592 : vector<16x32xf32>
    %594 = vector.extract_strided_slice %379 {offsets = [256, 0], sizes = [16, 32], strides = [1, 1]} : vector<448x32xf32> to vector<16x32xf32>
    %595 = arith.addf %593, %594 : vector<16x32xf32>
    %cst_299 = arith.constant 5.000000e-01 : f32
    %596 = vector.broadcast %cst_299 : f32 to vector<16x32xf32>
    %597 = arith.cmpf ogt, %595, %596 : vector<16x32xf32>
    %cst_300 = arith.constant 1.000000e+00 : f32
    %cst_301 = arith.constant 0.000000e+00 : f32
    %598 = vector.broadcast %cst_300 : f32 to vector<16x32xf32>
    %599 = vector.broadcast %cst_301 : f32 to vector<16x32xf32>
    %600 = arith.select %597, %598, %599 : vector<16x32xi1>, vector<16x32xf32>
    %601 = arith.truncf %600 : vector<16x32xf32> to vector<16x32xbf16>
    %c256_302 = arith.constant 256 : index
    %c0_303 = arith.constant 0 : index
    %602 = vector.load %arg12[%c256_302, %c0_303] : memref<448x32xbf16, #tpu.memory_space<vmem>>, vector<16x32xbf16>
    tpu.vector_store %arg12[%c256_302, %c0_303], %601 {strides = array<i32>} : memref<448x32xbf16, #tpu.memory_space<vmem>>, vector<16x32xbf16>,
    %cst_304 = arith.constant 0.000000e+00 : f32
    %603 = vector.broadcast %cst_304 : f32 to vector<16x32xf32>
    %604 = arith.select %597, %603, %595 : vector<16x32xi1>, vector<16x32xf32>
    %cst_305 = arith.constant 2.000000e-01 : f32
    %605 = vector.broadcast %cst_305 : f32 to vector<16x32xf32>
    %606 = arith.mulf %604, %605 : vector<16x32xf32>
    %607 = vector.extract_strided_slice %379 {offsets = [272, 0], sizes = [16, 32], strides = [1, 1]} : vector<448x32xf32> to vector<16x32xf32>
    %608 = arith.addf %606, %607 : vector<16x32xf32>
    %cst_306 = arith.constant 5.000000e-01 : f32
    %609 = vector.broadcast %cst_306 : f32 to vector<16x32xf32>
    %610 = arith.cmpf ogt, %608, %609 : vector<16x32xf32>
    %cst_307 = arith.constant 1.000000e+00 : f32
    %cst_308 = arith.constant 0.000000e+00 : f32
    %611 = vector.broadcast %cst_307 : f32 to vector<16x32xf32>
    %612 = vector.broadcast %cst_308 : f32 to vector<16x32xf32>
    %613 = arith.select %610, %611, %612 : vector<16x32xi1>, vector<16x32xf32>
    %614 = arith.truncf %613 : vector<16x32xf32> to vector<16x32xbf16>
    %c272_309 = arith.constant 272 : index
    %c0_310 = arith.constant 0 : index
    %615 = vector.load %arg12[%c272_309, %c0_310] : memref<448x32xbf16, #tpu.memory_space<vmem>>, vector<16x32xbf16>
    tpu.vector_store %arg12[%c272_309, %c0_310], %614 {strides = array<i32>} : memref<448x32xbf16, #tpu.memory_space<vmem>>, vector<16x32xbf16>,
    %cst_311 = arith.constant 0.000000e+00 : f32
    %616 = vector.broadcast %cst_311 : f32 to vector<16x32xf32>
    %617 = arith.select %610, %616, %608 : vector<16x32xi1>, vector<16x32xf32>
    %cst_312 = arith.constant 2.000000e-01 : f32
    %618 = vector.broadcast %cst_312 : f32 to vector<16x32xf32>
    %619 = arith.mulf %617, %618 : vector<16x32xf32>
    %620 = vector.extract_strided_slice %379 {offsets = [288, 0], sizes = [16, 32], strides = [1, 1]} : vector<448x32xf32> to vector<16x32xf32>
    %621 = arith.addf %619, %620 : vector<16x32xf32>
    %cst_313 = arith.constant 5.000000e-01 : f32
    %622 = vector.broadcast %cst_313 : f32 to vector<16x32xf32>
    %623 = arith.cmpf ogt, %621, %622 : vector<16x32xf32>
    %cst_314 = arith.constant 1.000000e+00 : f32
    %cst_315 = arith.constant 0.000000e+00 : f32
    %624 = vector.broadcast %cst_314 : f32 to vector<16x32xf32>
    %625 = vector.broadcast %cst_315 : f32 to vector<16x32xf32>
    %626 = arith.select %623, %624, %625 : vector<16x32xi1>, vector<16x32xf32>
    %627 = arith.truncf %626 : vector<16x32xf32> to vector<16x32xbf16>
    %c288_316 = arith.constant 288 : index
    %c0_317 = arith.constant 0 : index
    %628 = vector.load %arg12[%c288_316, %c0_317] : memref<448x32xbf16, #tpu.memory_space<vmem>>, vector<16x32xbf16>
    tpu.vector_store %arg12[%c288_316, %c0_317], %627 {strides = array<i32>} : memref<448x32xbf16, #tpu.memory_space<vmem>>, vector<16x32xbf16>,
    %cst_318 = arith.constant 0.000000e+00 : f32
    %629 = vector.broadcast %cst_318 : f32 to vector<16x32xf32>
    %630 = arith.select %623, %629, %621 : vector<16x32xi1>, vector<16x32xf32>
    %cst_319 = arith.constant 2.000000e-01 : f32
    %631 = vector.broadcast %cst_319 : f32 to vector<16x32xf32>
    %632 = arith.mulf %630, %631 : vector<16x32xf32>
    %633 = vector.extract_strided_slice %379 {offsets = [304, 0], sizes = [16, 32], strides = [1, 1]} : vector<448x32xf32> to vector<16x32xf32>
    %634 = arith.addf %632, %633 : vector<16x32xf32>
    %cst_320 = arith.constant 5.000000e-01 : f32
    %635 = vector.broadcast %cst_320 : f32 to vector<16x32xf32>
    %636 = arith.cmpf ogt, %634, %635 : vector<16x32xf32>
    %cst_321 = arith.constant 1.000000e+00 : f32
    %cst_322 = arith.constant 0.000000e+00 : f32
    %637 = vector.broadcast %cst_321 : f32 to vector<16x32xf32>
    %638 = vector.broadcast %cst_322 : f32 to vector<16x32xf32>
    %639 = arith.select %636, %637, %638 : vector<16x32xi1>, vector<16x32xf32>
    %640 = arith.truncf %639 : vector<16x32xf32> to vector<16x32xbf16>
    %c304_323 = arith.constant 304 : index
    %c0_324 = arith.constant 0 : index
    %641 = vector.load %arg12[%c304_323, %c0_324] : memref<448x32xbf16, #tpu.memory_space<vmem>>, vector<16x32xbf16>
    tpu.vector_store %arg12[%c304_323, %c0_324], %640 {strides = array<i32>} : memref<448x32xbf16, #tpu.memory_space<vmem>>, vector<16x32xbf16>,
    %cst_325 = arith.constant 0.000000e+00 : f32
    %642 = vector.broadcast %cst_325 : f32 to vector<16x32xf32>
    %643 = arith.select %636, %642, %634 : vector<16x32xi1>, vector<16x32xf32>
    %cst_326 = arith.constant 2.000000e-01 : f32
    %644 = vector.broadcast %cst_326 : f32 to vector<16x32xf32>
    %645 = arith.mulf %643, %644 : vector<16x32xf32>
    %646 = vector.extract_strided_slice %379 {offsets = [320, 0], sizes = [16, 32], strides = [1, 1]} : vector<448x32xf32> to vector<16x32xf32>
    %647 = arith.addf %645, %646 : vector<16x32xf32>
    %cst_327 = arith.constant 5.000000e-01 : f32
    %648 = vector.broadcast %cst_327 : f32 to vector<16x32xf32>
    %649 = arith.cmpf ogt, %647, %648 : vector<16x32xf32>
    %cst_328 = arith.constant 1.000000e+00 : f32
    %cst_329 = arith.constant 0.000000e+00 : f32
    %650 = vector.broadcast %cst_328 : f32 to vector<16x32xf32>
    %651 = vector.broadcast %cst_329 : f32 to vector<16x32xf32>
    %652 = arith.select %649, %650, %651 : vector<16x32xi1>, vector<16x32xf32>
    %653 = arith.truncf %652 : vector<16x32xf32> to vector<16x32xbf16>
    %c320_330 = arith.constant 320 : index
    %c0_331 = arith.constant 0 : index
    %654 = vector.load %arg12[%c320_330, %c0_331] : memref<448x32xbf16, #tpu.memory_space<vmem>>, vector<16x32xbf16>
    tpu.vector_store %arg12[%c320_330, %c0_331], %653 {strides = array<i32>} : memref<448x32xbf16, #tpu.memory_space<vmem>>, vector<16x32xbf16>,
    %cst_332 = arith.constant 0.000000e+00 : f32
    %655 = vector.broadcast %cst_332 : f32 to vector<16x32xf32>
    %656 = arith.select %649, %655, %647 : vector<16x32xi1>, vector<16x32xf32>
    %cst_333 = arith.constant 2.000000e-01 : f32
    %657 = vector.broadcast %cst_333 : f32 to vector<16x32xf32>
    %658 = arith.mulf %656, %657 : vector<16x32xf32>
    %659 = vector.extract_strided_slice %379 {offsets = [336, 0], sizes = [16, 32], strides = [1, 1]} : vector<448x32xf32> to vector<16x32xf32>
    %660 = arith.addf %658, %659 : vector<16x32xf32>
    %cst_334 = arith.constant 5.000000e-01 : f32
    %661 = vector.broadcast %cst_334 : f32 to vector<16x32xf32>
    %662 = arith.cmpf ogt, %660, %661 : vector<16x32xf32>
    %cst_335 = arith.constant 1.000000e+00 : f32
    %cst_336 = arith.constant 0.000000e+00 : f32
    %663 = vector.broadcast %cst_335 : f32 to vector<16x32xf32>
    %664 = vector.broadcast %cst_336 : f32 to vector<16x32xf32>
    %665 = arith.select %662, %663, %664 : vector<16x32xi1>, vector<16x32xf32>
    %666 = arith.truncf %665 : vector<16x32xf32> to vector<16x32xbf16>
    %c336_337 = arith.constant 336 : index
    %c0_338 = arith.constant 0 : index
    %667 = vector.load %arg12[%c336_337, %c0_338] : memref<448x32xbf16, #tpu.memory_space<vmem>>, vector<16x32xbf16>
    tpu.vector_store %arg12[%c336_337, %c0_338], %666 {strides = array<i32>} : memref<448x32xbf16, #tpu.memory_space<vmem>>, vector<16x32xbf16>,
    %cst_339 = arith.constant 0.000000e+00 : f32
    %668 = vector.broadcast %cst_339 : f32 to vector<16x32xf32>
    %669 = arith.select %662, %668, %660 : vector<16x32xi1>, vector<16x32xf32>
    %cst_340 = arith.constant 2.000000e-01 : f32
    %670 = vector.broadcast %cst_340 : f32 to vector<16x32xf32>
    %671 = arith.mulf %669, %670 : vector<16x32xf32>
    %672 = vector.extract_strided_slice %379 {offsets = [352, 0], sizes = [16, 32], strides = [1, 1]} : vector<448x32xf32> to vector<16x32xf32>
    %673 = arith.addf %671, %672 : vector<16x32xf32>
    %cst_341 = arith.constant 5.000000e-01 : f32
    %674 = vector.broadcast %cst_341 : f32 to vector<16x32xf32>
    %675 = arith.cmpf ogt, %673, %674 : vector<16x32xf32>
    %cst_342 = arith.constant 1.000000e+00 : f32
    %cst_343 = arith.constant 0.000000e+00 : f32
    %676 = vector.broadcast %cst_342 : f32 to vector<16x32xf32>
    %677 = vector.broadcast %cst_343 : f32 to vector<16x32xf32>
    %678 = arith.select %675, %676, %677 : vector<16x32xi1>, vector<16x32xf32>
    %679 = arith.truncf %678 : vector<16x32xf32> to vector<16x32xbf16>
    %c352_344 = arith.constant 352 : index
    %c0_345 = arith.constant 0 : index
    %680 = vector.load %arg12[%c352_344, %c0_345] : memref<448x32xbf16, #tpu.memory_space<vmem>>, vector<16x32xbf16>
    tpu.vector_store %arg12[%c352_344, %c0_345], %679 {strides = array<i32>} : memref<448x32xbf16, #tpu.memory_space<vmem>>, vector<16x32xbf16>,
    %cst_346 = arith.constant 0.000000e+00 : f32
    %681 = vector.broadcast %cst_346 : f32 to vector<16x32xf32>
    %682 = arith.select %675, %681, %673 : vector<16x32xi1>, vector<16x32xf32>
    %cst_347 = arith.constant 2.000000e-01 : f32
    %683 = vector.broadcast %cst_347 : f32 to vector<16x32xf32>
    %684 = arith.mulf %682, %683 : vector<16x32xf32>
    %685 = vector.extract_strided_slice %379 {offsets = [368, 0], sizes = [16, 32], strides = [1, 1]} : vector<448x32xf32> to vector<16x32xf32>
    %686 = arith.addf %684, %685 : vector<16x32xf32>
    %cst_348 = arith.constant 5.000000e-01 : f32
    %687 = vector.broadcast %cst_348 : f32 to vector<16x32xf32>
    %688 = arith.cmpf ogt, %686, %687 : vector<16x32xf32>
    %cst_349 = arith.constant 1.000000e+00 : f32
    %cst_350 = arith.constant 0.000000e+00 : f32
    %689 = vector.broadcast %cst_349 : f32 to vector<16x32xf32>
    %690 = vector.broadcast %cst_350 : f32 to vector<16x32xf32>
    %691 = arith.select %688, %689, %690 : vector<16x32xi1>, vector<16x32xf32>
    %692 = arith.truncf %691 : vector<16x32xf32> to vector<16x32xbf16>
    %c368_351 = arith.constant 368 : index
    %c0_352 = arith.constant 0 : index
    %693 = vector.load %arg12[%c368_351, %c0_352] : memref<448x32xbf16, #tpu.memory_space<vmem>>, vector<16x32xbf16>
    tpu.vector_store %arg12[%c368_351, %c0_352], %692 {strides = array<i32>} : memref<448x32xbf16, #tpu.memory_space<vmem>>, vector<16x32xbf16>,
    %cst_353 = arith.constant 0.000000e+00 : f32
    %694 = vector.broadcast %cst_353 : f32 to vector<16x32xf32>
    %695 = arith.select %688, %694, %686 : vector<16x32xi1>, vector<16x32xf32>
    %cst_354 = arith.constant 2.000000e-01 : f32
    %696 = vector.broadcast %cst_354 : f32 to vector<16x32xf32>
    %697 = arith.mulf %695, %696 : vector<16x32xf32>
    %698 = vector.extract_strided_slice %379 {offsets = [384, 0], sizes = [16, 32], strides = [1, 1]} : vector<448x32xf32> to vector<16x32xf32>
    %699 = arith.addf %697, %698 : vector<16x32xf32>
    %cst_355 = arith.constant 5.000000e-01 : f32
    %700 = vector.broadcast %cst_355 : f32 to vector<16x32xf32>
    %701 = arith.cmpf ogt, %699, %700 : vector<16x32xf32>
    %cst_356 = arith.constant 1.000000e+00 : f32
    %cst_357 = arith.constant 0.000000e+00 : f32
    %702 = vector.broadcast %cst_356 : f32 to vector<16x32xf32>
    %703 = vector.broadcast %cst_357 : f32 to vector<16x32xf32>
    %704 = arith.select %701, %702, %703 : vector<16x32xi1>, vector<16x32xf32>
    %705 = arith.truncf %704 : vector<16x32xf32> to vector<16x32xbf16>
    %c384_358 = arith.constant 384 : index
    %c0_359 = arith.constant 0 : index
    %706 = vector.load %arg12[%c384_358, %c0_359] : memref<448x32xbf16, #tpu.memory_space<vmem>>, vector<16x32xbf16>
    tpu.vector_store %arg12[%c384_358, %c0_359], %705 {strides = array<i32>} : memref<448x32xbf16, #tpu.memory_space<vmem>>, vector<16x32xbf16>,
    %cst_360 = arith.constant 0.000000e+00 : f32
    %707 = vector.broadcast %cst_360 : f32 to vector<16x32xf32>
    %708 = arith.select %701, %707, %699 : vector<16x32xi1>, vector<16x32xf32>
    %cst_361 = arith.constant 2.000000e-01 : f32
    %709 = vector.broadcast %cst_361 : f32 to vector<16x32xf32>
    %710 = arith.mulf %708, %709 : vector<16x32xf32>
    %711 = vector.extract_strided_slice %379 {offsets = [400, 0], sizes = [16, 32], strides = [1, 1]} : vector<448x32xf32> to vector<16x32xf32>
    %712 = arith.addf %710, %711 : vector<16x32xf32>
    %cst_362 = arith.constant 5.000000e-01 : f32
    %713 = vector.broadcast %cst_362 : f32 to vector<16x32xf32>
    %714 = arith.cmpf ogt, %712, %713 : vector<16x32xf32>
    %cst_363 = arith.constant 1.000000e+00 : f32
    %cst_364 = arith.constant 0.000000e+00 : f32
    %715 = vector.broadcast %cst_363 : f32 to vector<16x32xf32>
    %716 = vector.broadcast %cst_364 : f32 to vector<16x32xf32>
    %717 = arith.select %714, %715, %716 : vector<16x32xi1>, vector<16x32xf32>
    %718 = arith.truncf %717 : vector<16x32xf32> to vector<16x32xbf16>
    %c400_365 = arith.constant 400 : index
    %c0_366 = arith.constant 0 : index
    %719 = vector.load %arg12[%c400_365, %c0_366] : memref<448x32xbf16, #tpu.memory_space<vmem>>, vector<16x32xbf16>
    tpu.vector_store %arg12[%c400_365, %c0_366], %718 {strides = array<i32>} : memref<448x32xbf16, #tpu.memory_space<vmem>>, vector<16x32xbf16>,
    %cst_367 = arith.constant 0.000000e+00 : f32
    %720 = vector.broadcast %cst_367 : f32 to vector<16x32xf32>
    %721 = arith.select %714, %720, %712 : vector<16x32xi1>, vector<16x32xf32>
    %cst_368 = arith.constant 2.000000e-01 : f32
    %722 = vector.broadcast %cst_368 : f32 to vector<16x32xf32>
    %723 = arith.mulf %721, %722 : vector<16x32xf32>
    %724 = vector.extract_strided_slice %379 {offsets = [416, 0], sizes = [16, 32], strides = [1, 1]} : vector<448x32xf32> to vector<16x32xf32>
    %725 = arith.addf %723, %724 : vector<16x32xf32>
    %cst_369 = arith.constant 5.000000e-01 : f32
    %726 = vector.broadcast %cst_369 : f32 to vector<16x32xf32>
    %727 = arith.cmpf ogt, %725, %726 : vector<16x32xf32>
    %cst_370 = arith.constant 1.000000e+00 : f32
    %cst_371 = arith.constant 0.000000e+00 : f32
    %728 = vector.broadcast %cst_370 : f32 to vector<16x32xf32>
    %729 = vector.broadcast %cst_371 : f32 to vector<16x32xf32>
    %730 = arith.select %727, %728, %729 : vector<16x32xi1>, vector<16x32xf32>
    %731 = arith.truncf %730 : vector<16x32xf32> to vector<16x32xbf16>
    %c416_372 = arith.constant 416 : index
    %c0_373 = arith.constant 0 : index
    %732 = vector.load %arg12[%c416_372, %c0_373] : memref<448x32xbf16, #tpu.memory_space<vmem>>, vector<16x32xbf16>
    tpu.vector_store %arg12[%c416_372, %c0_373], %731 {strides = array<i32>} : memref<448x32xbf16, #tpu.memory_space<vmem>>, vector<16x32xbf16>,
    %cst_374 = arith.constant 0.000000e+00 : f32
    %733 = vector.broadcast %cst_374 : f32 to vector<16x32xf32>
    %734 = arith.select %727, %733, %725 : vector<16x32xi1>, vector<16x32xf32>
    %cst_375 = arith.constant 2.000000e-01 : f32
    %735 = vector.broadcast %cst_375 : f32 to vector<16x32xf32>
    %736 = arith.mulf %734, %735 : vector<16x32xf32>
    %737 = vector.extract_strided_slice %379 {offsets = [432, 0], sizes = [16, 32], strides = [1, 1]} : vector<448x32xf32> to vector<16x32xf32>
    %738 = arith.addf %736, %737 : vector<16x32xf32>
    %cst_376 = arith.constant 5.000000e-01 : f32
    %739 = vector.broadcast %cst_376 : f32 to vector<16x32xf32>
    %740 = arith.cmpf ogt, %738, %739 : vector<16x32xf32>
    %cst_377 = arith.constant 1.000000e+00 : f32
    %cst_378 = arith.constant 0.000000e+00 : f32
    %741 = vector.broadcast %cst_377 : f32 to vector<16x32xf32>
    %742 = vector.broadcast %cst_378 : f32 to vector<16x32xf32>
    %743 = arith.select %740, %741, %742 : vector<16x32xi1>, vector<16x32xf32>
    %744 = arith.truncf %743 : vector<16x32xf32> to vector<16x32xbf16>
    %c432_379 = arith.constant 432 : index
    %c0_380 = arith.constant 0 : index
    %745 = vector.load %arg12[%c432_379, %c0_380] : memref<448x32xbf16, #tpu.memory_space<vmem>>, vector<16x32xbf16>
    tpu.vector_store %arg12[%c432_379, %c0_380], %744 {strides = array<i32>} : memref<448x32xbf16, #tpu.memory_space<vmem>>, vector<16x32xbf16>,
    %c0_381 = arith.constant 0 : index
    %c0_382 = arith.constant 0 : index
    %746 = vector.load %arg12[%c0_381, %c0_382] : memref<448x32xbf16, #tpu.memory_space<vmem>>, vector<448x32xbf16>
    %c0_383 = arith.constant 0 : index
    %c0_384 = arith.constant 0 : index
    %747 = vector.load %arg6[%c0_383, %c0_384] : memref<32x32xbf16, #tpu.memory_space<vmem>>, vector<32x32xbf16>
    %cst_385 = arith.constant dense<0.000000e+00> : vector<448x32xf32>
    %748 = tpu.matmul %746, %747, %cst_385 {dimension_numbers = #tpu.dot_dimension_numbers<[1], [0], [0], [1], [0, 0, 1, 1], [], []>} : vector<448x32xbf16>, vector<32x32xbf16>, vector<448x32xf32> -> vector<448x32xf32>
    %c0_386 = arith.constant 0 : index
    %c0_387 = arith.constant 0 : index
    %749 = vector.load %arg7[%c0_386, %c0_387] : memref<1x32xf32, #tpu.memory_space<vmem>>, vector<1x32xf32>
    %750 = vector.broadcast %749 : vector<1x32xf32> to vector<448x32xf32>
    %751 = arith.addf %748, %750 : vector<448x32xf32>
    %cst_388 = arith.constant 0.000000e+00 : f32
    %752 = vector.broadcast %cst_388 : f32 to vector<16x32xf32>
    %false_389 = arith.constant false
    %753 = vector.broadcast %false_389 : i1 to vector<16x32xi1>
    %cst_390 = arith.constant 0.000000e+00 : f32
    %754 = vector.broadcast %cst_390 : f32 to vector<16x32xf32>
    %cst_391 = arith.constant 0.000000e+00 : f32
    %755 = vector.broadcast %cst_391 : f32 to vector<16x32xf32>
    %756 = arith.select %753, %755, %752 : vector<16x32xi1>, vector<16x32xf32>
    %cst_392 = arith.constant 2.000000e-01 : f32
    %757 = vector.broadcast %cst_392 : f32 to vector<16x32xf32>
    %758 = arith.mulf %756, %757 : vector<16x32xf32>
    %759 = vector.extract_strided_slice %751 {offsets = [0, 0], sizes = [16, 32], strides = [1, 1]} : vector<448x32xf32> to vector<16x32xf32>
    %760 = arith.addf %758, %759 : vector<16x32xf32>
    %cst_393 = arith.constant 5.000000e-01 : f32
    %761 = vector.broadcast %cst_393 : f32 to vector<16x32xf32>
    %762 = arith.cmpf ogt, %760, %761 : vector<16x32xf32>
    %cst_394 = arith.constant 1.000000e+00 : f32
    %cst_395 = arith.constant 0.000000e+00 : f32
    %763 = vector.broadcast %cst_394 : f32 to vector<16x32xf32>
    %764 = vector.broadcast %cst_395 : f32 to vector<16x32xf32>
    %765 = arith.select %762, %763, %764 : vector<16x32xi1>, vector<16x32xf32>
    %766 = arith.addf %754, %765 : vector<16x32xf32>
    %cst_396 = arith.constant 0.000000e+00 : f32
    %767 = vector.broadcast %cst_396 : f32 to vector<16x32xf32>
    %768 = arith.select %762, %767, %760 : vector<16x32xi1>, vector<16x32xf32>
    %cst_397 = arith.constant 2.000000e-01 : f32
    %769 = vector.broadcast %cst_397 : f32 to vector<16x32xf32>
    %770 = arith.mulf %768, %769 : vector<16x32xf32>
    %771 = vector.extract_strided_slice %751 {offsets = [16, 0], sizes = [16, 32], strides = [1, 1]} : vector<448x32xf32> to vector<16x32xf32>
    %772 = arith.addf %770, %771 : vector<16x32xf32>
    %cst_398 = arith.constant 5.000000e-01 : f32
    %773 = vector.broadcast %cst_398 : f32 to vector<16x32xf32>
    %774 = arith.cmpf ogt, %772, %773 : vector<16x32xf32>
    %cst_399 = arith.constant 1.000000e+00 : f32
    %cst_400 = arith.constant 0.000000e+00 : f32
    %775 = vector.broadcast %cst_399 : f32 to vector<16x32xf32>
    %776 = vector.broadcast %cst_400 : f32 to vector<16x32xf32>
    %777 = arith.select %774, %775, %776 : vector<16x32xi1>, vector<16x32xf32>
    %778 = arith.addf %766, %777 : vector<16x32xf32>
    %cst_401 = arith.constant 0.000000e+00 : f32
    %779 = vector.broadcast %cst_401 : f32 to vector<16x32xf32>
    %780 = arith.select %774, %779, %772 : vector<16x32xi1>, vector<16x32xf32>
    %cst_402 = arith.constant 2.000000e-01 : f32
    %781 = vector.broadcast %cst_402 : f32 to vector<16x32xf32>
    %782 = arith.mulf %780, %781 : vector<16x32xf32>
    %783 = vector.extract_strided_slice %751 {offsets = [32, 0], sizes = [16, 32], strides = [1, 1]} : vector<448x32xf32> to vector<16x32xf32>
    %784 = arith.addf %782, %783 : vector<16x32xf32>
    %cst_403 = arith.constant 5.000000e-01 : f32
    %785 = vector.broadcast %cst_403 : f32 to vector<16x32xf32>
    %786 = arith.cmpf ogt, %784, %785 : vector<16x32xf32>
    %cst_404 = arith.constant 1.000000e+00 : f32
    %cst_405 = arith.constant 0.000000e+00 : f32
    %787 = vector.broadcast %cst_404 : f32 to vector<16x32xf32>
    %788 = vector.broadcast %cst_405 : f32 to vector<16x32xf32>
    %789 = arith.select %786, %787, %788 : vector<16x32xi1>, vector<16x32xf32>
    %790 = arith.addf %778, %789 : vector<16x32xf32>
    %cst_406 = arith.constant 0.000000e+00 : f32
    %791 = vector.broadcast %cst_406 : f32 to vector<16x32xf32>
    %792 = arith.select %786, %791, %784 : vector<16x32xi1>, vector<16x32xf32>
    %cst_407 = arith.constant 2.000000e-01 : f32
    %793 = vector.broadcast %cst_407 : f32 to vector<16x32xf32>
    %794 = arith.mulf %792, %793 : vector<16x32xf32>
    %795 = vector.extract_strided_slice %751 {offsets = [48, 0], sizes = [16, 32], strides = [1, 1]} : vector<448x32xf32> to vector<16x32xf32>
    %796 = arith.addf %794, %795 : vector<16x32xf32>
    %cst_408 = arith.constant 5.000000e-01 : f32
    %797 = vector.broadcast %cst_408 : f32 to vector<16x32xf32>
    %798 = arith.cmpf ogt, %796, %797 : vector<16x32xf32>
    %cst_409 = arith.constant 1.000000e+00 : f32
    %cst_410 = arith.constant 0.000000e+00 : f32
    %799 = vector.broadcast %cst_409 : f32 to vector<16x32xf32>
    %800 = vector.broadcast %cst_410 : f32 to vector<16x32xf32>
    %801 = arith.select %798, %799, %800 : vector<16x32xi1>, vector<16x32xf32>
    %802 = arith.addf %790, %801 : vector<16x32xf32>
    %cst_411 = arith.constant 0.000000e+00 : f32
    %803 = vector.broadcast %cst_411 : f32 to vector<16x32xf32>
    %804 = arith.select %798, %803, %796 : vector<16x32xi1>, vector<16x32xf32>
    %cst_412 = arith.constant 2.000000e-01 : f32
    %805 = vector.broadcast %cst_412 : f32 to vector<16x32xf32>
    %806 = arith.mulf %804, %805 : vector<16x32xf32>
    %807 = vector.extract_strided_slice %751 {offsets = [64, 0], sizes = [16, 32], strides = [1, 1]} : vector<448x32xf32> to vector<16x32xf32>
    %808 = arith.addf %806, %807 : vector<16x32xf32>
    %cst_413 = arith.constant 5.000000e-01 : f32
    %809 = vector.broadcast %cst_413 : f32 to vector<16x32xf32>
    %810 = arith.cmpf ogt, %808, %809 : vector<16x32xf32>
    %cst_414 = arith.constant 1.000000e+00 : f32
    %cst_415 = arith.constant 0.000000e+00 : f32
    %811 = vector.broadcast %cst_414 : f32 to vector<16x32xf32>
    %812 = vector.broadcast %cst_415 : f32 to vector<16x32xf32>
    %813 = arith.select %810, %811, %812 : vector<16x32xi1>, vector<16x32xf32>
    %814 = arith.addf %802, %813 : vector<16x32xf32>
    %cst_416 = arith.constant 0.000000e+00 : f32
    %815 = vector.broadcast %cst_416 : f32 to vector<16x32xf32>
    %816 = arith.select %810, %815, %808 : vector<16x32xi1>, vector<16x32xf32>
    %cst_417 = arith.constant 2.000000e-01 : f32
    %817 = vector.broadcast %cst_417 : f32 to vector<16x32xf32>
    %818 = arith.mulf %816, %817 : vector<16x32xf32>
    %819 = vector.extract_strided_slice %751 {offsets = [80, 0], sizes = [16, 32], strides = [1, 1]} : vector<448x32xf32> to vector<16x32xf32>
    %820 = arith.addf %818, %819 : vector<16x32xf32>
    %cst_418 = arith.constant 5.000000e-01 : f32
    %821 = vector.broadcast %cst_418 : f32 to vector<16x32xf32>
    %822 = arith.cmpf ogt, %820, %821 : vector<16x32xf32>
    %cst_419 = arith.constant 1.000000e+00 : f32
    %cst_420 = arith.constant 0.000000e+00 : f32
    %823 = vector.broadcast %cst_419 : f32 to vector<16x32xf32>
    %824 = vector.broadcast %cst_420 : f32 to vector<16x32xf32>
    %825 = arith.select %822, %823, %824 : vector<16x32xi1>, vector<16x32xf32>
    %826 = arith.addf %814, %825 : vector<16x32xf32>
    %cst_421 = arith.constant 0.000000e+00 : f32
    %827 = vector.broadcast %cst_421 : f32 to vector<16x32xf32>
    %828 = arith.select %822, %827, %820 : vector<16x32xi1>, vector<16x32xf32>
    %cst_422 = arith.constant 2.000000e-01 : f32
    %829 = vector.broadcast %cst_422 : f32 to vector<16x32xf32>
    %830 = arith.mulf %828, %829 : vector<16x32xf32>
    %831 = vector.extract_strided_slice %751 {offsets = [96, 0], sizes = [16, 32], strides = [1, 1]} : vector<448x32xf32> to vector<16x32xf32>
    %832 = arith.addf %830, %831 : vector<16x32xf32>
    %cst_423 = arith.constant 5.000000e-01 : f32
    %833 = vector.broadcast %cst_423 : f32 to vector<16x32xf32>
    %834 = arith.cmpf ogt, %832, %833 : vector<16x32xf32>
    %cst_424 = arith.constant 1.000000e+00 : f32
    %cst_425 = arith.constant 0.000000e+00 : f32
    %835 = vector.broadcast %cst_424 : f32 to vector<16x32xf32>
    %836 = vector.broadcast %cst_425 : f32 to vector<16x32xf32>
    %837 = arith.select %834, %835, %836 : vector<16x32xi1>, vector<16x32xf32>
    %838 = arith.addf %826, %837 : vector<16x32xf32>
    %cst_426 = arith.constant 0.000000e+00 : f32
    %839 = vector.broadcast %cst_426 : f32 to vector<16x32xf32>
    %840 = arith.select %834, %839, %832 : vector<16x32xi1>, vector<16x32xf32>
    %cst_427 = arith.constant 2.000000e-01 : f32
    %841 = vector.broadcast %cst_427 : f32 to vector<16x32xf32>
    %842 = arith.mulf %840, %841 : vector<16x32xf32>
    %843 = vector.extract_strided_slice %751 {offsets = [112, 0], sizes = [16, 32], strides = [1, 1]} : vector<448x32xf32> to vector<16x32xf32>
    %844 = arith.addf %842, %843 : vector<16x32xf32>
    %cst_428 = arith.constant 5.000000e-01 : f32
    %845 = vector.broadcast %cst_428 : f32 to vector<16x32xf32>
    %846 = arith.cmpf ogt, %844, %845 : vector<16x32xf32>
    %cst_429 = arith.constant 1.000000e+00 : f32
    %cst_430 = arith.constant 0.000000e+00 : f32
    %847 = vector.broadcast %cst_429 : f32 to vector<16x32xf32>
    %848 = vector.broadcast %cst_430 : f32 to vector<16x32xf32>
    %849 = arith.select %846, %847, %848 : vector<16x32xi1>, vector<16x32xf32>
    %850 = arith.addf %838, %849 : vector<16x32xf32>
    %cst_431 = arith.constant 0.000000e+00 : f32
    %851 = vector.broadcast %cst_431 : f32 to vector<16x32xf32>
    %852 = arith.select %846, %851, %844 : vector<16x32xi1>, vector<16x32xf32>
    %cst_432 = arith.constant 2.000000e-01 : f32
    %853 = vector.broadcast %cst_432 : f32 to vector<16x32xf32>
    %854 = arith.mulf %852, %853 : vector<16x32xf32>
    %855 = vector.extract_strided_slice %751 {offsets = [128, 0], sizes = [16, 32], strides = [1, 1]} : vector<448x32xf32> to vector<16x32xf32>
    %856 = arith.addf %854, %855 : vector<16x32xf32>
    %cst_433 = arith.constant 5.000000e-01 : f32
    %857 = vector.broadcast %cst_433 : f32 to vector<16x32xf32>
    %858 = arith.cmpf ogt, %856, %857 : vector<16x32xf32>
    %cst_434 = arith.constant 1.000000e+00 : f32
    %cst_435 = arith.constant 0.000000e+00 : f32
    %859 = vector.broadcast %cst_434 : f32 to vector<16x32xf32>
    %860 = vector.broadcast %cst_435 : f32 to vector<16x32xf32>
    %861 = arith.select %858, %859, %860 : vector<16x32xi1>, vector<16x32xf32>
    %862 = arith.addf %850, %861 : vector<16x32xf32>
    %cst_436 = arith.constant 0.000000e+00 : f32
    %863 = vector.broadcast %cst_436 : f32 to vector<16x32xf32>
    %864 = arith.select %858, %863, %856 : vector<16x32xi1>, vector<16x32xf32>
    %cst_437 = arith.constant 2.000000e-01 : f32
    %865 = vector.broadcast %cst_437 : f32 to vector<16x32xf32>
    %866 = arith.mulf %864, %865 : vector<16x32xf32>
    %867 = vector.extract_strided_slice %751 {offsets = [144, 0], sizes = [16, 32], strides = [1, 1]} : vector<448x32xf32> to vector<16x32xf32>
    %868 = arith.addf %866, %867 : vector<16x32xf32>
    %cst_438 = arith.constant 5.000000e-01 : f32
    %869 = vector.broadcast %cst_438 : f32 to vector<16x32xf32>
    %870 = arith.cmpf ogt, %868, %869 : vector<16x32xf32>
    %cst_439 = arith.constant 1.000000e+00 : f32
    %cst_440 = arith.constant 0.000000e+00 : f32
    %871 = vector.broadcast %cst_439 : f32 to vector<16x32xf32>
    %872 = vector.broadcast %cst_440 : f32 to vector<16x32xf32>
    %873 = arith.select %870, %871, %872 : vector<16x32xi1>, vector<16x32xf32>
    %874 = arith.addf %862, %873 : vector<16x32xf32>
    %cst_441 = arith.constant 0.000000e+00 : f32
    %875 = vector.broadcast %cst_441 : f32 to vector<16x32xf32>
    %876 = arith.select %870, %875, %868 : vector<16x32xi1>, vector<16x32xf32>
    %cst_442 = arith.constant 2.000000e-01 : f32
    %877 = vector.broadcast %cst_442 : f32 to vector<16x32xf32>
    %878 = arith.mulf %876, %877 : vector<16x32xf32>
    %879 = vector.extract_strided_slice %751 {offsets = [160, 0], sizes = [16, 32], strides = [1, 1]} : vector<448x32xf32> to vector<16x32xf32>
    %880 = arith.addf %878, %879 : vector<16x32xf32>
    %cst_443 = arith.constant 5.000000e-01 : f32
    %881 = vector.broadcast %cst_443 : f32 to vector<16x32xf32>
    %882 = arith.cmpf ogt, %880, %881 : vector<16x32xf32>
    %cst_444 = arith.constant 1.000000e+00 : f32
    %cst_445 = arith.constant 0.000000e+00 : f32
    %883 = vector.broadcast %cst_444 : f32 to vector<16x32xf32>
    %884 = vector.broadcast %cst_445 : f32 to vector<16x32xf32>
    %885 = arith.select %882, %883, %884 : vector<16x32xi1>, vector<16x32xf32>
    %886 = arith.addf %874, %885 : vector<16x32xf32>
    %cst_446 = arith.constant 0.000000e+00 : f32
    %887 = vector.broadcast %cst_446 : f32 to vector<16x32xf32>
    %888 = arith.select %882, %887, %880 : vector<16x32xi1>, vector<16x32xf32>
    %cst_447 = arith.constant 2.000000e-01 : f32
    %889 = vector.broadcast %cst_447 : f32 to vector<16x32xf32>
    %890 = arith.mulf %888, %889 : vector<16x32xf32>
    %891 = vector.extract_strided_slice %751 {offsets = [176, 0], sizes = [16, 32], strides = [1, 1]} : vector<448x32xf32> to vector<16x32xf32>
    %892 = arith.addf %890, %891 : vector<16x32xf32>
    %cst_448 = arith.constant 5.000000e-01 : f32
    %893 = vector.broadcast %cst_448 : f32 to vector<16x32xf32>
    %894 = arith.cmpf ogt, %892, %893 : vector<16x32xf32>
    %cst_449 = arith.constant 1.000000e+00 : f32
    %cst_450 = arith.constant 0.000000e+00 : f32
    %895 = vector.broadcast %cst_449 : f32 to vector<16x32xf32>
    %896 = vector.broadcast %cst_450 : f32 to vector<16x32xf32>
    %897 = arith.select %894, %895, %896 : vector<16x32xi1>, vector<16x32xf32>
    %898 = arith.addf %886, %897 : vector<16x32xf32>
    %cst_451 = arith.constant 0.000000e+00 : f32
    %899 = vector.broadcast %cst_451 : f32 to vector<16x32xf32>
    %900 = arith.select %894, %899, %892 : vector<16x32xi1>, vector<16x32xf32>
    %cst_452 = arith.constant 2.000000e-01 : f32
    %901 = vector.broadcast %cst_452 : f32 to vector<16x32xf32>
    %902 = arith.mulf %900, %901 : vector<16x32xf32>
    %903 = vector.extract_strided_slice %751 {offsets = [192, 0], sizes = [16, 32], strides = [1, 1]} : vector<448x32xf32> to vector<16x32xf32>
    %904 = arith.addf %902, %903 : vector<16x32xf32>
    %cst_453 = arith.constant 5.000000e-01 : f32
    %905 = vector.broadcast %cst_453 : f32 to vector<16x32xf32>
    %906 = arith.cmpf ogt, %904, %905 : vector<16x32xf32>
    %cst_454 = arith.constant 1.000000e+00 : f32
    %cst_455 = arith.constant 0.000000e+00 : f32
    %907 = vector.broadcast %cst_454 : f32 to vector<16x32xf32>
    %908 = vector.broadcast %cst_455 : f32 to vector<16x32xf32>
    %909 = arith.select %906, %907, %908 : vector<16x32xi1>, vector<16x32xf32>
    %910 = arith.addf %898, %909 : vector<16x32xf32>
    %cst_456 = arith.constant 0.000000e+00 : f32
    %911 = vector.broadcast %cst_456 : f32 to vector<16x32xf32>
    %912 = arith.select %906, %911, %904 : vector<16x32xi1>, vector<16x32xf32>
    %cst_457 = arith.constant 2.000000e-01 : f32
    %913 = vector.broadcast %cst_457 : f32 to vector<16x32xf32>
    %914 = arith.mulf %912, %913 : vector<16x32xf32>
    %915 = vector.extract_strided_slice %751 {offsets = [208, 0], sizes = [16, 32], strides = [1, 1]} : vector<448x32xf32> to vector<16x32xf32>
    %916 = arith.addf %914, %915 : vector<16x32xf32>
    %cst_458 = arith.constant 5.000000e-01 : f32
    %917 = vector.broadcast %cst_458 : f32 to vector<16x32xf32>
    %918 = arith.cmpf ogt, %916, %917 : vector<16x32xf32>
    %cst_459 = arith.constant 1.000000e+00 : f32
    %cst_460 = arith.constant 0.000000e+00 : f32
    %919 = vector.broadcast %cst_459 : f32 to vector<16x32xf32>
    %920 = vector.broadcast %cst_460 : f32 to vector<16x32xf32>
    %921 = arith.select %918, %919, %920 : vector<16x32xi1>, vector<16x32xf32>
    %922 = arith.addf %910, %921 : vector<16x32xf32>
    %cst_461 = arith.constant 0.000000e+00 : f32
    %923 = vector.broadcast %cst_461 : f32 to vector<16x32xf32>
    %924 = arith.select %918, %923, %916 : vector<16x32xi1>, vector<16x32xf32>
    %cst_462 = arith.constant 2.000000e-01 : f32
    %925 = vector.broadcast %cst_462 : f32 to vector<16x32xf32>
    %926 = arith.mulf %924, %925 : vector<16x32xf32>
    %927 = vector.extract_strided_slice %751 {offsets = [224, 0], sizes = [16, 32], strides = [1, 1]} : vector<448x32xf32> to vector<16x32xf32>
    %928 = arith.addf %926, %927 : vector<16x32xf32>
    %cst_463 = arith.constant 5.000000e-01 : f32
    %929 = vector.broadcast %cst_463 : f32 to vector<16x32xf32>
    %930 = arith.cmpf ogt, %928, %929 : vector<16x32xf32>
    %cst_464 = arith.constant 1.000000e+00 : f32
    %cst_465 = arith.constant 0.000000e+00 : f32
    %931 = vector.broadcast %cst_464 : f32 to vector<16x32xf32>
    %932 = vector.broadcast %cst_465 : f32 to vector<16x32xf32>
    %933 = arith.select %930, %931, %932 : vector<16x32xi1>, vector<16x32xf32>
    %934 = arith.addf %922, %933 : vector<16x32xf32>
    %cst_466 = arith.constant 0.000000e+00 : f32
    %935 = vector.broadcast %cst_466 : f32 to vector<16x32xf32>
    %936 = arith.select %930, %935, %928 : vector<16x32xi1>, vector<16x32xf32>
    %cst_467 = arith.constant 2.000000e-01 : f32
    %937 = vector.broadcast %cst_467 : f32 to vector<16x32xf32>
    %938 = arith.mulf %936, %937 : vector<16x32xf32>
    %939 = vector.extract_strided_slice %751 {offsets = [240, 0], sizes = [16, 32], strides = [1, 1]} : vector<448x32xf32> to vector<16x32xf32>
    %940 = arith.addf %938, %939 : vector<16x32xf32>
    %cst_468 = arith.constant 5.000000e-01 : f32
    %941 = vector.broadcast %cst_468 : f32 to vector<16x32xf32>
    %942 = arith.cmpf ogt, %940, %941 : vector<16x32xf32>
    %cst_469 = arith.constant 1.000000e+00 : f32
    %cst_470 = arith.constant 0.000000e+00 : f32
    %943 = vector.broadcast %cst_469 : f32 to vector<16x32xf32>
    %944 = vector.broadcast %cst_470 : f32 to vector<16x32xf32>
    %945 = arith.select %942, %943, %944 : vector<16x32xi1>, vector<16x32xf32>
    %946 = arith.addf %934, %945 : vector<16x32xf32>
    %cst_471 = arith.constant 0.000000e+00 : f32
    %947 = vector.broadcast %cst_471 : f32 to vector<16x32xf32>
    %948 = arith.select %942, %947, %940 : vector<16x32xi1>, vector<16x32xf32>
    %cst_472 = arith.constant 2.000000e-01 : f32
    %949 = vector.broadcast %cst_472 : f32 to vector<16x32xf32>
    %950 = arith.mulf %948, %949 : vector<16x32xf32>
    %951 = vector.extract_strided_slice %751 {offsets = [256, 0], sizes = [16, 32], strides = [1, 1]} : vector<448x32xf32> to vector<16x32xf32>
    %952 = arith.addf %950, %951 : vector<16x32xf32>
    %cst_473 = arith.constant 5.000000e-01 : f32
    %953 = vector.broadcast %cst_473 : f32 to vector<16x32xf32>
    %954 = arith.cmpf ogt, %952, %953 : vector<16x32xf32>
    %cst_474 = arith.constant 1.000000e+00 : f32
    %cst_475 = arith.constant 0.000000e+00 : f32
    %955 = vector.broadcast %cst_474 : f32 to vector<16x32xf32>
    %956 = vector.broadcast %cst_475 : f32 to vector<16x32xf32>
    %957 = arith.select %954, %955, %956 : vector<16x32xi1>, vector<16x32xf32>
    %958 = arith.addf %946, %957 : vector<16x32xf32>
    %cst_476 = arith.constant 0.000000e+00 : f32
    %959 = vector.broadcast %cst_476 : f32 to vector<16x32xf32>
    %960 = arith.select %954, %959, %952 : vector<16x32xi1>, vector<16x32xf32>
    %cst_477 = arith.constant 2.000000e-01 : f32
    %961 = vector.broadcast %cst_477 : f32 to vector<16x32xf32>
    %962 = arith.mulf %960, %961 : vector<16x32xf32>
    %963 = vector.extract_strided_slice %751 {offsets = [272, 0], sizes = [16, 32], strides = [1, 1]} : vector<448x32xf32> to vector<16x32xf32>
    %964 = arith.addf %962, %963 : vector<16x32xf32>
    %cst_478 = arith.constant 5.000000e-01 : f32
    %965 = vector.broadcast %cst_478 : f32 to vector<16x32xf32>
    %966 = arith.cmpf ogt, %964, %965 : vector<16x32xf32>
    %cst_479 = arith.constant 1.000000e+00 : f32
    %cst_480 = arith.constant 0.000000e+00 : f32
    %967 = vector.broadcast %cst_479 : f32 to vector<16x32xf32>
    %968 = vector.broadcast %cst_480 : f32 to vector<16x32xf32>
    %969 = arith.select %966, %967, %968 : vector<16x32xi1>, vector<16x32xf32>
    %970 = arith.addf %958, %969 : vector<16x32xf32>
    %cst_481 = arith.constant 0.000000e+00 : f32
    %971 = vector.broadcast %cst_481 : f32 to vector<16x32xf32>
    %972 = arith.select %966, %971, %964 : vector<16x32xi1>, vector<16x32xf32>
    %cst_482 = arith.constant 2.000000e-01 : f32
    %973 = vector.broadcast %cst_482 : f32 to vector<16x32xf32>
    %974 = arith.mulf %972, %973 : vector<16x32xf32>
    %975 = vector.extract_strided_slice %751 {offsets = [288, 0], sizes = [16, 32], strides = [1, 1]} : vector<448x32xf32> to vector<16x32xf32>
    %976 = arith.addf %974, %975 : vector<16x32xf32>
    %cst_483 = arith.constant 5.000000e-01 : f32
    %977 = vector.broadcast %cst_483 : f32 to vector<16x32xf32>
    %978 = arith.cmpf ogt, %976, %977 : vector<16x32xf32>
    %cst_484 = arith.constant 1.000000e+00 : f32
    %cst_485 = arith.constant 0.000000e+00 : f32
    %979 = vector.broadcast %cst_484 : f32 to vector<16x32xf32>
    %980 = vector.broadcast %cst_485 : f32 to vector<16x32xf32>
    %981 = arith.select %978, %979, %980 : vector<16x32xi1>, vector<16x32xf32>
    %982 = arith.addf %970, %981 : vector<16x32xf32>
    %cst_486 = arith.constant 0.000000e+00 : f32
    %983 = vector.broadcast %cst_486 : f32 to vector<16x32xf32>
    %984 = arith.select %978, %983, %976 : vector<16x32xi1>, vector<16x32xf32>
    %cst_487 = arith.constant 2.000000e-01 : f32
    %985 = vector.broadcast %cst_487 : f32 to vector<16x32xf32>
    %986 = arith.mulf %984, %985 : vector<16x32xf32>
    %987 = vector.extract_strided_slice %751 {offsets = [304, 0], sizes = [16, 32], strides = [1, 1]} : vector<448x32xf32> to vector<16x32xf32>
    %988 = arith.addf %986, %987 : vector<16x32xf32>
    %cst_488 = arith.constant 5.000000e-01 : f32
    %989 = vector.broadcast %cst_488 : f32 to vector<16x32xf32>
    %990 = arith.cmpf ogt, %988, %989 : vector<16x32xf32>
    %cst_489 = arith.constant 1.000000e+00 : f32
    %cst_490 = arith.constant 0.000000e+00 : f32
    %991 = vector.broadcast %cst_489 : f32 to vector<16x32xf32>
    %992 = vector.broadcast %cst_490 : f32 to vector<16x32xf32>
    %993 = arith.select %990, %991, %992 : vector<16x32xi1>, vector<16x32xf32>
    %994 = arith.addf %982, %993 : vector<16x32xf32>
    %cst_491 = arith.constant 0.000000e+00 : f32
    %995 = vector.broadcast %cst_491 : f32 to vector<16x32xf32>
    %996 = arith.select %990, %995, %988 : vector<16x32xi1>, vector<16x32xf32>
    %cst_492 = arith.constant 2.000000e-01 : f32
    %997 = vector.broadcast %cst_492 : f32 to vector<16x32xf32>
    %998 = arith.mulf %996, %997 : vector<16x32xf32>
    %999 = vector.extract_strided_slice %751 {offsets = [320, 0], sizes = [16, 32], strides = [1, 1]} : vector<448x32xf32> to vector<16x32xf32>
    %1000 = arith.addf %998, %999 : vector<16x32xf32>
    %cst_493 = arith.constant 5.000000e-01 : f32
    %1001 = vector.broadcast %cst_493 : f32 to vector<16x32xf32>
    %1002 = arith.cmpf ogt, %1000, %1001 : vector<16x32xf32>
    %cst_494 = arith.constant 1.000000e+00 : f32
    %cst_495 = arith.constant 0.000000e+00 : f32
    %1003 = vector.broadcast %cst_494 : f32 to vector<16x32xf32>
    %1004 = vector.broadcast %cst_495 : f32 to vector<16x32xf32>
    %1005 = arith.select %1002, %1003, %1004 : vector<16x32xi1>, vector<16x32xf32>
    %1006 = arith.addf %994, %1005 : vector<16x32xf32>
    %cst_496 = arith.constant 0.000000e+00 : f32
    %1007 = vector.broadcast %cst_496 : f32 to vector<16x32xf32>
    %1008 = arith.select %1002, %1007, %1000 : vector<16x32xi1>, vector<16x32xf32>
    %cst_497 = arith.constant 2.000000e-01 : f32
    %1009 = vector.broadcast %cst_497 : f32 to vector<16x32xf32>
    %1010 = arith.mulf %1008, %1009 : vector<16x32xf32>
    %1011 = vector.extract_strided_slice %751 {offsets = [336, 0], sizes = [16, 32], strides = [1, 1]} : vector<448x32xf32> to vector<16x32xf32>
    %1012 = arith.addf %1010, %1011 : vector<16x32xf32>
    %cst_498 = arith.constant 5.000000e-01 : f32
    %1013 = vector.broadcast %cst_498 : f32 to vector<16x32xf32>
    %1014 = arith.cmpf ogt, %1012, %1013 : vector<16x32xf32>
    %cst_499 = arith.constant 1.000000e+00 : f32
    %cst_500 = arith.constant 0.000000e+00 : f32
    %1015 = vector.broadcast %cst_499 : f32 to vector<16x32xf32>
    %1016 = vector.broadcast %cst_500 : f32 to vector<16x32xf32>
    %1017 = arith.select %1014, %1015, %1016 : vector<16x32xi1>, vector<16x32xf32>
    %1018 = arith.addf %1006, %1017 : vector<16x32xf32>
    %cst_501 = arith.constant 0.000000e+00 : f32
    %1019 = vector.broadcast %cst_501 : f32 to vector<16x32xf32>
    %1020 = arith.select %1014, %1019, %1012 : vector<16x32xi1>, vector<16x32xf32>
    %cst_502 = arith.constant 2.000000e-01 : f32
    %1021 = vector.broadcast %cst_502 : f32 to vector<16x32xf32>
    %1022 = arith.mulf %1020, %1021 : vector<16x32xf32>
    %1023 = vector.extract_strided_slice %751 {offsets = [352, 0], sizes = [16, 32], strides = [1, 1]} : vector<448x32xf32> to vector<16x32xf32>
    %1024 = arith.addf %1022, %1023 : vector<16x32xf32>
    %cst_503 = arith.constant 5.000000e-01 : f32
    %1025 = vector.broadcast %cst_503 : f32 to vector<16x32xf32>
    %1026 = arith.cmpf ogt, %1024, %1025 : vector<16x32xf32>
    %cst_504 = arith.constant 1.000000e+00 : f32
    %cst_505 = arith.constant 0.000000e+00 : f32
    %1027 = vector.broadcast %cst_504 : f32 to vector<16x32xf32>
    %1028 = vector.broadcast %cst_505 : f32 to vector<16x32xf32>
    %1029 = arith.select %1026, %1027, %1028 : vector<16x32xi1>, vector<16x32xf32>
    %1030 = arith.addf %1018, %1029 : vector<16x32xf32>
    %cst_506 = arith.constant 0.000000e+00 : f32
    %1031 = vector.broadcast %cst_506 : f32 to vector<16x32xf32>
    %1032 = arith.select %1026, %1031, %1024 : vector<16x32xi1>, vector<16x32xf32>
    %cst_507 = arith.constant 2.000000e-01 : f32
    %1033 = vector.broadcast %cst_507 : f32 to vector<16x32xf32>
    %1034 = arith.mulf %1032, %1033 : vector<16x32xf32>
    %1035 = vector.extract_strided_slice %751 {offsets = [368, 0], sizes = [16, 32], strides = [1, 1]} : vector<448x32xf32> to vector<16x32xf32>
    %1036 = arith.addf %1034, %1035 : vector<16x32xf32>
    %cst_508 = arith.constant 5.000000e-01 : f32
    %1037 = vector.broadcast %cst_508 : f32 to vector<16x32xf32>
    %1038 = arith.cmpf ogt, %1036, %1037 : vector<16x32xf32>
    %cst_509 = arith.constant 1.000000e+00 : f32
    %cst_510 = arith.constant 0.000000e+00 : f32
    %1039 = vector.broadcast %cst_509 : f32 to vector<16x32xf32>
    %1040 = vector.broadcast %cst_510 : f32 to vector<16x32xf32>
    %1041 = arith.select %1038, %1039, %1040 : vector<16x32xi1>, vector<16x32xf32>
    %1042 = arith.addf %1030, %1041 : vector<16x32xf32>
    %cst_511 = arith.constant 0.000000e+00 : f32
    %1043 = vector.broadcast %cst_511 : f32 to vector<16x32xf32>
    %1044 = arith.select %1038, %1043, %1036 : vector<16x32xi1>, vector<16x32xf32>
    %cst_512 = arith.constant 2.000000e-01 : f32
    %1045 = vector.broadcast %cst_512 : f32 to vector<16x32xf32>
    %1046 = arith.mulf %1044, %1045 : vector<16x32xf32>
    %1047 = vector.extract_strided_slice %751 {offsets = [384, 0], sizes = [16, 32], strides = [1, 1]} : vector<448x32xf32> to vector<16x32xf32>
    %1048 = arith.addf %1046, %1047 : vector<16x32xf32>
    %cst_513 = arith.constant 5.000000e-01 : f32
    %1049 = vector.broadcast %cst_513 : f32 to vector<16x32xf32>
    %1050 = arith.cmpf ogt, %1048, %1049 : vector<16x32xf32>
    %cst_514 = arith.constant 1.000000e+00 : f32
    %cst_515 = arith.constant 0.000000e+00 : f32
    %1051 = vector.broadcast %cst_514 : f32 to vector<16x32xf32>
    %1052 = vector.broadcast %cst_515 : f32 to vector<16x32xf32>
    %1053 = arith.select %1050, %1051, %1052 : vector<16x32xi1>, vector<16x32xf32>
    %1054 = arith.addf %1042, %1053 : vector<16x32xf32>
    %cst_516 = arith.constant 0.000000e+00 : f32
    %1055 = vector.broadcast %cst_516 : f32 to vector<16x32xf32>
    %1056 = arith.select %1050, %1055, %1048 : vector<16x32xi1>, vector<16x32xf32>
    %cst_517 = arith.constant 2.000000e-01 : f32
    %1057 = vector.broadcast %cst_517 : f32 to vector<16x32xf32>
    %1058 = arith.mulf %1056, %1057 : vector<16x32xf32>
    %1059 = vector.extract_strided_slice %751 {offsets = [400, 0], sizes = [16, 32], strides = [1, 1]} : vector<448x32xf32> to vector<16x32xf32>
    %1060 = arith.addf %1058, %1059 : vector<16x32xf32>
    %cst_518 = arith.constant 5.000000e-01 : f32
    %1061 = vector.broadcast %cst_518 : f32 to vector<16x32xf32>
    %1062 = arith.cmpf ogt, %1060, %1061 : vector<16x32xf32>
    %cst_519 = arith.constant 1.000000e+00 : f32
    %cst_520 = arith.constant 0.000000e+00 : f32
    %1063 = vector.broadcast %cst_519 : f32 to vector<16x32xf32>
    %1064 = vector.broadcast %cst_520 : f32 to vector<16x32xf32>
    %1065 = arith.select %1062, %1063, %1064 : vector<16x32xi1>, vector<16x32xf32>
    %1066 = arith.addf %1054, %1065 : vector<16x32xf32>
    %cst_521 = arith.constant 0.000000e+00 : f32
    %1067 = vector.broadcast %cst_521 : f32 to vector<16x32xf32>
    %1068 = arith.select %1062, %1067, %1060 : vector<16x32xi1>, vector<16x32xf32>
    %cst_522 = arith.constant 2.000000e-01 : f32
    %1069 = vector.broadcast %cst_522 : f32 to vector<16x32xf32>
    %1070 = arith.mulf %1068, %1069 : vector<16x32xf32>
    %1071 = vector.extract_strided_slice %751 {offsets = [416, 0], sizes = [16, 32], strides = [1, 1]} : vector<448x32xf32> to vector<16x32xf32>
    %1072 = arith.addf %1070, %1071 : vector<16x32xf32>
    %cst_523 = arith.constant 5.000000e-01 : f32
    %1073 = vector.broadcast %cst_523 : f32 to vector<16x32xf32>
    %1074 = arith.cmpf ogt, %1072, %1073 : vector<16x32xf32>
    %cst_524 = arith.constant 1.000000e+00 : f32
    %cst_525 = arith.constant 0.000000e+00 : f32
    %1075 = vector.broadcast %cst_524 : f32 to vector<16x32xf32>
    %1076 = vector.broadcast %cst_525 : f32 to vector<16x32xf32>
    %1077 = arith.select %1074, %1075, %1076 : vector<16x32xi1>, vector<16x32xf32>
    %1078 = arith.addf %1066, %1077 : vector<16x32xf32>
    %cst_526 = arith.constant 0.000000e+00 : f32
    %1079 = vector.broadcast %cst_526 : f32 to vector<16x32xf32>
    %1080 = arith.select %1074, %1079, %1072 : vector<16x32xi1>, vector<16x32xf32>
    %cst_527 = arith.constant 2.000000e-01 : f32
    %1081 = vector.broadcast %cst_527 : f32 to vector<16x32xf32>
    %1082 = arith.mulf %1080, %1081 : vector<16x32xf32>
    %1083 = vector.extract_strided_slice %751 {offsets = [432, 0], sizes = [16, 32], strides = [1, 1]} : vector<448x32xf32> to vector<16x32xf32>
    %1084 = arith.addf %1082, %1083 : vector<16x32xf32>
    %cst_528 = arith.constant 5.000000e-01 : f32
    %1085 = vector.broadcast %cst_528 : f32 to vector<16x32xf32>
    %1086 = arith.cmpf ogt, %1084, %1085 : vector<16x32xf32>
    %cst_529 = arith.constant 1.000000e+00 : f32
    %cst_530 = arith.constant 0.000000e+00 : f32
    %1087 = vector.broadcast %cst_529 : f32 to vector<16x32xf32>
    %1088 = vector.broadcast %cst_530 : f32 to vector<16x32xf32>
    %1089 = arith.select %1086, %1087, %1088 : vector<16x32xi1>, vector<16x32xf32>
    %1090 = arith.addf %1078, %1089 : vector<16x32xf32>
    %cst_531 = arith.constant 0.0357142873 : f32
    %1091 = vector.broadcast %cst_531 : f32 to vector<16x32xf32>
    %1092 = arith.mulf %1090, %1091 : vector<16x32xf32>
    %c0_532 = arith.constant 0 : index
    %c0_533 = arith.constant 0 : index
    %1093 = vector.load %arg8[%c0_532, %c0_533] : memref<32x128xf32, #tpu.memory_space<vmem>>, vector<32x128xf32>
    %cst_534 = arith.constant dense<0.000000e+00> : vector<16x128xf32>
    %1094 = tpu.matmul %1092, %1093, %cst_534 {dimension_numbers = #tpu.dot_dimension_numbers<[1], [0], [0], [1], [0, 0, 1, 1], [], []>} : vector<16x32xf32>, vector<32x128xf32>, vector<16x128xf32> -> vector<16x128xf32>
    %c0_535 = arith.constant 0 : index
    %c0_536 = arith.constant 0 : index
    %1095 = vector.load %arg9[%c0_535, %c0_536] : memref<1x128xf32, #tpu.memory_space<vmem>>, vector<1x128xf32>
    %1096 = vector.broadcast %1095 : vector<1x128xf32> to vector<16x128xf32>
    %1097 = arith.addf %1094, %1096 : vector<16x128xf32>
    %c0_537 = arith.constant 0 : index
    %c0_538 = arith.constant 0 : index
    %1098 = vector.load %arg10[%c0_537, %c0_538] : memref<16x128xf32, #tpu.memory_space<vmem>>, vector<16x128xf32>
    tpu.vector_store %arg10[%c0_537, %c0_538], %1097 {strides = array<i32>} : memref<16x128xf32, #tpu.memory_space<vmem>>, vector<16x128xf32>,
    return
  }
  func.func @transform_0(%arg0: i32) -> (i32, i32, i32) {
    %c0_i32 = arith.constant 0 : i32
    %c0_i32_0 = arith.constant 0 : i32
    %c0_i32_1 = arith.constant 0 : i32
    return %c0_i32, %arg0, %c0_i32_0 : i32, i32, i32
  }
  func.func @transform_1(%arg0: i32) -> (i32, i32) {
    %c0_i32 = arith.constant 0 : i32
    %c0_i32_0 = arith.constant 0 : i32
    %c0_i32_1 = arith.constant 0 : i32
    return %c0_i32, %c0_i32_0 : i32, i32
  }
  func.func @transform_2(%arg0: i32) -> (i32, i32) {
    %c0_i32 = arith.constant 0 : i32
    %c0_i32_0 = arith.constant 0 : i32
    %c0_i32_1 = arith.constant 0 : i32
    return %c0_i32, %c0_i32_0 : i32, i32
  }
  func.func @transform_3(%arg0: i32) -> (i32, i32) {
    %c0_i32 = arith.constant 0 : i32
    %c0_i32_0 = arith.constant 0 : i32
    %c0_i32_1 = arith.constant 0 : i32
    return %c0_i32, %c0_i32_0 : i32, i32
  }
  func.func @transform_4(%arg0: i32) -> (i32, i32) {
    %c0_i32 = arith.constant 0 : i32
    %c0_i32_0 = arith.constant 0 : i32
    %c0_i32_1 = arith.constant 0 : i32
    return %c0_i32, %c0_i32_0 : i32, i32
  }
  func.func @transform_5(%arg0: i32) -> (i32, i32) {
    %c0_i32 = arith.constant 0 : i32
    %c0_i32_0 = arith.constant 0 : i32
    %c0_i32_1 = arith.constant 0 : i32
    return %c0_i32, %c0_i32_0 : i32, i32
  }
  func.func @transform_6(%arg0: i32) -> (i32, i32) {
    %c0_i32 = arith.constant 0 : i32
    %c0_i32_0 = arith.constant 0 : i32
    %c0_i32_1 = arith.constant 0 : i32
    return %c0_i32, %c0_i32_0 : i32, i32
  }
  func.func @transform_7(%arg0: i32) -> (i32, i32) {
    %c0_i32 = arith.constant 0 : i32
    %c0_i32_0 = arith.constant 0 : i32
    %c0_i32_1 = arith.constant 0 : i32
    return %c0_i32, %c0_i32_0 : i32, i32
  }
  func.func @transform_8(%arg0: i32) -> (i32, i32) {
    %c0_i32 = arith.constant 0 : i32
    %c0_i32_0 = arith.constant 0 : i32
    %c0_i32_1 = arith.constant 0 : i32
    return %c0_i32, %c0_i32_0 : i32, i32
  }
  func.func @transform_9(%arg0: i32) -> (i32, i32) {
    %c0_i32 = arith.constant 0 : i32
    %c0_i32_0 = arith.constant 0 : i32
    return %arg0, %c0_i32 : i32, i32
  }
}

</mosaic_0001>

<bundles_post_ra>
// kernel: tpu_custom_call.1
= control target key start
LH: loop header
LB: loop body
LE: loop exit
PB: predicated region body
PF: predicated region fallthrough
CT: control target
= control target key end

     0   :  { %14 = vsyncpa [#allocation5], 0  ;;  %s3737_s0 = inlined_call_operand.hbm [shape: f32[28,16,28], index: 0, kind: input, shape index: {}]   ;;  %s3738_s1 = inlined_call_operand.hbm [shape: bf16[28,32], index: 1, kind: input, shape index: {}]   ;;  %s3739_s2 = inlined_call_operand.vmem [shape: f32[1,32], index: 2, kind: input, shape index: {}]   ;;  %s3740_s3 = inlined_call_operand.hbm [shape: bf16[32,32], index: 3, kind: input, shape index: {}]   ;;  %s3741_s4 = inlined_call_operand.vmem [shape: f32[1,32], index: 4, kind: input, shape index: {}]   ;;  %s3742_s5 = inlined_call_operand.vmem [shape: bf16[32,32], index: 5, kind: input, shape index: {}]   ;;  %s3743_s6 = inlined_call_operand.vmem [shape: f32[1,32], index: 6, kind: input, shape index: {}]   ;;  %s3744_s7 = inlined_call_operand.hbm [shape: f32[32,128], index: 7, kind: input, shape index: {}]   ;;  %s3745_s8 = inlined_call_operand.vmem [shape: f32[1,128], index: 8, kind: input, shape index: {}]   ;;  %s3746_s9 = inlined_call_operand.hbm [shape: f32[16,128], index: 9, kind: output, shape index: {}]  }
   0x1   :  { %15 = vsyncpa [#allocation8], 0 }
   0x2   :  { %16 = vsyncpa [#allocation11], 0 }
   0x3   :  { %17 = vsyncpa [#allocation6], 0  ;;  %s2968_s30 = smov [#allocation7]   ;;  %s2850_s13 = scalar_lea.hbm %s3738_s1, 256 }
   0x4   :  { %s35_s10 = sshll.u32 %s2968_s30, 4  ;;  %p2851_p0 = scmp.ne.s32.totalorder %s3738_s1, %s2850_s13  ;;  %s36_s10 = int_to_ptr.vmem [resolvable:$true] %s35_s10 }
   0x5   :  { %p2854_p1 = scmp.lt.u32.totalorder %s2850_s13, %s3738_s1 }
   0x7   :  { %p2856_p2 = pnand %p2854_p1, %p2851_p0 }
   0x9   :  { %2859 = shalt.err (!%p2856_p2)
}
   0xa   :  { %s2860_s18 = scalar_lea.vmem %s36_s10, 256  ;;  %p2865_p4 = scmp.lt.s32.totalorder %s36_s10, %s36_s10 }
   0xb   :  { %p2861_p3 = scmp.ne.s32.totalorder %s36_s10, %s2860_s18  ;;  %p2866_p5 = scmp.lt.s32.totalorder %s2860_s18, %s2860_s18 }
   0xd   :  { %p2867_p6 = por %p2866_p5, %p2865_p4 }
   0xf   :  { %p2868_p7 = pnand %p2867_p6, %p2861_p3 }
  0x11   :  { %2871 = shalt.err (!%p2868_p7)
}
  0x12   :  { %s2969_s19 = smov 64   ;;  %s2970_s20 = smov 4  }
  0x13   :  { %41 = dma.hbm_to_vmem [thread:$0]  %s3738_s1, 256, %s36_s10, [#allocation8], %s2969_s19, %s2969_s19, %s2970_s20  }
  0x14   :  { %s2971_s23 = smov [#allocation4]   ;;  %s2872_s27 = scalar_lea.hbm %s3737_s0, 7168 }
  0x15   :  { %s23_s24 = sshll.u32 %s2971_s23, 4  ;;  %p2873_p8 = scmp.ne.s32.totalorder %s3737_s0, %s2872_s27  ;;  %s24_s24 = int_to_ptr.vmem [resolvable:$true] %s23_s24 }
  0x16   :  { %p2876_p9 = scmp.lt.u32.totalorder %s2872_s27, %s3737_s0 }
  0x18   :  { %p2878_p10 = pnand %p2876_p9, %p2873_p8 }
  0x1a   :  { %2881 = shalt.err (!%p2878_p10)
}
  0x1b   :  { %s2882_s12 = scalar_lea.vmem %s24_s24, 7168  ;;  %p2887_p12 = scmp.lt.s32.totalorder %s24_s24, %s24_s24 }
  0x1c   :  { %p2883_p11 = scmp.ne.s32.totalorder %s24_s24, %s2882_s12  ;;  %p2888_p13 = scmp.lt.s32.totalorder %s2882_s12, %s2882_s12 }
  0x1e   :  { %p2889_p0 = por %p2888_p13, %p2887_p12 }
  0x20   :  { %p2890_p1 = pnand %p2889_p0, %p2883_p11 }
  0x22   :  { %2893 = shalt.err (!%p2890_p1)
}
  0x23   :  { %s2972_s1 = smov 128   ;;  %s2973_s10 = smov 8  }
  0x24   :  { %29 = dma.hbm_to_vmem [thread:$0]  %s3737_s0, 7168, %s24_s24, [#allocation5], %s2972_s1, %s2972_s1, %s2973_s10  }
  0x25   :  { %s2974_s15 = smov [#allocation9]   ;;  %s2975_s17 = smov [#allocation10]  }
  0x26   :  { %s49_s16 = sshll.u32 %s2974_s15, 4  ;;  %s67_s18 = sshll.u32 %s2975_s17, 4  ;;  %s50_s16 = int_to_ptr.vmem [resolvable:$true] %s49_s16  ;;  %s3058_s18 = int_to_ptr.vmem [resolvable:$true] %s67_s18 }
  0x27   :  { %s2894_s23 = scalar_lea.hbm %s3740_s3, 256 }
  0x28   :  { %p2895_p2 = scmp.ne.s32.totalorder %s3740_s3, %s2894_s23  ;;  %p2898_p3 = scmp.lt.u32.totalorder %s2894_s23, %s3740_s3 }
  0x2a   :  { %p2900_p4 = pnand %p2898_p3, %p2895_p2 }
  0x2c   :  { %2903 = shalt.err (!%p2900_p4)
}
  0x2d   :  { %s2904_s0 = scalar_lea.vmem %s50_s16, 256  ;;  %p2909_p6 = scmp.lt.s32.totalorder %s50_s16, %s50_s16 }
  0x2e   :  { %p2905_p5 = scmp.ne.s32.totalorder %s50_s16, %s2904_s0  ;;  %p2910_p7 = scmp.lt.s32.totalorder %s2904_s0, %s2904_s0 }
  0x30   :  { %p2911_p8 = por %p2910_p7, %p2909_p6 }
  0x32   :  { %p2912_p9 = pnand %p2911_p8, %p2905_p5 }
  0x34   :  { %2915 = shalt.err (!%p2912_p9)
}
  0x35   :  { %55 = dma.hbm_to_vmem [thread:$0]  %s3740_s3, 256, %s50_s16, [#allocation8], %s2969_s19, %s2969_s19, %s2970_s20  }
  0x36   :  { %s2916_s12 = scalar_lea.hbm %s3744_s7, 512 }
  0x37   :  { %p2917_p10 = scmp.ne.s32.totalorder %s3744_s7, %s2916_s12  ;;  %p2920_p11 = scmp.lt.u32.totalorder %s2916_s12, %s3744_s7 }
  0x39   :  { %p2922_p12 = pnand %p2920_p11, %p2917_p10 }
  0x3b   :  { %2925 = shalt.err (!%p2922_p12)
}
  0x3c   :  { %s2926_s21 = scalar_lea.vmem %s3058_s18, 512  ;;  %p2931_p0 = scmp.lt.s32.totalorder %s3058_s18, %s3058_s18 }
  0x3d   :  { %p2927_p13 = scmp.ne.s32.totalorder %s3058_s18, %s2926_s21  ;;  %p2932_p1 = scmp.lt.s32.totalorder %s2926_s21, %s2926_s21 }
  0x3f   :  { %p2933_p2 = por %p2932_p1, %p2931_p0 }
  0x41   :  { %p2934_p3 = pnand %p2933_p2, %p2927_p13 }
  0x43   :  { %2937 = shalt.err (!%p2934_p3)
}
  0x44   :  { %73 = dma.hbm_to_vmem [thread:$0]  %s3744_s7, 512, %s3058_s18, [#allocation11], %s2972_s1, %s2972_s1, %s2973_s10  }
  0x45   :  { %2960 = dma.done.wait [#allocation5], 7168  }
  0x46   :  { %2961 = vsyncadd [#allocation5], 4294960128 }
  0x47   :  { %2962 = dma.done.wait [#allocation8], 512  }
  0x48   :  { %2963 = vsyncadd [#allocation8], 4294966784 }
  0x49   :  { %2964 = dma.done.wait [#allocation11], 512  }
  0x4a   :  { %2965 = vsyncadd [#allocation11], 4294966784  ;;  %v2844_v0 = vld [vmem:[#allocation7] sm:$0xff]   ;;  %vm280_vm0 = vcmask 1045504   ;;  %v2845_v1 = vld [vmem:[#allocation7 + $0x8] sm:$0x3f]  }
  0x4b   :  { %2629 = vmatprep.subr.bf16.mxu0 %v2844_v0  ;;  %v89_v2 = vld [vmem:[#allocation4] sm:$0xff]  ;;  %v90_v3 = vld [vmem:[#allocation4 + $0x8] sm:$0xff]  ;;  %vm195_vm1 = vcmask 228352   ;;  %2828 = vmatprep.subr.bf16.mxu1 %v2844_v0  ;;  %v91_v5 = vld [vmem:[#allocation4 + $0x10] sm:$0xff]  ;;  %v282_v7 = vsel %vm280_vm0, %v2845_v1, 0  ;;  %vm548_vm4 = vcmask 261120  }
  0x4c   :  { %2630 = vmatpush3.bf16.msra.mxu0 %v2844_v0  ;;  %v145_v4 = vpack.c.bf16 %v90_v3, %v89_v2  ;;  %v92_v6 = vld [vmem:[#allocation4 + $0x18] sm:$0xff]  ;;  %2830 = vmatpush3.bf16.msra.mxu1 %v2844_v0  ;;  %v93_v8 = vld [vmem:[#allocation4 + $0x20] sm:$0xff]  ;;  %v94_v9 = vld [vmem:[#allocation4 + $0x28] sm:$0xff]  ;;  %s2977_s27 = smov [#allocation12]  }
  0x4d   :  { %2832 = vmatprep.subr.msk.bf16.mxu0 %vm280_vm0, %v2845_v1  ;;  %2833 = vmatprep.subr.msk.bf16.mxu1 %vm280_vm0, %v2845_v1  ;;  %v146_v10 = vpack.c.bf16 %v92_v6, %v91_v5  ;;  %v147_v11 = vpack.c.bf16 %v94_v9, %v93_v8  ;;  %v95_v12 = vld [vmem:[#allocation4 + $0x30] sm:$0xff]  ;;  %v96_v13 = vld [vmem:[#allocation4 + $0x38] sm:$0xff]  ;;  %v97_v14 = vld [vmem:[#allocation4 + $0x40] sm:$0xff]  ;;  %s2423_s28 = sshll.u32 %s2977_s27, 4  ;;  %s2424_s28 = int_to_ptr.vmem [resolvable:$true] %s2423_s28 }
  0x4e   :  { %2633 = vmatprep.mubr.msk.bf16.mxu0 %vm195_vm1, %v145_v4  ;;  %v98_v15 = vld [vmem:[#allocation4 + $0x48] sm:$0xff]  ;;  %v121_v16 = vld [vmem:[#allocation4 + $0x100] sm:$0xff]  ;;  %v123_v18 = vld [vmem:[#allocation4 + $0x110] sm:$0xff]  ;;  %v148_v20 = vpack.c.bf16 %v96_v13, %v95_v12  ;;  %s2938_s0 = scalar_lea.vmem %s2424_s28, 256  ;;  %p2943_p5 = scmp.lt.s32.totalorder %s2424_s28, %s2424_s28 }
  0x4f   :  { %v122_v17 = vld [vmem:[#allocation4 + $0x108] sm:$0xff]  ;;  %v124_v19 = vld [vmem:[#allocation4 + $0x118] sm:$0xff]  ;;  %v125_v23 = vld [vmem:[#allocation4 + $0x120] sm:$0xff]  ;;  %v149_v25 = vpack.c.bf16 %v98_v15, %v97_v14  ;;  %p2939_p4 = scmp.ne.s32.totalorder %s2424_s28, %s2938_s0  ;;  %p2944_p6 = scmp.lt.s32.totalorder %s2938_s0, %s2938_s0 }
  0x50   :  { %2632 = vmatpush3.bf16.msra.mxu0 %v282_v7  ;;  %2831 = vmatpush3.bf16.msra.mxu1 %v282_v7  ;;  %v161_v21 = vpack.c.bf16 %v122_v17, %v121_v16  ;;  %v162_v22 = vpack.c.bf16 %v124_v19, %v123_v18  ;;  %v126_v24 = vld [vmem:[#allocation4 + $0x128] sm:$0xff]  ;;  %v99_v27 = vld [vmem:[#allocation4 + $0x50] sm:$0xff]  ;;  %v128_v29 = vld [vmem:[#allocation4 + $0x138] sm:$0xff] }
  0x51   :  { %v163_v26 = vpack.c.bf16 %v126_v24, %v125_v23  ;;  %v127_v28 = vld [vmem:[#allocation4 + $0x130] sm:$0xff]  ;;  %v100_v30 = vld [vmem:[#allocation4 + $0x58] sm:$0xff]  ;;  %v129_v31 = vld [vmem:[#allocation4 + $0x140] sm:$0xff]  ;;  %p2945_p7 = por %p2944_p6, %p2943_p5 }
  0x52   :  { %2665 = vmatprep.mubr.msk.bf16.mxu1 %vm195_vm1, %v161_v21  ;;  %v130_v32 = vld [vmem:[#allocation4 + $0x148] sm:$0xff]  ;;  %v101_v33 = vld [vmem:[#allocation4 + $0x60] sm:$0xff]  ;;  %v164_v35 = vpack.c.bf16 %v128_v29, %v127_v28  ;;  %v2846_v36 = vld [vmem:[#allocation9] sm:$0xff]   ;;  %v150_v37 = vpack.c.bf16 %v100_v30, %v99_v27 }
  0x53   :  { %2634 = vmatmul.mubr.msk.bf16.vlgmr.msra.gmra.mrb[0].mxu0 %vm195_vm1, %v146_v10  ;;  %2666 = vmatmul.mubr.msk.bf16.vlgmr.msra.gmra.mrb[0].mxu1 %vm195_vm1, %v162_v22  ;;  %v102_v34 = vld [vmem:[#allocation4 + $0x68] sm:$0xff]  ;;  %v165_v38 = vpack.c.bf16 %v130_v32, %v129_v31  ;;  %v103_v40 = vld [vmem:[#allocation4 + $0x70] sm:$0xff]  ;;  %v132_v42 = vld [vmem:[#allocation4 + $0x158] sm:$0xff]  ;;  %p2946_p8 = pnand %p2945_p7, %p2939_p4 }
  0x54   :  { %2637 = vmatprep.mubr.msk.bf16.mxu0 %vm195_vm1, %v147_v11  ;;  %2669 = vmatprep.mubr.msk.bf16.mxu1 %vm195_vm1, %v163_v26  ;;  %v151_v39 = vpack.c.bf16 %v102_v34, %v101_v33  ;;  %v131_v41 = vld [vmem:[#allocation4 + $0x150] sm:$0xff]  ;;  %v104_v43 = vld [vmem:[#allocation4 + $0x78] sm:$0xff]  ;;  %v133_v44 = vld [vmem:[#allocation4 + $0x160] sm:$0xff] }
  0x55   :  { %2689 = vmatprep.subr.bf16.mxu1 %v2846_v36  ;;  %v134_v45 = vld [vmem:[#allocation4 + $0x168] sm:$0xff]  ;;  %v105_v46 = vld [vmem:[#allocation4 + $0x80] sm:$0xff]  ;;  %v166_v48 = vpack.c.bf16 %v132_v42, %v131_v41  ;;  %v152_v49 = vpack.c.bf16 %v104_v43, %v103_v40  ;;  %v107_v52 = vld [vmem:[#allocation4 + $0x90] sm:$0xff] }
  0x56   :  { %2690 = vmatpush3.bf16.msra.mxu1 %v2846_v36  ;;  %v106_v47 = vld [vmem:[#allocation4 + $0x88] sm:$0xff]  ;;  %v167_v50 = vpack.c.bf16 %v134_v45, %v133_v44  ;;  %v135_v53 = vld [vmem:[#allocation4 + $0x170] sm:$0xff]  ;;  %v136_v54 = vld [vmem:[#allocation4 + $0x178] sm:$0xff] }
  0x57   :  { %v153_v51 = vpack.c.bf16 %v106_v47, %v105_v46  ;;  %v108_v55 = vld [vmem:[#allocation4 + $0x98] sm:$0xff]  ;;  %v137_v56 = vld [vmem:[#allocation4 + $0x180] sm:$0xff]  ;;  %v138_v57 = vld [vmem:[#allocation4 + $0x188] sm:$0xff]  ;;  %v168_v60 = vpack.c.bf16 %v136_v54, %v135_v53 }
  0x58   :  { %v109_v58 = vld [vmem:[#allocation4 + $0xa0] sm:$0xff]  ;;  %v110_v59 = vld [vmem:[#allocation4 + $0xa8] sm:$0xff]  ;;  %v154_v61 = vpack.c.bf16 %v108_v55, %v107_v52  ;;  %v169_v62 = vpack.c.bf16 %v138_v57, %v137_v56  ;;  %v111_v0 = vld [vmem:[#allocation4 + $0xb0] sm:$0xff] }
  0x59   :  { %v155_v63 = vpack.c.bf16 %v110_v59, %v109_v58  ;;  %v139_v1 = vld [vmem:[#allocation4 + $0x190] sm:$0xff]  ;;  %v140_v2 = vld [vmem:[#allocation4 + $0x198] sm:$0xff]  ;;  %v141_v4 = vld [vmem:[#allocation4 + $0x1a0] sm:$0xff] }
  0x5a   :  { %v112_v3 = vld [vmem:[#allocation4 + $0xb8] sm:$0xff]  ;;  %v142_v5 = vld [vmem:[#allocation4 + $0x1a8] sm:$0xff]  ;;  %v113_v6 = vld [vmem:[#allocation4 + $0xc0] sm:$0xff]  ;;  %v170_v8 = vpack.c.bf16 %v140_v2, %v139_v1 }
  0x5b   :  { %2638 = vmatmul.mubr.msk.bf16.gmra.mrb[4].mxu0 %vm195_vm1, %v148_v20  ;;  %2670 = vmatmul.mubr.msk.bf16.gmra.mrb[4].mxu1 %vm195_vm1, %v164_v35  ;;  %v114_v7 = vld [vmem:[#allocation4 + $0xc8] sm:$0xff]  ;;  %v156_v9 = vpack.c.bf16 %v112_v3, %v111_v0  ;;  %v171_v10 = vpack.c.bf16 %v142_v5, %v141_v4  ;;  %v143_v12 = vld [vmem:[#allocation4 + $0x1b0] sm:$0xff]  ;;  %v144_v13 = vld [vmem:[#allocation4 + $0x1b8] sm:$0xff]  ;;  %v2976_v35 = vmov 0.0  }
  0x5c   :  { %2641 = vmatprep.mubr.msk.bf16.mxu0 %vm195_vm1, %v149_v25  ;;  %2673 = vmatprep.mubr.msk.bf16.mxu1 %vm195_vm1, %v165_v38  ;;  %v157_v11 = vpack.c.bf16 %v114_v7, %v113_v6  ;;  %v115_v14 = vld [vmem:[#allocation4 + $0xd0] sm:$0xff]  ;;  %v116_v15 = vld [vmem:[#allocation4 + $0xd8] sm:$0xff]  ;;  %v117_v16 = vld [vmem:[#allocation4 + $0xe0] sm:$0xff]  ;;  %v172_v18 = vpack.c.bf16 %v144_v13, %v143_v12 }
  0x5d   :  { %v118_v17 = vld [vmem:[#allocation4 + $0xe8] sm:$0xff]  ;;  %v158_v19 = vpack.c.bf16 %v116_v15, %v115_v14  ;;  %v119_v21 = vld [vmem:[#allocation4 + $0xf0] sm:$0xff]  ;;  %v120_v22 = vld [vmem:[#allocation4 + $0xf8] sm:$0xff] }
  0x5e   :  { %v159_v20 = vpack.c.bf16 %v118_v17, %v117_v16  ;;  %v160_v23 = vpack.c.bf16 %v120_v22, %v119_v21  ;;  %v2847_v24 = vld [vmem:[#allocation9 + $0x8] sm:$0xff]   ;;  %v3129_v25 = vld [vmem:[%s3739_s2] ss:$0 sm:$0xff] }
  0x5f   :  { %2691 = vmatprep.subr.bf16.mxu1 %v2847_v24 }
  0x60   :  { %2692 = vmatpush3.bf16.msra.mxu1 %v2847_v24 }
  0x63   :  { %2642 = vmatmul.mubr.msk.bf16.gmra.mrb[8].mxu0 %vm195_vm1, %v150_v37  ;;  %2674 = vmatmul.mubr.msk.bf16.gmra.mrb[8].mxu1 %vm195_vm1, %v166_v48 }
  0x64   :  { %2645 = vmatprep.mubr.msk.bf16.mxu0 %vm195_vm1, %v151_v39  ;;  %2677 = vmatprep.mubr.msk.bf16.mxu1 %vm195_vm1, %v167_v50 }
  0x6b   :  { %2646 = vmatmul.mubr.msk.bf16.gmra.mrb[12].mxu0 %vm195_vm1, %v152_v49  ;;  %2678 = vmatmul.mubr.msk.bf16.gmra.mrb[12].mxu1 %vm195_vm1, %v168_v60 }
  0x6c   :  { %2649 = vmatprep.mubr.msk.bf16.mxu0 %vm195_vm1, %v153_v51  ;;  %2681 = vmatprep.mubr.msk.bf16.mxu1 %vm195_vm1, %v169_v62 }
  0x73   :  { %2650 = vmatmul.mubr.msk.bf16.gmra.mrb[16].mxu0 %vm195_vm1, %v154_v61  ;;  %2682 = vmatmul.mubr.msk.bf16.gmra.mrb[16].mxu1 %vm195_vm1, %v170_v8 }
  0x74   :  { %2653 = vmatprep.mubr.msk.bf16.mxu0 %vm195_vm1, %v155_v63  ;;  %2685 = vmatprep.mubr.msk.bf16.mxu1 %vm195_vm1, %v171_v10 }
  0x7b   :  { %2654 = vmatmul.mubr.msk.bf16.gmra.mrb[20].mxu0 %vm195_vm1, %v156_v9  ;;  %2686 = vmatmul.mubr.msk.bf16.gmra.mrb[20].mxu1 %vm195_vm1, %v172_v18 }
  0x7c   :  { %2657 = vmatprep.mubr.msk.bf16.mxu0 %vm195_vm1, %v157_v11 }
  0x83   :  { %2658 = vmatmul.mubr.msk.bf16.gmra.mrb[24].mxu0 %vm195_vm1, %v158_v19 }
  0x84   :  { %2661 = vmatprep.mubr.msk.bf16.mxu0 %vm195_vm1, %v159_v20 }
  0x8b   :  { %2662 = vmatmul.mubr.msk.bf16.gmra.mrb[28].mxu0 %vm195_vm1, %v160_v23 }
 0x126   :  { %v2635_v26 = vpop.f32.mrb[0].mxu0  ;;  %v2667_v40 = vpop.f32.mrb[0].mxu1 }
 0x127   :  { %v318_v27 = vpop.f32.mrb[1].mxu0  ;;  %v327_v33 = vadd.f32 %v2635_v26, %v3129_v25  ;;  %v3138_v45 = vadd.f32 %v2667_v40, %v3129_v25  ;;  %v446_v46 = vpop.f32.mrb[1].mxu1 }
 0x128   :  { %v319_v28 = vadd.f32 %v3129_v25, %v318_v27  ;;  %v2636_v29 = vpop.f32.mrb[2].mxu0  ;;  %v3141_v48 = vadd.f32 %v3129_v25, %v446_v46  ;;  %v2668_v49 = vpop.f32.mrb[2].mxu1 }
 0x129   :  { %v321_v30 = vpop.f32.mrb[3].mxu0  ;;  %v330_v37 = vadd.f32 %v2636_v29, %v3129_v25  ;;  %v3146_v53 = vadd.f32 %v2668_v49, %v3129_v25  ;;  %v449_v54 = vpop.f32.mrb[3].mxu1 }
 0x12a   :  { %vm543_vm2 = vcmp.gt.f32.partialorder %v319_v28, 0.5  ;;  %v322_v31 = vadd.f32 %v3129_v25, %v321_v30  ;;  %v3149_v57 = vadd.f32 %v3129_v25, %v449_v54 }
 0x12b   :  { %v550_v32 = vsel %vm543_vm2, 0.0, %v319_v28  ;;  %v545_v36 = vsel %vm543_vm2, 1.0, %v2976_v35 }
 0x12c   :  { %v552_v34 = vmul.f32 0.2, %v550_v32  ;;  %vm544_vm3 = vcmp.gt.f32.partialorder %v322_v31, 0.5 }
 0x12d   :  { %v546_v38 = vsel %vm544_vm3, 1.0, %v2976_v35  ;;  %v551_v39 = vsel %vm544_vm3, 0.0, %v322_v31 }
 0x12e   :  { %v554_v41 = vadd.f32 %v552_v34, %v327_v33  ;;  %v547_v42 = vpack.c.bf16 %v546_v38, %v545_v36  ;;  %v553_v43 = vmul.f32 0.2, %v551_v39  ;;  %v2639_v44 = vpop.f32.mrb[4].mxu0  ;;  %v2671_v2 = vpop.f32.mrb[4].mxu1 }
 0x12f   :  { %v334_v47 = vpop.f32.mrb[5].mxu0  ;;  %v3156_v5 = vadd.f32 %v2671_v2, %v3129_v25  ;;  %v462_v6 = vpop.f32.mrb[5].mxu1  ;;  %v343_v12 = vadd.f32 %v2639_v44, %v3129_v25 }
 0x130   :  { %549 = vst.msk [vmem:[#allocation2] sm:$0xff] %vm548_vm4, %v547_v42  ;;  %v555_v50 = vadd.f32 %v553_v43, %v330_v37  ;;  %v335_v51 = vadd.f32 %v3129_v25, %v334_v47  ;;  %vm556_vm5 = vcmp.gt.f32.partialorder %v554_v41, 0.5  ;;  %v2640_v52 = vpop.f32.mrb[6].mxu0  ;;  %v3160_v10 = vadd.f32 %v3129_v25, %v462_v6  ;;  %v2672_v11 = vpop.f32.mrb[6].mxu1 }
 0x131   :  { %v562_v55 = vsel %vm556_vm5, 0.0, %v554_v41  ;;  %v337_v56 = vpop.f32.mrb[7].mxu0  ;;  %v558_v59 = vsel %vm556_vm5, 1.0, %v2976_v35  ;;  %v3165_v15 = vadd.f32 %v2672_v11, %v3129_v25  ;;  %v465_v16 = vpop.f32.mrb[7].mxu1  ;;  %v346_v22 = vadd.f32 %v2640_v52, %v3129_v25 }
 0x132   :  { %v564_v58 = vmul.f32 0.2, %v562_v55  ;;  %vm557_vm6 = vcmp.gt.f32.partialorder %v555_v50, 0.5  ;;  %v338_v63 = vadd.f32 %v3129_v25, %v337_v56  ;;  %v3171_v21 = vadd.f32 %v3129_v25, %v465_v16 }
 0x133   :  { %v559_v60 = vsel %vm557_vm6, 1.0, %v2976_v35  ;;  %v563_v61 = vsel %vm557_vm6, 0.0, %v555_v50 }
 0x134   :  { %v566_v62 = vadd.f32 %v564_v58, %v335_v51  ;;  %v560_v0 = vpack.c.bf16 %v559_v60, %v558_v59  ;;  %v565_v1 = vmul.f32 0.2, %v563_v61 }
 0x136   :  { %vm568_vm7 = vcmp.gt.f32.partialorder %v566_v62, 0.5  ;;  %561 = vst.msk [vmem:[#allocation2 + $0x8] sm:$0xff] %vm548_vm4, %v560_v0  ;;  %v567_v3 = vadd.f32 %v565_v1, %v338_v63  ;;  %v2643_v4 = vpop.f32.mrb[8].mxu0  ;;  %v2675_v31 = vpop.f32.mrb[8].mxu1 }
 0x137   :  { %v574_v7 = vsel %vm568_vm7, 0.0, %v566_v62  ;;  %v874_v8 = vld [vmem:[#allocation2] sm:$0xff]  ;;  %v350_v9 = vpop.f32.mrb[9].mxu0  ;;  %v570_v17 = vsel %vm568_vm7, 1.0, %v2976_v35  ;;  %v3180_v34 = vadd.f32 %v2675_v31, %v3129_v25  ;;  %v478_v36 = vpop.f32.mrb[9].mxu1  ;;  %v359_v59 = vadd.f32 %v2643_v4, %v3129_v25 }
 0x138   :  { %v576_v13 = vmul.f32 0.2, %v574_v7  ;;  %vm569_vm8 = vcmp.gt.f32.partialorder %v567_v3, 0.5  ;;  %2693 = vmatprep.mubr.msk.bf16.mxu1 %vm548_vm4, %v874_v8  ;;  %v2644_v14 = vpop.f32.mrb[10].mxu0  ;;  %v351_v27 = vadd.f32 %v3129_v25, %v350_v9  ;;  %v3185_v41 = vadd.f32 %v3129_v25, %v478_v36  ;;  %v2676_v42 = vpop.f32.mrb[10].mxu1 }
 0x139   :  { %v571_v18 = vsel %vm569_vm8, 1.0, %v2976_v35  ;;  %v575_v19 = vsel %vm569_vm8, 0.0, %v567_v3  ;;  %v353_v20 = vpop.f32.mrb[11].mxu0  ;;  %v481_v50 = vpop.f32.mrb[11].mxu1  ;;  %v3191_v52 = vadd.f32 %v2676_v42, %v3129_v25  ;;  %v362_v62 = vadd.f32 %v2644_v14, %v3129_v25 }
 0x13a   :  { %v572_v23 = vpack.c.bf16 %v571_v18, %v570_v17  ;;  %v577_v24 = vmul.f32 0.2, %v575_v19  ;;  %v578_v26 = vadd.f32 %v576_v13, %v343_v12  ;;  %v354_v44 = vadd.f32 %v3129_v25, %v353_v20 }
 0x13b   :  { %v3194_v54 = vadd.f32 %v3129_v25, %v481_v50 }
 0x13c   :  { %573 = vst.msk [vmem:[#allocation2 + $0x10] sm:$0xff] %vm548_vm4, %v572_v23  ;;  %vm580_vm9 = vcmp.gt.f32.partialorder %v578_v26, 0.5  ;;  %v579_v28 = vadd.f32 %v577_v24, %v346_v22 }
 0x13d   :  { %v586_v29 = vsel %vm580_vm9, 0.0, %v578_v26  ;;  %v875_v30 = vld [vmem:[#allocation2 + $0x8] sm:$0xff]  ;;  %v582_v37 = vsel %vm580_vm9, 1.0, %v2976_v35 }
 0x13e   :  { %v588_v32 = vmul.f32 0.2, %v586_v29  ;;  %vm581_vm10 = vcmp.gt.f32.partialorder %v579_v28, 0.5  ;;  %2694 = vmatmul.mubr.msk.bf16.vlgmr.msra.gmra.mrb[24].mxu1 %vm548_vm4, %v875_v30  ;;  %v3177_v33 = vpop.f32.mrb[12].mxu0  ;;  %v2679_v1 = vpop.f32.mrb[12].mxu1 }
 0x13f   :  { %v583_v38 = vsel %vm581_vm10, 1.0, %v2976_v35  ;;  %v587_v39 = vsel %vm581_vm10, 0.0, %v579_v28  ;;  %v366_v40 = vpop.f32.mrb[13].mxu0  ;;  %v3205_v8 = vadd.f32 %v2679_v1, %v3129_v25  ;;  %v494_v4 = vpop.f32.mrb[13].mxu1  ;;  %v375_v42 = vadd.f32 %v3177_v33, %v3129_v25 }
 0x140   :  { %v590_v43 = vadd.f32 %v588_v32, %v351_v27  ;;  %v584_v46 = vpack.c.bf16 %v583_v38, %v582_v37  ;;  %v589_v47 = vmul.f32 0.2, %v587_v39  ;;  %v3188_v49 = vpop.f32.mrb[14].mxu0  ;;  %v3208_v11 = vadd.f32 %v3129_v25, %v494_v4  ;;  %v2680_v12 = vpop.f32.mrb[14].mxu1 }
 0x141   :  { %v369_v51 = vpop.f32.mrb[15].mxu0  ;;  %v367_v13 = vadd.f32 %v3129_v25, %v366_v40  ;;  %v3215_v17 = vadd.f32 %v2680_v12, %v3129_v25  ;;  %v497_v18 = vpop.f32.mrb[15].mxu1  ;;  %v378_v1 = vadd.f32 %v3188_v49, %v3129_v25 }
 0x142   :  { %vm592_vm11 = vcmp.gt.f32.partialorder %v590_v43, 0.5  ;;  %585 = vst.msk [vmem:[#allocation2 + $0x18] sm:$0xff] %vm548_vm4, %v584_v46  ;;  %v591_v55 = vadd.f32 %v589_v47, %v354_v44  ;;  %v3218_v23 = vadd.f32 %v3129_v25, %v497_v18  ;;  %v370_v30 = vadd.f32 %v3129_v25, %v369_v51 }
 0x143   :  { %v598_v56 = vsel %vm592_vm11, 0.0, %v590_v43  ;;  %v876_v58 = vld [vmem:[#allocation2 + $0x10] sm:$0xff]  ;;  %v594_v61 = vsel %vm592_vm11, 1.0, %v2976_v35 }
 0x144   :  { %v600_v60 = vmul.f32 0.2, %v598_v56  ;;  %vm593_vm12 = vcmp.gt.f32.partialorder %v591_v55, 0.5  ;;  %2697 = vmatprep.mubr.msk.bf16.mxu1 %vm548_vm4, %v876_v58 }
 0x145   :  { %v595_v63 = vsel %vm593_vm12, 1.0, %v2976_v35  ;;  %v599_v0 = vsel %vm593_vm12, 0.0, %v591_v55 }
 0x146   :  { %v596_v2 = vpack.c.bf16 %v595_v63, %v594_v61  ;;  %v601_v3 = vmul.f32 0.2, %v599_v0  ;;  %v602_v6 = vadd.f32 %v600_v60, %v359_v59  ;;  %v3202_v7 = vpop.f32.mrb[16].mxu0  ;;  %v2683_v36 = vpop.f32.mrb[16].mxu1 }
 0x147   :  { %v382_v9 = vpop.f32.mrb[17].mxu0  ;;  %v3226_v39 = vadd.f32 %v2683_v36, %v3129_v25  ;;  %v510_v40 = vpop.f32.mrb[17].mxu1 }
 0x148   :  { %597 = vst.msk [vmem:[#allocation2 + $0x20] sm:$0xff] %vm548_vm4, %v596_v2  ;;  %vm604_vm13 = vcmp.gt.f32.partialorder %v602_v6, 0.5  ;;  %v603_v14 = vadd.f32 %v601_v3, %v362_v62  ;;  %v3212_v16 = vpop.f32.mrb[18].mxu0  ;;  %v3236_v50 = vadd.f32 %v3129_v25, %v510_v40  ;;  %v2684_v51 = vpop.f32.mrb[18].mxu1  ;;  %v383_v4 = vadd.f32 %v3129_v25, %v382_v9 }
 0x149   :  { %v610_v19 = vsel %vm604_vm13, 0.0, %v602_v6  ;;  %v877_v20 = vld [vmem:[#allocation2 + $0x18] sm:$0xff]  ;;  %v385_v22 = vpop.f32.mrb[19].mxu0  ;;  %v606_v26 = vsel %vm604_vm13, 1.0, %v2976_v35  ;;  %v3241_v33 = vadd.f32 %v2684_v51, %v3129_v25  ;;  %v513_v59 = vpop.f32.mrb[19].mxu1 }
 0x14a   :  { %v612_v24 = vmul.f32 0.2, %v610_v19  ;;  %vm605_vm14 = vcmp.gt.f32.partialorder %v603_v14, 0.5  ;;  %2698 = vmatmul.mubr.msk.bf16.gmra.mrb[28].mxu1 %vm548_vm4, %v877_v20  ;;  %v3250_v0 = vadd.f32 %v3129_v25, %v513_v59  ;;  %v2848_v59 = vld [vmem:[%s3742_s5] sm:$0xff]  }
 0x14b   :  { %v607_v27 = vsel %vm605_vm14, 1.0, %v2976_v35  ;;  %v611_v28 = vsel %vm605_vm14, 0.0, %v603_v14  ;;  %v386_v14 = vadd.f32 %v3129_v25, %v385_v22  ;;  %2749 = vmatprep.subr.bf16.mxu0 %v2848_v59 }
 0x14c   :  { %v614_v29 = vadd.f32 %v612_v24, %v367_v13  ;;  %v608_v31 = vpack.c.bf16 %v607_v27, %v606_v26  ;;  %v613_v32 = vmul.f32 0.2, %v611_v28  ;;  %2750 = vmatpush3.bf16.msra.mxu0 %v2848_v59 }
 0x14e   :  { %vm616_vm15 = vcmp.gt.f32.partialorder %v614_v29, 0.5  ;;  %609 = vst.msk [vmem:[#allocation2 + $0x28] sm:$0xff] %vm548_vm4, %v608_v31  ;;  %v615_v37 = vadd.f32 %v613_v32, %v370_v30  ;;  %v2655_v38 = vpop.f32.mrb[20].mxu0  ;;  %v2687_v19 = vpop.f32.mrb[20].mxu1 }
 0x14f   :  { %v622_v43 = vsel %vm616_vm15, 0.0, %v614_v29  ;;  %v878_v44 = vld [vmem:[#allocation2 + $0x20] sm:$0xff]  ;;  %v3231_v46 = vadd.f32 %v2655_v38, %v3129_v25  ;;  %v3233_v47 = vpop.f32.mrb[21].mxu0  ;;  %v618_v55 = vsel %vm616_vm15, 1.0, %v2976_v35  ;;  %v3260_v26 = vadd.f32 %v2687_v19, %v3129_v25  ;;  %v526_v27 = vpop.f32.mrb[21].mxu1 }
 0x150   :  { %v624_v56 = vmul.f32 0.2, %v622_v43  ;;  %vm617_vm0 = vcmp.gt.f32.partialorder %v615_v37, 0.5  ;;  %2701 = vmatprep.mubr.msk.bf16.mxu1 %vm548_vm4, %v878_v44  ;;  %v2656_v58 = vpop.f32.mrb[22].mxu0  ;;  %v3267_v30 = vadd.f32 %v3129_v25, %v526_v27  ;;  %v2688_v31 = vpop.f32.mrb[22].mxu1 }
 0x151   :  { %v619_v60 = vsel %vm617_vm0, 1.0, %v2976_v35  ;;  %v623_v61 = vsel %vm617_vm0, 0.0, %v615_v37  ;;  %v3245_v62 = vadd.f32 %v2656_v58, %v3129_v25  ;;  %v3247_v63 = vpop.f32.mrb[23].mxu0  ;;  %v3276_v51 = vadd.f32 %v2688_v31, %v3129_v25 }
 0x152   :  { %v620_v2 = vpack.c.bf16 %v619_v60, %v618_v55  ;;  %v625_v3 = vmul.f32 0.2, %v623_v61  ;;  %v626_v6 = vadd.f32 %v624_v56, %v375_v42  ;;  %v529_v42 = vpop.f32.mrb[23].mxu1  ;;  %v2849_v60 = vld [vmem:[%s3742_s5 + $0x8] sm:$0xff]  }
 0x153   :  { %v3279_v55 = vadd.f32 %v3129_v25, %v529_v42  ;;  %2751 = vmatprep.subr.bf16.mxu0 %v2849_v60 }
 0x154   :  { %621 = vst.msk [vmem:[#allocation2 + $0x30] sm:$0xff] %vm548_vm4, %v620_v2  ;;  %vm628_vm1 = vcmp.gt.f32.partialorder %v626_v6, 0.5  ;;  %v627_v12 = vadd.f32 %v625_v3, %v378_v1  ;;  %v391_v2 = vadd.f32 %v3202_v7, %v3129_v25  ;;  %2752 = vmatpush3.bf16.msra.mxu0 %v2849_v60 }
 0x155   :  { %v634_v13 = vsel %vm628_vm1, 0.0, %v626_v6  ;;  %v879_v18 = vld [vmem:[#allocation2 + $0x28] sm:$0xff]  ;;  %v630_v20 = vsel %vm628_vm1, 1.0, %v2976_v35 }
 0x156   :  { %v636_v24 = vmul.f32 0.2, %v634_v13  ;;  %vm629_vm2 = vcmp.gt.f32.partialorder %v627_v12, 0.5  ;;  %2702 = vmatmul.mubr.msk.bf16.gmra.mrb[32].mxu1 %vm548_vm4, %v879_v18  ;;  %v2659_v49 = vpop.f32.mrb[24].mxu0  ;;  %v394_v13 = vadd.f32 %v3212_v16, %v3129_v25 }
 0x157   :  { %v631_v9 = vsel %vm629_vm2, 1.0, %v2976_v35  ;;  %v635_v28 = vsel %vm629_vm2, 0.0, %v627_v12  ;;  %v3264_v29 = vadd.f32 %v2659_v49, %v3129_v25  ;;  %v414_v22 = vpop.f32.mrb[25].mxu0  ;;  %v399_v49 = vadd.f32 %v3129_v25, %v3233_v47 }
 0x158   :  { %v638_v32 = vadd.f32 %v636_v24, %v383_v4  ;;  %v632_v36 = vpack.c.bf16 %v631_v9, %v630_v20  ;;  %v637_v37 = vmul.f32 0.2, %v635_v28  ;;  %v3270_v38 = vadd.f32 %v3129_v25, %v414_v22  ;;  %v2660_v40 = vpop.f32.mrb[26].mxu0 }
 0x159   :  { %v3273_v43 = vadd.f32 %v2660_v40, %v3129_v25  ;;  %v417_v44 = vpop.f32.mrb[27].mxu0 }
 0x15a   :  { %vm640_vm3 = vcmp.gt.f32.partialorder %v638_v32, 0.5  ;;  %633 = vst.msk [vmem:[#allocation2 + $0x38] sm:$0xff] %vm548_vm4, %v632_v36  ;;  %v639_v56 = vadd.f32 %v637_v37, %v386_v14  ;;  %v3283_v58 = vadd.f32 %v3129_v25, %v417_v44 }
 0x15b   :  { %v646_v61 = vsel %vm640_vm3, 0.0, %v638_v32  ;;  %v880_v1 = vld [vmem:[#allocation2 + $0x30] sm:$0xff]  ;;  %v642_v6 = vsel %vm640_vm3, 1.0, %v2976_v35 }
 0x15c   :  { %v648_v3 = vmul.f32 0.2, %v646_v61  ;;  %vm641_vm5 = vcmp.gt.f32.partialorder %v639_v56, 0.5  ;;  %2705 = vmatprep.mubr.msk.bf16.mxu1 %vm548_vm4, %v880_v1 }
 0x15d   :  { %v643_v4 = vsel %vm641_vm5, 1.0, %v2976_v35  ;;  %v647_v12 = vsel %vm641_vm5, 0.0, %v639_v56  ;;  %v402_v56 = vadd.f32 %v3129_v25, %v3247_v63 }
 0x15e   :  { %v644_v14 = vpack.c.bf16 %v643_v4, %v642_v6  ;;  %v649_v18 = vmul.f32 0.2, %v647_v12  ;;  %v650_v19 = vadd.f32 %v648_v3, %v391_v2  ;;  %v2663_v20 = vpop.f32.mrb[28].mxu0 }
 0x15f   :  { %v3299_v7 = vadd.f32 %v2663_v20, %v3129_v25  ;;  %v430_v24 = vpop.f32.mrb[29].mxu0 }
 0x160   :  { %645 = vst.msk [vmem:[#allocation2 + $0x40] sm:$0xff] %vm548_vm4, %v644_v14  ;;  %vm652_vm6 = vcmp.gt.f32.partialorder %v650_v19, 0.5  ;;  %v651_v27 = vadd.f32 %v649_v18, %v394_v13  ;;  %v3305_v9 = vadd.f32 %v3129_v25, %v430_v24  ;;  %v2664_v16 = vpop.f32.mrb[30].mxu0 }
 0x161   :  { %v658_v28 = vsel %vm652_vm6, 0.0, %v650_v19  ;;  %v881_v22 = vld [vmem:[#allocation2 + $0x38] sm:$0xff]  ;;  %v3308_v31 = vadd.f32 %v2664_v16, %v3129_v25  ;;  %v433_v32 = vpop.f32.mrb[31].mxu0  ;;  %v654_v47 = vsel %vm652_vm6, 1.0, %v2976_v35 }
 0x162   :  { %v660_v36 = vmul.f32 0.2, %v658_v28  ;;  %vm653_vm7 = vcmp.gt.f32.partialorder %v651_v27, 0.5  ;;  %2706 = vmatmul.mubr.msk.bf16.gmra.mrb[36].mxu1 %vm548_vm4, %v881_v22  ;;  %v3312_v37 = vadd.f32 %v3129_v25, %v433_v32 }
 0x163   :  { %v655_v40 = vsel %vm653_vm7, 1.0, %v2976_v35  ;;  %v659_v42 = vsel %vm653_vm7, 0.0, %v651_v27 }
 0x164   :  { %v662_v44 = vadd.f32 %v660_v36, %v399_v49  ;;  %v656_v59 = vpack.c.bf16 %v655_v40, %v654_v47  ;;  %v661_v61 = vmul.f32 0.2, %v659_v42 }
 0x166   :  { %vm664_vm8 = vcmp.gt.f32.partialorder %v662_v44, 0.5  ;;  %657 = vst.msk [vmem:[#allocation2 + $0x48] sm:$0xff] %vm548_vm4, %v656_v59  ;;  %v663_v60 = vadd.f32 %v661_v61, %v402_v56 }
 0x167   :  { %v670_v1 = vsel %vm664_vm8, 0.0, %v662_v44  ;;  %v882_v2 = vld [vmem:[#allocation2 + $0x40] sm:$0xff]  ;;  %v666_v6 = vsel %vm664_vm8, 1.0, %v2976_v35 }
 0x168   :  { %v672_v3 = vmul.f32 0.2, %v670_v1  ;;  %vm665_vm9 = vcmp.gt.f32.partialorder %v663_v60, 0.5  ;;  %2709 = vmatprep.mubr.msk.bf16.mxu1 %vm548_vm4, %v882_v2 }
 0x169   :  { %v667_v4 = vsel %vm665_vm9, 1.0, %v2976_v35  ;;  %v671_v12 = vsel %vm665_vm9, 0.0, %v663_v60 }
 0x16a   :  { %v668_v13 = vpack.c.bf16 %v667_v4, %v666_v6  ;;  %v673_v14 = vmul.f32 0.2, %v671_v12  ;;  %v674_v25 = vadd.f32 %v672_v3, %v3231_v46 }
 0x16c   :  { %669 = vst.msk [vmem:[#allocation2 + $0x50] sm:$0xff] %vm548_vm4, %v668_v13  ;;  %vm676_vm10 = vcmp.gt.f32.partialorder %v674_v25, 0.5  ;;  %v675_v63 = vadd.f32 %v673_v14, %v3245_v62 }
 0x16d   :  { %v682_v18 = vsel %vm676_vm10, 0.0, %v674_v25  ;;  %v883_v19 = vld [vmem:[#allocation2 + $0x48] sm:$0xff]  ;;  %v678_v24 = vsel %vm676_vm10, 1.0, %v2976_v35 }
 0x16e   :  { %v684_v20 = vmul.f32 0.2, %v682_v18  ;;  %vm677_vm11 = vcmp.gt.f32.partialorder %v675_v63, 0.5  ;;  %2710 = vmatmul.mubr.msk.bf16.gmra.mrb[40].mxu1 %vm548_vm4, %v883_v19 }
 0x16f   :  { %v679_v49 = vsel %vm677_vm11, 1.0, %v2976_v35  ;;  %v683_v27 = vsel %vm677_vm11, 0.0, %v675_v63 }
 0x170   :  { %v686_v16 = vadd.f32 %v684_v20, %v3270_v38  ;;  %v680_v28 = vpack.c.bf16 %v679_v49, %v678_v24  ;;  %v685_v46 = vmul.f32 0.2, %v683_v27 }
 0x172   :  { %vm688_vm12 = vcmp.gt.f32.partialorder %v686_v16, 0.5  ;;  %681 = vst.msk [vmem:[#allocation2 + $0x58] sm:$0xff] %vm548_vm4, %v680_v28  ;;  %v687_v62 = vadd.f32 %v685_v46, %v3283_v58 }
 0x173   :  { %v694_v22 = vsel %vm688_vm12, 0.0, %v686_v16  ;;  %v884_v32 = vld [vmem:[#allocation2 + $0x50] sm:$0xff]  ;;  %v690_v47 = vsel %vm688_vm12, 1.0, %v2976_v35 }
 0x174   :  { %v696_v36 = vmul.f32 0.2, %v694_v22  ;;  %vm689_vm13 = vcmp.gt.f32.partialorder %v687_v62, 0.5  ;;  %2713 = vmatprep.mubr.msk.bf16.mxu1 %vm548_vm4, %v884_v32 }
 0x175   :  { %v691_v40 = vsel %vm689_vm13, 1.0, %v2976_v35  ;;  %v695_v42 = vsel %vm689_vm13, 0.0, %v687_v62 }
 0x176   :  { %v692_v44 = vpack.c.bf16 %v691_v40, %v690_v47  ;;  %v697_v38 = vmul.f32 0.2, %v695_v42  ;;  %v698_v56 = vadd.f32 %v696_v36, %v3264_v29 }
 0x178   :  { %693 = vst.msk [vmem:[#allocation2 + $0x60] sm:$0xff] %vm548_vm4, %v692_v44  ;;  %vm700_vm14 = vcmp.gt.f32.partialorder %v698_v56, 0.5  ;;  %v699_v58 = vadd.f32 %v697_v38, %v3273_v43 }
 0x179   :  { %v706_v59 = vsel %vm700_vm14, 0.0, %v698_v56  ;;  %v885_v61 = vld [vmem:[#allocation2 + $0x58] sm:$0xff]  ;;  %v702_v1 = vsel %vm700_vm14, 1.0, %v2976_v35 }
 0x17a   :  { %v708_v60 = vmul.f32 0.2, %v706_v59  ;;  %vm701_vm15 = vcmp.gt.f32.partialorder %v699_v58, 0.5  ;;  %2714 = vmatmul.mubr.msk.bf16.gmra.mrb[44].mxu1 %vm548_vm4, %v885_v61 }
 0x17b   :  { %v703_v2 = vsel %vm701_vm15, 1.0, %v2976_v35  ;;  %v707_v3 = vsel %vm701_vm15, 0.0, %v699_v58 }
 0x17c   :  { %v710_v6 = vadd.f32 %v708_v60, %v3305_v9  ;;  %v704_v4 = vpack.c.bf16 %v703_v2, %v702_v1  ;;  %v709_v29 = vmul.f32 0.2, %v707_v3 }
 0x17e   :  { %vm712_vm0 = vcmp.gt.f32.partialorder %v710_v6, 0.5  ;;  %705 = vst.msk [vmem:[#allocation2 + $0x68] sm:$0xff] %vm548_vm4, %v704_v4  ;;  %v711_v43 = vadd.f32 %v709_v29, %v3312_v37 }
 0x17f   :  { %v718_v12 = vsel %vm712_vm0, 0.0, %v710_v6  ;;  %v886_v13 = vld [vmem:[#allocation2 + $0x60] sm:$0xff]  ;;  %v714_v25 = vsel %vm712_vm0, 1.0, %v2976_v35 }
 0x180   :  { %v720_v14 = vmul.f32 0.2, %v718_v12  ;;  %vm713_vm1 = vcmp.gt.f32.partialorder %v711_v43, 0.5  ;;  %2717 = vmatprep.mubr.msk.bf16.mxu1 %vm548_vm4, %v886_v13 }
 0x181   :  { %v715_v63 = vsel %vm713_vm1, 1.0, %v2976_v35  ;;  %v719_v18 = vsel %vm713_vm1, 0.0, %v711_v43 }
 0x182   :  { %v716_v19 = vpack.c.bf16 %v715_v63, %v714_v25  ;;  %v721_v9 = vmul.f32 0.2, %v719_v18  ;;  %v722_v20 = vadd.f32 %v720_v14, %v3299_v7 }
 0x184   :  { %717 = vst.msk [vmem:[#allocation2 + $0x70] sm:$0xff] %vm548_vm4, %v716_v19  ;;  %vm724_vm2 = vcmp.gt.f32.partialorder %v722_v20, 0.5  ;;  %v723_v37 = vadd.f32 %v721_v9, %v3308_v31 }
 0x185   :  { %v730_v24 = vsel %vm724_vm2, 0.0, %v722_v20  ;;  %v887_v49 = vld [vmem:[#allocation2 + $0x68] sm:$0xff]  ;;  %v726_v16 = vsel %vm724_vm2, 1.0, %v2976_v35 }
 0x186   :  { %v732_v27 = vmul.f32 0.2, %v730_v24  ;;  %vm725_vm3 = vcmp.gt.f32.partialorder %v723_v37, 0.5  ;;  %2718 = vmatmul.mubr.msk.bf16.gmra.mrb[48].mxu1 %vm548_vm4, %v887_v49 }
 0x187   :  { %v727_v28 = vsel %vm725_vm3, 1.0, %v2976_v35  ;;  %v731_v46 = vsel %vm725_vm3, 0.0, %v723_v37 }
 0x188   :  { %v734_v62 = vadd.f32 %v732_v27, %v3141_v48  ;;  %v728_v22 = vpack.c.bf16 %v727_v28, %v726_v16  ;;  %v733_v7 = vmul.f32 0.2, %v731_v46 }
 0x18a   :  { %vm736_vm5 = vcmp.gt.f32.partialorder %v734_v62, 0.5  ;;  %729 = vst.msk [vmem:[#allocation2 + $0x78] sm:$0xff] %vm548_vm4, %v728_v22  ;;  %v735_v31 = vadd.f32 %v733_v7, %v3149_v57 }
 0x18b   :  { %v742_v32 = vsel %vm736_vm5, 0.0, %v734_v62  ;;  %v888_v36 = vld [vmem:[#allocation2 + $0x70] sm:$0xff]  ;;  %v738_v40 = vsel %vm736_vm5, 1.0, %v2976_v35 }
 0x18c   :  { %v744_v47 = vmul.f32 0.2, %v742_v32  ;;  %vm737_vm6 = vcmp.gt.f32.partialorder %v735_v31, 0.5  ;;  %2721 = vmatprep.mubr.msk.bf16.mxu1 %vm548_vm4, %v888_v36 }
 0x18d   :  { %v739_v42 = vsel %vm737_vm6, 1.0, %v2976_v35  ;;  %v743_v44 = vsel %vm737_vm6, 0.0, %v735_v31 }
 0x18e   :  { %v740_v38 = vpack.c.bf16 %v739_v42, %v738_v40  ;;  %v745_v48 = vmul.f32 0.2, %v743_v44  ;;  %v746_v56 = vadd.f32 %v744_v47, %v3138_v45 }
 0x190   :  { %741 = vst.msk [vmem:[#allocation2 + $0x80] sm:$0xff] %vm548_vm4, %v740_v38  ;;  %vm748_vm7 = vcmp.gt.f32.partialorder %v746_v56, 0.5  ;;  %v747_v57 = vadd.f32 %v745_v48, %v3146_v53 }
 0x191   :  { %v754_v58 = vsel %vm748_vm7, 0.0, %v746_v56  ;;  %v889_v59 = vld [vmem:[#allocation2 + $0x78] sm:$0xff]  ;;  %v750_v60 = vsel %vm748_vm7, 1.0, %v2976_v35 }
 0x192   :  { %v756_v61 = vmul.f32 0.2, %v754_v58  ;;  %vm749_vm8 = vcmp.gt.f32.partialorder %v747_v57, 0.5  ;;  %2722 = vmatmul.mubr.msk.bf16.gmra.mrb[52].mxu1 %vm548_vm4, %v889_v59 }
 0x193   :  { %v751_v1 = vsel %vm749_vm8, 1.0, %v2976_v35  ;;  %v755_v2 = vsel %vm749_vm8, 0.0, %v747_v57 }
 0x194   :  { %v758_v3 = vadd.f32 %v756_v61, %v3160_v10  ;;  %v752_v6 = vpack.c.bf16 %v751_v1, %v750_v60  ;;  %v757_v45 = vmul.f32 0.2, %v755_v2 }
 0x196   :  { %vm760_vm9 = vcmp.gt.f32.partialorder %v758_v3, 0.5  ;;  %753 = vst.msk [vmem:[#allocation2 + $0x88] sm:$0xff] %vm548_vm4, %v752_v6  ;;  %v759_v53 = vadd.f32 %v757_v45, %v3171_v21 }
 0x197   :  { %v766_v4 = vsel %vm760_vm9, 0.0, %v758_v3  ;;  %v890_v29 = vld [vmem:[#allocation2 + $0x80] sm:$0xff]  ;;  %v762_v12 = vsel %vm760_vm9, 1.0, %v2976_v35 }
 0x198   :  { %v768_v43 = vmul.f32 0.2, %v766_v4  ;;  %vm761_vm10 = vcmp.gt.f32.partialorder %v759_v53, 0.5  ;;  %2725 = vmatprep.mubr.msk.bf16.mxu1 %vm548_vm4, %v890_v29 }
 0x199   :  { %v763_v13 = vsel %vm761_vm10, 1.0, %v2976_v35  ;;  %v767_v14 = vsel %vm761_vm10, 0.0, %v759_v53 }
 0x19a   :  { %v764_v25 = vpack.c.bf16 %v763_v13, %v762_v12  ;;  %v769_v10 = vmul.f32 0.2, %v767_v14  ;;  %v770_v63 = vadd.f32 %v768_v43, %v3156_v5 }
 0x19c   :  { %765 = vst.msk [vmem:[#allocation2 + $0x90] sm:$0xff] %vm548_vm4, %v764_v25  ;;  %vm772_vm11 = vcmp.gt.f32.partialorder %v770_v63, 0.5  ;;  %v771_v21 = vadd.f32 %v769_v10, %v3165_v15 }
 0x19d   :  { %v778_v18 = vsel %vm772_vm11, 0.0, %v770_v63  ;;  %v891_v19 = vld [vmem:[#allocation2 + $0x88] sm:$0xff]  ;;  %v774_v20 = vsel %vm772_vm11, 1.0, %v2976_v35 }
 0x19e   :  { %v780_v9 = vmul.f32 0.2, %v778_v18  ;;  %vm773_vm12 = vcmp.gt.f32.partialorder %v771_v21, 0.5  ;;  %2726 = vmatmul.mubr.msk.bf16.gmra.mrb[56].mxu1 %vm548_vm4, %v891_v19 }
 0x19f   :  { %v775_v37 = vsel %vm773_vm12, 1.0, %v2976_v35  ;;  %v779_v24 = vsel %vm773_vm12, 0.0, %v771_v21 }
 0x1a0   :  { %v782_v49 = vadd.f32 %v780_v9, %v3185_v41  ;;  %v776_v27 = vpack.c.bf16 %v775_v37, %v774_v20  ;;  %v781_v5 = vmul.f32 0.2, %v779_v24 }
 0x1a2   :  { %vm784_vm13 = vcmp.gt.f32.partialorder %v782_v49, 0.5  ;;  %777 = vst.msk [vmem:[#allocation2 + $0x98] sm:$0xff] %vm548_vm4, %v776_v27  ;;  %v783_v15 = vadd.f32 %v781_v5, %v3194_v54 }
 0x1a3   :  { %v790_v16 = vsel %vm784_vm13, 0.0, %v782_v49  ;;  %v892_v28 = vld [vmem:[#allocation2 + $0x90] sm:$0xff]  ;;  %v786_v62 = vsel %vm784_vm13, 1.0, %v2976_v35 }
 0x1a4   :  { %v792_v46 = vmul.f32 0.2, %v790_v16  ;;  %vm785_vm14 = vcmp.gt.f32.partialorder %v783_v15, 0.5  ;;  %2729 = vmatprep.mubr.msk.bf16.mxu1 %vm548_vm4, %v892_v28 }
 0x1a5   :  { %v787_v22 = vsel %vm785_vm14, 1.0, %v2976_v35  ;;  %v791_v7 = vsel %vm785_vm14, 0.0, %v783_v15 }
 0x1a6   :  { %v788_v31 = vpack.c.bf16 %v787_v22, %v786_v62  ;;  %v793_v41 = vmul.f32 0.2, %v791_v7  ;;  %v794_v32 = vadd.f32 %v792_v46, %v3180_v34 }
 0x1a8   :  { %789 = vst.msk [vmem:[#allocation2 + $0xa0] sm:$0xff] %vm548_vm4, %v788_v31  ;;  %vm796_vm15 = vcmp.gt.f32.partialorder %v794_v32, 0.5  ;;  %v795_v54 = vadd.f32 %v793_v41, %v3191_v52 }
 0x1a9   :  { %v802_v36 = vsel %vm796_vm15, 0.0, %v794_v32  ;;  %v893_v47 = vld [vmem:[#allocation2 + $0x98] sm:$0xff]  ;;  %v798_v42 = vsel %vm796_vm15, 1.0, %v2976_v35 }
 0x1aa   :  { %v804_v40 = vmul.f32 0.2, %v802_v36  ;;  %vm797_vm0 = vcmp.gt.f32.partialorder %v795_v54, 0.5  ;;  %2730 = vmatmul.mubr.msk.bf16.gmra.mrb[60].mxu1 %vm548_vm4, %v893_v47 }
 0x1ab   :  { %v799_v44 = vsel %vm797_vm0, 1.0, %v2976_v35  ;;  %v803_v38 = vsel %vm797_vm0, 0.0, %v795_v54 }
 0x1ac   :  { %v806_v48 = vadd.f32 %v804_v40, %v3208_v11  ;;  %v800_v56 = vpack.c.bf16 %v799_v44, %v798_v42  ;;  %v805_v34 = vmul.f32 0.2, %v803_v38 }
 0x1ae   :  { %vm808_vm1 = vcmp.gt.f32.partialorder %v806_v48, 0.5  ;;  %801 = vst.msk [vmem:[#allocation2 + $0xa8] sm:$0xff] %vm548_vm4, %v800_v56  ;;  %v807_v52 = vadd.f32 %v805_v34, %v3218_v23 }
 0x1af   :  { %v814_v57 = vsel %vm808_vm1, 0.0, %v806_v48  ;;  %v894_v58 = vld [vmem:[#allocation2 + $0xa0] sm:$0xff]  ;;  %v810_v61 = vsel %vm808_vm1, 1.0, %v2976_v35 }
 0x1b0   :  { %v816_v59 = vmul.f32 0.2, %v814_v57  ;;  %vm809_vm2 = vcmp.gt.f32.partialorder %v807_v52, 0.5  ;;  %2733 = vmatprep.mubr.msk.bf16.mxu1 %vm548_vm4, %v894_v58 }
 0x1b1   :  { %v811_v60 = vsel %vm809_vm2, 1.0, %v2976_v35  ;;  %v815_v1 = vsel %vm809_vm2, 0.0, %v807_v52 }
 0x1b2   :  { %v812_v2 = vpack.c.bf16 %v811_v60, %v810_v61  ;;  %v817_v11 = vmul.f32 0.2, %v815_v1  ;;  %v818_v3 = vadd.f32 %v816_v59, %v3205_v8 }
 0x1b4   :  { %813 = vst.msk [vmem:[#allocation2 + $0xb0] sm:$0xff] %vm548_vm4, %v812_v2  ;;  %vm820_vm3 = vcmp.gt.f32.partialorder %v818_v3, 0.5  ;;  %v819_v23 = vadd.f32 %v817_v11, %v3215_v17 }
 0x1b5   :  { %v826_v6 = vsel %vm820_vm3, 0.0, %v818_v3  ;;  %v895_v45 = vld [vmem:[#allocation2 + $0xa8] sm:$0xff]  ;;  %v822_v4 = vsel %vm820_vm3, 1.0, %v2976_v35 }
 0x1b6   :  { %v828_v53 = vmul.f32 0.2, %v826_v6  ;;  %vm821_vm5 = vcmp.gt.f32.partialorder %v819_v23, 0.5  ;;  %2734 = vmatmul.mubr.msk.bf16.gmra.mrb[64].mxu1 %vm548_vm4, %v895_v45 }
 0x1b7   :  { %v823_v29 = vsel %vm821_vm5, 1.0, %v2976_v35  ;;  %v827_v43 = vsel %vm821_vm5, 0.0, %v819_v23 }
 0x1b8   :  { %v830_v12 = vadd.f32 %v828_v53, %v3236_v50  ;;  %v824_v13 = vpack.c.bf16 %v823_v29, %v822_v4  ;;  %v829_v8 = vmul.f32 0.2, %v827_v43 }
 0x1ba   :  { %vm832_vm6 = vcmp.gt.f32.partialorder %v830_v12, 0.5  ;;  %825 = vst.msk [vmem:[#allocation2 + $0xb8] sm:$0xff] %vm548_vm4, %v824_v13  ;;  %v831_v17 = vadd.f32 %v829_v8, %v3250_v0 }
 0x1bb   :  { %v838_v14 = vsel %vm832_vm6, 0.0, %v830_v12  ;;  %v896_v25 = vld [vmem:[#allocation2 + $0xb0] sm:$0xff]  ;;  %v834_v63 = vsel %vm832_vm6, 1.0, %v2976_v35 }
 0x1bc   :  { %v840_v10 = vmul.f32 0.2, %v838_v14  ;;  %vm833_vm7 = vcmp.gt.f32.partialorder %v831_v17, 0.5  ;;  %2737 = vmatprep.mubr.msk.bf16.mxu1 %vm548_vm4, %v896_v25 }
 0x1bd   :  { %v835_v21 = vsel %vm833_vm7, 1.0, %v2976_v35  ;;  %v839_v18 = vsel %vm833_vm7, 0.0, %v831_v17 }
 0x1be   :  { %v836_v19 = vpack.c.bf16 %v835_v21, %v834_v63  ;;  %v841_v50 = vmul.f32 0.2, %v839_v18  ;;  %v842_v9 = vadd.f32 %v840_v10, %v3226_v39 }
 0x1c0   :  { %837 = vst.msk [vmem:[#allocation2 + $0xc0] sm:$0xff] %vm548_vm4, %v836_v19  ;;  %vm844_vm8 = vcmp.gt.f32.partialorder %v842_v9, 0.5  ;;  %v843_v0 = vadd.f32 %v841_v50, %v3241_v33 }
 0x1c1   :  { %v850_v20 = vsel %vm844_vm8, 0.0, %v842_v9  ;;  %v897_v37 = vld [vmem:[#allocation2 + $0xb8] sm:$0xff]  ;;  %v846_v49 = vsel %vm844_vm8, 1.0, %v2976_v35 }
 0x1c2   :  { %v852_v24 = vmul.f32 0.2, %v850_v20  ;;  %vm845_vm9 = vcmp.gt.f32.partialorder %v843_v0, 0.5  ;;  %2738 = vmatmul.mubr.msk.bf16.gmra.mrb[68].mxu1 %vm548_vm4, %v897_v37 }
 0x1c3   :  { %v847_v27 = vsel %vm845_vm9, 1.0, %v2976_v35  ;;  %v851_v5 = vsel %vm845_vm9, 0.0, %v843_v0 }
 0x1c4   :  { %v854_v15 = vadd.f32 %v852_v24, %v3267_v30  ;;  %v848_v16 = vpack.c.bf16 %v847_v27, %v846_v49  ;;  %v853_v39 = vmul.f32 0.2, %v851_v5 }
 0x1c6   :  { %vm856_vm10 = vcmp.gt.f32.partialorder %v854_v15, 0.5  ;;  %849 = vst.msk [vmem:[#allocation2 + $0xc8] sm:$0xff] %vm548_vm4, %v848_v16  ;;  %v855_v33 = vadd.f32 %v853_v39, %v3279_v55 }
 0x1c7   :  { %v862_v28 = vsel %vm856_vm10, 0.0, %v854_v15  ;;  %v898_v46 = vld [vmem:[#allocation2 + $0xc0] sm:$0xff]  ;;  %v858_v22 = vsel %vm856_vm10, 1.0, %v2976_v35 }
 0x1c8   :  { %v864_v62 = vmul.f32 0.2, %v862_v28  ;;  %vm857_vm11 = vcmp.gt.f32.partialorder %v855_v33, 0.5  ;;  %2741 = vmatprep.mubr.msk.bf16.mxu1 %vm548_vm4, %v898_v46 }
 0x1c9   :  { %v859_v7 = vsel %vm857_vm11, 1.0, %v2976_v35  ;;  %v863_v31 = vsel %vm857_vm11, 0.0, %v855_v33 }
 0x1ca   :  { %v866_v30 = vadd.f32 %v864_v62, %v3260_v26  ;;  %v860_v41 = vpack.c.bf16 %v859_v7, %v858_v22  ;;  %v865_v32 = vmul.f32 0.2, %v863_v31 }
 0x1cc   :  { %vm868_vm12 = vcmp.gt.f32.partialorder %v866_v30, 0.5  ;;  %861 = vst.msk [vmem:[#allocation2 + $0xd0] sm:$0xff] %vm548_vm4, %v860_v41  ;;  %v867_v55 = vadd.f32 %v865_v32, %v3276_v51  ;;  %v3430_v51 = vld [vmem:[%s3741_s4] ss:$0 sm:$0xff] }
 0x1cd   :  { %v899_v54 = vld [vmem:[#allocation2 + $0xc8] sm:$0xff]  ;;  %v870_v36 = vsel %vm868_vm12, 1.0, %v2976_v35 }
 0x1ce   :  { %vm869_vm13 = vcmp.gt.f32.partialorder %v867_v55, 0.5  ;;  %2742 = vmatmul.mubr.msk.bf16.gmra.mrb[72].mxu1 %vm548_vm4, %v899_v54 }
 0x1cf   :  { %v871_v47 = vsel %vm869_vm13, 1.0, %v2976_v35 }
 0x1d0   :  { %v872_v40 = vpack.c.bf16 %v871_v47, %v870_v36 }
 0x1d2   :  { %873 = vst.msk [vmem:[#allocation2 + $0xd8] sm:$0xff] %vm548_vm4, %v872_v40 }
 0x1d3   :  { %v900_v42 = vld [vmem:[#allocation2 + $0xd0] sm:$0xff] }
 0x1d4   :  { %2745 = vmatprep.mubr.msk.bf16.mxu1 %vm548_vm4, %v900_v42 }
 0x1d9   :  { %v901_v26 = vld [vmem:[#allocation2 + $0xd8] sm:$0xff] }
 0x1da   :  { %2746 = vmatmul.mubr.msk.bf16.gmra.mrb[76].mxu1 %vm548_vm4, %v901_v26 }
 0x211   :  { %v2695_v44 = vpop.f32.mrb[24].mxu1 }
 0x212   :  { %v1043_v38 = vpop.f32.mrb[25].mxu1  ;;  %v1052_v58 = vadd.f32 %v2695_v44, %v3430_v51 }
 0x213   :  { %v1044_v48 = vadd.f32 %v3430_v51, %v1043_v38  ;;  %v2696_v56 = vpop.f32.mrb[26].mxu1 }
 0x214   :  { %v1046_v34 = vpop.f32.mrb[27].mxu1  ;;  %v1055_v11 = vadd.f32 %v2696_v56, %v3430_v51 }
 0x215   :  { %vm1268_vm14 = vcmp.gt.f32.partialorder %v1044_v48, 0.5  ;;  %v1047_v52 = vadd.f32 %v3430_v51, %v1046_v34 }
 0x216   :  { %v1274_v57 = vsel %vm1268_vm14, 0.0, %v1044_v48  ;;  %v1270_v61 = vsel %vm1268_vm14, 1.0, %v2976_v35 }
 0x217   :  { %v1276_v59 = vmul.f32 0.2, %v1274_v57  ;;  %vm1269_vm15 = vcmp.gt.f32.partialorder %v1047_v52, 0.5 }
 0x218   :  { %v1271_v60 = vsel %vm1269_vm15, 1.0, %v2976_v35  ;;  %v1275_v1 = vsel %vm1269_vm15, 0.0, %v1047_v52 }
 0x219   :  { %v1278_v2 = vadd.f32 %v1276_v59, %v1052_v58  ;;  %v1272_v3 = vpack.c.bf16 %v1271_v60, %v1270_v61  ;;  %v1277_v23 = vmul.f32 0.2, %v1275_v1 }
 0x21b   :  { %1273 = vst.msk [vmem:[#allocation3] sm:$0xff] %vm548_vm4, %v1272_v3  ;;  %v1279_v6 = vadd.f32 %v1277_v23, %v1055_v11  ;;  %vm1280_vm0 = vcmp.gt.f32.partialorder %v1278_v2, 0.5 }
 0x21c   :  { %v1286_v45 = vsel %vm1280_vm0, 0.0, %v1278_v2  ;;  %v1282_v29 = vsel %vm1280_vm0, 1.0, %v2976_v35 }
 0x21d   :  { %v2699_v53 = vpop.f32.mrb[28].mxu1  ;;  %vm1281_vm1 = vcmp.gt.f32.partialorder %v1279_v6, 0.5  ;;  %v1288_v8 = vmul.f32 0.2, %v1286_v45 }
 0x21e   :  { %v1059_v4 = vpop.f32.mrb[29].mxu1  ;;  %v1283_v43 = vsel %vm1281_vm1, 1.0, %v2976_v35  ;;  %v1287_v12 = vsel %vm1281_vm1, 0.0, %v1279_v6  ;;  %v1068_v9 = vadd.f32 %v2699_v53, %v3430_v51 }
 0x21f   :  { %v1060_v13 = vadd.f32 %v3430_v51, %v1059_v4  ;;  %v2700_v17 = vpop.f32.mrb[30].mxu1  ;;  %v1284_v14 = vpack.c.bf16 %v1283_v43, %v1282_v29  ;;  %v1289_v21 = vmul.f32 0.2, %v1287_v12 }
 0x220   :  { %v1062_v25 = vpop.f32.mrb[31].mxu1  ;;  %v1071_v49 = vadd.f32 %v2700_v17, %v3430_v51 }
 0x221   :  { %v1290_v10 = vadd.f32 %v1288_v8, %v1060_v13  ;;  %v1063_v63 = vadd.f32 %v3430_v51, %v1062_v25  ;;  %1285 = vst.msk [vmem:[#allocation3 + $0x8] sm:$0xff] %vm548_vm4, %v1284_v14 }
 0x222   :  { %v1598_v18 = vld [vmem:[#allocation3] sm:$0xff] }
 0x223   :  { %vm1292_vm2 = vcmp.gt.f32.partialorder %v1290_v10, 0.5  ;;  %v1291_v19 = vadd.f32 %v1289_v21, %v1063_v63  ;;  %2753 = vmatprep.mubr.msk.bf16.mxu0 %vm548_vm4, %v1598_v18 }
 0x224   :  { %v1298_v50 = vsel %vm1292_vm2, 0.0, %v1290_v10  ;;  %v1294_v20 = vsel %vm1292_vm2, 1.0, %v2976_v35 }
 0x225   :  { %v1300_v0 = vmul.f32 0.2, %v1298_v50  ;;  %vm1293_vm3 = vcmp.gt.f32.partialorder %v1291_v19, 0.5 }
 0x226   :  { %v1295_v37 = vsel %vm1293_vm3, 1.0, %v2976_v35  ;;  %v1299_v24 = vsel %vm1293_vm3, 0.0, %v1291_v19 }
 0x227   :  { %v1296_v27 = vpack.c.bf16 %v1295_v37, %v1294_v20  ;;  %v1301_v5 = vmul.f32 0.2, %v1299_v24  ;;  %v1302_v15 = vadd.f32 %v1300_v0, %v1068_v9 }
 0x228   :  { %v1599_v16 = vld [vmem:[#allocation3 + $0x8] sm:$0xff] }
 0x229   :  { %1297 = vst.msk [vmem:[#allocation3 + $0x10] sm:$0xff] %vm548_vm4, %v1296_v27  ;;  %v2703_v39 = vpop.f32.mrb[32].mxu1  ;;  %2754 = vmatmul.mubr.msk.bf16.vlgmr.msra.gmra.mrb[32].mxu0 %vm548_vm4, %v1599_v16  ;;  %vm1304_vm5 = vcmp.gt.f32.partialorder %v1302_v15, 0.5  ;;  %v1303_v33 = vadd.f32 %v1301_v5, %v1071_v49 }
 0x22a   :  { %v1075_v28 = vpop.f32.mrb[33].mxu1  ;;  %v1310_v46 = vsel %vm1304_vm5, 0.0, %v1302_v15  ;;  %v1306_v31 = vsel %vm1304_vm5, 1.0, %v2976_v35  ;;  %v1084_v44 = vadd.f32 %v2703_v39, %v3430_v51 }
 0x22b   :  { %v1076_v62 = vadd.f32 %v3430_v51, %v1075_v28  ;;  %v1312_v22 = vmul.f32 0.2, %v1310_v46  ;;  %v2704_v7 = vpop.f32.mrb[34].mxu1  ;;  %vm1305_vm6 = vcmp.gt.f32.partialorder %v1303_v33, 0.5 }
 0x22c   :  { %v1078_v30 = vpop.f32.mrb[35].mxu1  ;;  %v1307_v41 = vsel %vm1305_vm6, 1.0, %v2976_v35  ;;  %v1311_v32 = vsel %vm1305_vm6, 0.0, %v1303_v33  ;;  %v1087_v52 = vadd.f32 %v2704_v7, %v3430_v51 }
 0x22d   :  { %v1314_v55 = vadd.f32 %v1312_v22, %v1076_v62  ;;  %v1079_v54 = vadd.f32 %v3430_v51, %v1078_v30  ;;  %v1308_v36 = vpack.c.bf16 %v1307_v41, %v1306_v31  ;;  %v1313_v47 = vmul.f32 0.2, %v1311_v32 }
 0x22f   :  { %vm1316_vm7 = vcmp.gt.f32.partialorder %v1314_v55, 0.5  ;;  %1309 = vst.msk [vmem:[#allocation3 + $0x18] sm:$0xff] %vm548_vm4, %v1308_v36  ;;  %v1315_v40 = vadd.f32 %v1313_v47, %v1079_v54 }
 0x230   :  { %v1322_v42 = vsel %vm1316_vm7, 0.0, %v1314_v55  ;;  %v1600_v26 = vld [vmem:[#allocation3 + $0x10] sm:$0xff]  ;;  %v1318_v48 = vsel %vm1316_vm7, 1.0, %v2976_v35 }
 0x231   :  { %v1324_v38 = vmul.f32 0.2, %v1322_v42  ;;  %vm1317_vm8 = vcmp.gt.f32.partialorder %v1315_v40, 0.5  ;;  %2757 = vmatprep.mubr.msk.bf16.mxu0 %vm548_vm4, %v1600_v26 }
 0x232   :  { %v1319_v56 = vsel %vm1317_vm8, 1.0, %v2976_v35  ;;  %v1323_v34 = vsel %vm1317_vm8, 0.0, %v1315_v40 }
 0x233   :  { %v1320_v57 = vpack.c.bf16 %v1319_v56, %v1318_v48  ;;  %v1325_v58 = vmul.f32 0.2, %v1323_v34  ;;  %v1326_v59 = vadd.f32 %v1324_v38, %v1084_v44 }
 0x235   :  { %1321 = vst.msk [vmem:[#allocation3 + $0x20] sm:$0xff] %vm548_vm4, %v1320_v57  ;;  %v2707_v61 = vpop.f32.mrb[36].mxu1  ;;  %vm1328_vm9 = vcmp.gt.f32.partialorder %v1326_v59, 0.5  ;;  %v1327_v60 = vadd.f32 %v1325_v58, %v1087_v52 }
 0x236   :  { %v1091_v1 = vpop.f32.mrb[37].mxu1  ;;  %v1334_v2 = vsel %vm1328_vm9, 0.0, %v1326_v59  ;;  %v1601_v11 = vld [vmem:[#allocation3 + $0x18] sm:$0xff]  ;;  %v1330_v45 = vsel %vm1328_vm9, 1.0, %v2976_v35  ;;  %v1100_v10 = vadd.f32 %v2707_v61, %v3430_v51 }
 0x237   :  { %v1092_v3 = vadd.f32 %v3430_v51, %v1091_v1  ;;  %v1336_v23 = vmul.f32 0.2, %v1334_v2  ;;  %v2708_v6 = vpop.f32.mrb[38].mxu1  ;;  %2758 = vmatmul.mubr.msk.bf16.gmra.mrb[36].mxu0 %vm548_vm4, %v1601_v11  ;;  %vm1329_vm10 = vcmp.gt.f32.partialorder %v1327_v60, 0.5 }
 0x238   :  { %v1094_v53 = vpop.f32.mrb[39].mxu1  ;;  %v1331_v4 = vsel %vm1329_vm10, 1.0, %v2976_v35  ;;  %v1335_v29 = vsel %vm1329_vm10, 0.0, %v1327_v60  ;;  %v1103_v50 = vadd.f32 %v2708_v6, %v3430_v51 }
 0x239   :  { %v1338_v43 = vadd.f32 %v1336_v23, %v1092_v3  ;;  %v1095_v12 = vadd.f32 %v3430_v51, %v1094_v53  ;;  %v1332_v13 = vpack.c.bf16 %v1331_v4, %v1330_v45  ;;  %v1337_v8 = vmul.f32 0.2, %v1335_v29 }
 0x23b   :  { %vm1340_vm11 = vcmp.gt.f32.partialorder %v1338_v43, 0.5  ;;  %1333 = vst.msk [vmem:[#allocation3 + $0x28] sm:$0xff] %vm548_vm4, %v1332_v13  ;;  %v1339_v17 = vadd.f32 %v1337_v8, %v1095_v12 }
 0x23c   :  { %v1346_v14 = vsel %vm1340_vm11, 0.0, %v1338_v43  ;;  %v1602_v25 = vld [vmem:[#allocation3 + $0x20] sm:$0xff]  ;;  %v1342_v21 = vsel %vm1340_vm11, 1.0, %v2976_v35 }
 0x23d   :  { %v1348_v63 = vmul.f32 0.2, %v1346_v14  ;;  %vm1341_vm12 = vcmp.gt.f32.partialorder %v1339_v17, 0.5  ;;  %2761 = vmatprep.mubr.msk.bf16.mxu0 %vm548_vm4, %v1602_v25 }
 0x23e   :  { %v1343_v18 = vsel %vm1341_vm12, 1.0, %v2976_v35  ;;  %v1347_v19 = vsel %vm1341_vm12, 0.0, %v1339_v17 }
 0x23f   :  { %v1344_v9 = vpack.c.bf16 %v1343_v18, %v1342_v21  ;;  %v1349_v0 = vmul.f32 0.2, %v1347_v19  ;;  %v1350_v20 = vadd.f32 %v1348_v63, %v1100_v10 }
 0x241   :  { %1345 = vst.msk [vmem:[#allocation3 + $0x30] sm:$0xff] %vm548_vm4, %v1344_v9  ;;  %v2711_v37 = vpop.f32.mrb[40].mxu1  ;;  %vm1352_vm13 = vcmp.gt.f32.partialorder %v1350_v20, 0.5  ;;  %v1351_v24 = vadd.f32 %v1349_v0, %v1103_v50 }
 0x242   :  { %v1107_v49 = vpop.f32.mrb[41].mxu1  ;;  %v1358_v27 = vsel %vm1352_vm13, 0.0, %v1350_v20  ;;  %v1603_v5 = vld [vmem:[#allocation3 + $0x28] sm:$0xff]  ;;  %v1354_v33 = vsel %vm1352_vm13, 1.0, %v2976_v35  ;;  %v1116_v54 = vadd.f32 %v2711_v37, %v3430_v51 }
 0x243   :  { %v1108_v15 = vadd.f32 %v3430_v51, %v1107_v49  ;;  %v1360_v16 = vmul.f32 0.2, %v1358_v27  ;;  %v2712_v39 = vpop.f32.mrb[42].mxu1  ;;  %2762 = vmatmul.mubr.msk.bf16.gmra.mrb[40].mxu0 %vm548_vm4, %v1603_v5  ;;  %vm1353_vm14 = vcmp.gt.f32.partialorder %v1351_v24, 0.5 }
 0x244   :  { %v1110_v28 = vpop.f32.mrb[43].mxu1  ;;  %v1355_v46 = vsel %vm1353_vm14, 1.0, %v2976_v35  ;;  %v1359_v62 = vsel %vm1353_vm14, 0.0, %v1351_v24  ;;  %v1119_v26 = vadd.f32 %v2712_v39, %v3430_v51 }
 0x245   :  { %v1362_v22 = vadd.f32 %v1360_v16, %v1108_v15  ;;  %v1111_v7 = vadd.f32 %v3430_v51, %v1110_v28  ;;  %v1356_v31 = vpack.c.bf16 %v1355_v46, %v1354_v33  ;;  %v1361_v30 = vmul.f32 0.2, %v1359_v62 }
 0x247   :  { %vm1364_vm15 = vcmp.gt.f32.partialorder %v1362_v22, 0.5  ;;  %1357 = vst.msk [vmem:[#allocation3 + $0x38] sm:$0xff] %vm548_vm4, %v1356_v31  ;;  %v1363_v41 = vadd.f32 %v1361_v30, %v1111_v7 }
 0x248   :  { %v1370_v32 = vsel %vm1364_vm15, 0.0, %v1362_v22  ;;  %v1604_v55 = vld [vmem:[#allocation3 + $0x30] sm:$0xff]  ;;  %v1366_v47 = vsel %vm1364_vm15, 1.0, %v2976_v35 }
 0x249   :  { %v1372_v36 = vmul.f32 0.2, %v1370_v32  ;;  %vm1365_vm0 = vcmp.gt.f32.partialorder %v1363_v41, 0.5  ;;  %2765 = vmatprep.mubr.msk.bf16.mxu0 %vm548_vm4, %v1604_v55 }
 0x24a   :  { %v1367_v40 = vsel %vm1365_vm0, 1.0, %v2976_v35  ;;  %v1371_v42 = vsel %vm1365_vm0, 0.0, %v1363_v41 }
 0x24b   :  { %v1368_v44 = vpack.c.bf16 %v1367_v40, %v1366_v47  ;;  %v1373_v38 = vmul.f32 0.2, %v1371_v42  ;;  %v1374_v48 = vadd.f32 %v1372_v36, %v1116_v54 }
 0x24d   :  { %1369 = vst.msk [vmem:[#allocation3 + $0x40] sm:$0xff] %vm548_vm4, %v1368_v44  ;;  %v2715_v56 = vpop.f32.mrb[44].mxu1  ;;  %vm1376_vm1 = vcmp.gt.f32.partialorder %v1374_v48, 0.5  ;;  %v1375_v34 = vadd.f32 %v1373_v38, %v1119_v26 }
 0x24e   :  { %v1123_v52 = vpop.f32.mrb[45].mxu1  ;;  %v1382_v57 = vsel %vm1376_vm1, 0.0, %v1374_v48  ;;  %v1605_v58 = vld [vmem:[#allocation3 + $0x38] sm:$0xff]  ;;  %v1378_v1 = vsel %vm1376_vm1, 1.0, %v2976_v35  ;;  %v1132_v12 = vadd.f32 %v2715_v56, %v3430_v51 }
 0x24f   :  { %v1124_v59 = vadd.f32 %v3430_v51, %v1123_v52  ;;  %v1384_v61 = vmul.f32 0.2, %v1382_v57  ;;  %v2716_v60 = vpop.f32.mrb[46].mxu1  ;;  %2766 = vmatmul.mubr.msk.bf16.gmra.mrb[44].mxu0 %vm548_vm4, %v1605_v58  ;;  %vm1377_vm2 = vcmp.gt.f32.partialorder %v1375_v34, 0.5 }
 0x250   :  { %v1126_v2 = vpop.f32.mrb[47].mxu1  ;;  %v1379_v11 = vsel %vm1377_vm2, 1.0, %v2976_v35  ;;  %v1383_v3 = vsel %vm1377_vm2, 0.0, %v1375_v34  ;;  %v1135_v25 = vadd.f32 %v2716_v60, %v3430_v51 }
 0x251   :  { %v1386_v23 = vadd.f32 %v1384_v61, %v1124_v59  ;;  %v1127_v6 = vadd.f32 %v3430_v51, %v1126_v2  ;;  %v1380_v45 = vpack.c.bf16 %v1379_v11, %v1378_v1  ;;  %v1385_v53 = vmul.f32 0.2, %v1383_v3 }
 0x253   :  { %vm1388_vm3 = vcmp.gt.f32.partialorder %v1386_v23, 0.5  ;;  %1381 = vst.msk [vmem:[#allocation3 + $0x48] sm:$0xff] %vm548_vm4, %v1380_v45  ;;  %v1387_v4 = vadd.f32 %v1385_v53, %v1127_v6 }
 0x254   :  { %v1394_v29 = vsel %vm1388_vm3, 0.0, %v1386_v23  ;;  %v1606_v43 = vld [vmem:[#allocation3 + $0x40] sm:$0xff]  ;;  %v1390_v8 = vsel %vm1388_vm3, 1.0, %v2976_v35 }
 0x255   :  { %v1396_v13 = vmul.f32 0.2, %v1394_v29  ;;  %vm1389_vm5 = vcmp.gt.f32.partialorder %v1387_v4, 0.5  ;;  %2769 = vmatprep.mubr.msk.bf16.mxu0 %vm548_vm4, %v1606_v43 }
 0x256   :  { %v1391_v17 = vsel %vm1389_vm5, 1.0, %v2976_v35  ;;  %v1395_v14 = vsel %vm1389_vm5, 0.0, %v1387_v4 }
 0x257   :  { %v1392_v10 = vpack.c.bf16 %v1391_v17, %v1390_v8  ;;  %v1397_v63 = vmul.f32 0.2, %v1395_v14  ;;  %v1398_v21 = vadd.f32 %v1396_v13, %v1132_v12 }
 0x259   :  { %1393 = vst.msk [vmem:[#allocation3 + $0x50] sm:$0xff] %vm548_vm4, %v1392_v10  ;;  %v2719_v18 = vpop.f32.mrb[48].mxu1  ;;  %vm1400_vm6 = vcmp.gt.f32.partialorder %v1398_v21, 0.5  ;;  %v1399_v19 = vadd.f32 %v1397_v63, %v1135_v25 }
 0x25a   :  { %v1139_v50 = vpop.f32.mrb[49].mxu1  ;;  %v1406_v9 = vsel %vm1400_vm6, 0.0, %v1398_v21  ;;  %v1607_v0 = vld [vmem:[#allocation3 + $0x48] sm:$0xff]  ;;  %v1402_v49 = vsel %vm1400_vm6, 1.0, %v2976_v35  ;;  %v1148_v7 = vadd.f32 %v2719_v18, %v3430_v51 }
 0x25b   :  { %v1140_v20 = vadd.f32 %v3430_v51, %v1139_v50  ;;  %v1408_v37 = vmul.f32 0.2, %v1406_v9  ;;  %v2720_v24 = vpop.f32.mrb[50].mxu1  ;;  %2770 = vmatmul.mubr.msk.bf16.gmra.mrb[48].mxu0 %vm548_vm4, %v1607_v0  ;;  %vm1401_vm7 = vcmp.gt.f32.partialorder %v1399_v19, 0.5 }
 0x25c   :  { %v1142_v27 = vpop.f32.mrb[51].mxu1  ;;  %v1403_v5 = vsel %vm1401_vm7, 1.0, %v2976_v35  ;;  %v1407_v15 = vsel %vm1401_vm7, 0.0, %v1399_v19  ;;  %v1151_v55 = vadd.f32 %v2720_v24, %v3430_v51 }
 0x25d   :  { %v1410_v16 = vadd.f32 %v1408_v37, %v1140_v20  ;;  %v1143_v39 = vadd.f32 %v3430_v51, %v1142_v27  ;;  %v1404_v33 = vpack.c.bf16 %v1403_v5, %v1402_v49  ;;  %v1409_v28 = vmul.f32 0.2, %v1407_v15 }
 0x25f   :  { %vm1412_vm8 = vcmp.gt.f32.partialorder %v1410_v16, 0.5  ;;  %1405 = vst.msk [vmem:[#allocation3 + $0x58] sm:$0xff] %vm548_vm4, %v1404_v33  ;;  %v1411_v46 = vadd.f32 %v1409_v28, %v1143_v39 }
 0x260   :  { %v1418_v62 = vsel %vm1412_vm8, 0.0, %v1410_v16  ;;  %v1608_v22 = vld [vmem:[#allocation3 + $0x50] sm:$0xff]  ;;  %v1414_v30 = vsel %vm1412_vm8, 1.0, %v2976_v35 }
 0x261   :  { %v1420_v31 = vmul.f32 0.2, %v1418_v62  ;;  %vm1413_vm9 = vcmp.gt.f32.partialorder %v1411_v46, 0.5  ;;  %2773 = vmatprep.mubr.msk.bf16.mxu0 %vm548_vm4, %v1608_v22 }
 0x262   :  { %v1415_v41 = vsel %vm1413_vm9, 1.0, %v2976_v35  ;;  %v1419_v32 = vsel %vm1413_vm9, 0.0, %v1411_v46 }
 0x263   :  { %v1416_v54 = vpack.c.bf16 %v1415_v41, %v1414_v30  ;;  %v1421_v36 = vmul.f32 0.2, %v1419_v32  ;;  %v1422_v47 = vadd.f32 %v1420_v31, %v1148_v7 }
 0x265   :  { %1417 = vst.msk [vmem:[#allocation3 + $0x60] sm:$0xff] %vm548_vm4, %v1416_v54  ;;  %v2723_v40 = vpop.f32.mrb[52].mxu1  ;;  %vm1424_vm10 = vcmp.gt.f32.partialorder %v1422_v47, 0.5  ;;  %v1423_v42 = vadd.f32 %v1421_v36, %v1151_v55 }
 0x266   :  { %v1155_v26 = vpop.f32.mrb[53].mxu1  ;;  %v1430_v44 = vsel %vm1424_vm10, 0.0, %v1422_v47  ;;  %v1609_v38 = vld [vmem:[#allocation3 + $0x58] sm:$0xff]  ;;  %v1426_v52 = vsel %vm1424_vm10, 1.0, %v2976_v35  ;;  %v1164_v6 = vadd.f32 %v2723_v40, %v3430_v51 }
 0x267   :  { %v1156_v48 = vadd.f32 %v3430_v51, %v1155_v26  ;;  %v1432_v56 = vmul.f32 0.2, %v1430_v44  ;;  %v2724_v34 = vpop.f32.mrb[54].mxu1  ;;  %2774 = vmatmul.mubr.msk.bf16.gmra.mrb[52].mxu0 %vm548_vm4, %v1609_v38  ;;  %vm1425_vm11 = vcmp.gt.f32.partialorder %v1423_v42, 0.5 }
 0x268   :  { %v1158_v57 = vpop.f32.mrb[55].mxu1  ;;  %v1427_v58 = vsel %vm1425_vm11, 1.0, %v2976_v35  ;;  %v1431_v59 = vsel %vm1425_vm11, 0.0, %v1423_v42  ;;  %v1167_v43 = vadd.f32 %v2724_v34, %v3430_v51 }
 0x269   :  { %v1434_v61 = vadd.f32 %v1432_v56, %v1156_v48  ;;  %v1159_v60 = vadd.f32 %v3430_v51, %v1158_v57  ;;  %v1428_v1 = vpack.c.bf16 %v1427_v58, %v1426_v52  ;;  %v1433_v2 = vmul.f32 0.2, %v1431_v59 }
 0x26b   :  { %vm1436_vm12 = vcmp.gt.f32.partialorder %v1434_v61, 0.5  ;;  %1429 = vst.msk [vmem:[#allocation3 + $0x68] sm:$0xff] %vm548_vm4, %v1428_v1  ;;  %v1435_v11 = vadd.f32 %v1433_v2, %v1159_v60 }
 0x26c   :  { %v1442_v3 = vsel %vm1436_vm12, 0.0, %v1434_v61  ;;  %v1610_v23 = vld [vmem:[#allocation3 + $0x60] sm:$0xff]  ;;  %v1438_v53 = vsel %vm1436_vm12, 1.0, %v2976_v35 }
 0x26d   :  { %v1444_v45 = vmul.f32 0.2, %v1442_v3  ;;  %vm1437_vm13 = vcmp.gt.f32.partialorder %v1435_v11, 0.5  ;;  %2777 = vmatprep.mubr.msk.bf16.mxu0 %vm548_vm4, %v1610_v23 }
 0x26e   :  { %v1439_v4 = vsel %vm1437_vm13, 1.0, %v2976_v35  ;;  %v1443_v29 = vsel %vm1437_vm13, 0.0, %v1435_v11 }
 0x26f   :  { %v1440_v12 = vpack.c.bf16 %v1439_v4, %v1438_v53  ;;  %v1445_v13 = vmul.f32 0.2, %v1443_v29  ;;  %v1446_v8 = vadd.f32 %v1444_v45, %v1164_v6 }
 0x271   :  { %1441 = vst.msk [vmem:[#allocation3 + $0x70] sm:$0xff] %vm548_vm4, %v1440_v12  ;;  %v2727_v17 = vpop.f32.mrb[56].mxu1  ;;  %vm1448_vm14 = vcmp.gt.f32.partialorder %v1446_v8, 0.5  ;;  %v1447_v14 = vadd.f32 %v1445_v13, %v1167_v43 }
 0x272   :  { %v1171_v25 = vpop.f32.mrb[57].mxu1  ;;  %v1454_v10 = vsel %vm1448_vm14, 0.0, %v1446_v8  ;;  %v1611_v63 = vld [vmem:[#allocation3 + $0x68] sm:$0xff]  ;;  %v1450_v50 = vsel %vm1448_vm14, 1.0, %v2976_v35  ;;  %v1180_v39 = vadd.f32 %v2727_v17, %v3430_v51 }
 0x273   :  { %v1172_v21 = vadd.f32 %v3430_v51, %v1171_v25  ;;  %v1456_v18 = vmul.f32 0.2, %v1454_v10  ;;  %v2728_v19 = vpop.f32.mrb[58].mxu1  ;;  %2778 = vmatmul.mubr.msk.bf16.gmra.mrb[56].mxu0 %vm548_vm4, %v1611_v63  ;;  %vm1449_vm15 = vcmp.gt.f32.partialorder %v1447_v14, 0.5 }
 0x274   :  { %v1174_v9 = vpop.f32.mrb[59].mxu1  ;;  %v1451_v0 = vsel %vm1449_vm15, 1.0, %v2976_v35  ;;  %v1455_v20 = vsel %vm1449_vm15, 0.0, %v1447_v14  ;;  %v1183_v22 = vadd.f32 %v2728_v19, %v3430_v51 }
 0x275   :  { %v1458_v37 = vadd.f32 %v1456_v18, %v1172_v21  ;;  %v1175_v24 = vadd.f32 %v3430_v51, %v1174_v9  ;;  %v1452_v49 = vpack.c.bf16 %v1451_v0, %v1450_v50  ;;  %v1457_v27 = vmul.f32 0.2, %v1455_v20 }
 0x277   :  { %vm1460_vm0 = vcmp.gt.f32.partialorder %v1458_v37, 0.5  ;;  %1453 = vst.msk [vmem:[#allocation3 + $0x78] sm:$0xff] %vm548_vm4, %v1452_v49  ;;  %v1459_v5 = vadd.f32 %v1457_v27, %v1175_v24 }
 0x278   :  { %v1466_v15 = vsel %vm1460_vm0, 0.0, %v1458_v37  ;;  %v1612_v16 = vld [vmem:[#allocation3 + $0x70] sm:$0xff]  ;;  %v1462_v28 = vsel %vm1460_vm0, 1.0, %v2976_v35 }
 0x279   :  { %v1468_v33 = vmul.f32 0.2, %v1466_v15  ;;  %vm1461_vm1 = vcmp.gt.f32.partialorder %v1459_v5, 0.5  ;;  %2781 = vmatprep.mubr.msk.bf16.mxu0 %vm548_vm4, %v1612_v16 }
 0x27a   :  { %v1463_v46 = vsel %vm1461_vm1, 1.0, %v2976_v35  ;;  %v1467_v62 = vsel %vm1461_vm1, 0.0, %v1459_v5 }
 0x27b   :  { %v1464_v7 = vpack.c.bf16 %v1463_v46, %v1462_v28  ;;  %v1469_v31 = vmul.f32 0.2, %v1467_v62  ;;  %v1470_v30 = vadd.f32 %v1468_v33, %v1180_v39 }
 0x27d   :  { %1465 = vst.msk [vmem:[#allocation3 + $0x80] sm:$0xff] %vm548_vm4, %v1464_v7  ;;  %v2731_v41 = vpop.f32.mrb[60].mxu1  ;;  %vm1472_vm2 = vcmp.gt.f32.partialorder %v1470_v30, 0.5  ;;  %v1471_v32 = vadd.f32 %v1469_v31, %v1183_v22 }
 0x27e   :  { %v1187_v55 = vpop.f32.mrb[61].mxu1  ;;  %v1478_v54 = vsel %vm1472_vm2, 0.0, %v1470_v30  ;;  %v1613_v36 = vld [vmem:[#allocation3 + $0x78] sm:$0xff]  ;;  %v1474_v26 = vsel %vm1472_vm2, 1.0, %v2976_v35  ;;  %v1196_v60 = vadd.f32 %v2731_v41, %v3430_v51 }
 0x27f   :  { %v1188_v47 = vadd.f32 %v3430_v51, %v1187_v55  ;;  %v1480_v40 = vmul.f32 0.2, %v1478_v54  ;;  %v2732_v42 = vpop.f32.mrb[62].mxu1  ;;  %2782 = vmatmul.mubr.msk.bf16.gmra.mrb[60].mxu0 %vm548_vm4, %v1613_v36  ;;  %vm1473_vm3 = vcmp.gt.f32.partialorder %v1471_v32, 0.5 }
 0x280   :  { %v1190_v44 = vpop.f32.mrb[63].mxu1  ;;  %v1475_v38 = vsel %vm1473_vm3, 1.0, %v2976_v35  ;;  %v1479_v48 = vsel %vm1473_vm3, 0.0, %v1471_v32  ;;  %v1199_v23 = vadd.f32 %v2732_v42, %v3430_v51 }
 0x281   :  { %v1482_v56 = vadd.f32 %v1480_v40, %v1188_v47  ;;  %v1191_v34 = vadd.f32 %v3430_v51, %v1190_v44  ;;  %v1476_v52 = vpack.c.bf16 %v1475_v38, %v1474_v26  ;;  %v1481_v57 = vmul.f32 0.2, %v1479_v48 }
 0x283   :  { %vm1484_vm5 = vcmp.gt.f32.partialorder %v1482_v56, 0.5  ;;  %1477 = vst.msk [vmem:[#allocation3 + $0x88] sm:$0xff] %vm548_vm4, %v1476_v52  ;;  %v1483_v58 = vadd.f32 %v1481_v57, %v1191_v34 }
 0x284   :  { %v1490_v59 = vsel %vm1484_vm5, 0.0, %v1482_v56  ;;  %v1614_v61 = vld [vmem:[#allocation3 + $0x80] sm:$0xff]  ;;  %v1486_v2 = vsel %vm1484_vm5, 1.0, %v2976_v35 }
 0x285   :  { %v1492_v1 = vmul.f32 0.2, %v1490_v59  ;;  %vm1485_vm6 = vcmp.gt.f32.partialorder %v1483_v58, 0.5  ;;  %2785 = vmatprep.mubr.msk.bf16.mxu0 %vm548_vm4, %v1614_v61 }
 0x286   :  { %v1487_v11 = vsel %vm1485_vm6, 1.0, %v2976_v35  ;;  %v1491_v3 = vsel %vm1485_vm6, 0.0, %v1483_v58 }
 0x287   :  { %v1488_v6 = vpack.c.bf16 %v1487_v11, %v1486_v2  ;;  %v1493_v45 = vmul.f32 0.2, %v1491_v3  ;;  %v1494_v53 = vadd.f32 %v1492_v1, %v1196_v60 }
 0x289   :  { %1489 = vst.msk [vmem:[#allocation3 + $0x90] sm:$0xff] %vm548_vm4, %v1488_v6  ;;  %v2735_v4 = vpop.f32.mrb[64].mxu1  ;;  %vm1496_vm7 = vcmp.gt.f32.partialorder %v1494_v53, 0.5  ;;  %v1495_v29 = vadd.f32 %v1493_v45, %v1199_v23 }
 0x28a   :  { %v1203_v43 = vpop.f32.mrb[65].mxu1  ;;  %v1502_v12 = vsel %vm1496_vm7, 0.0, %v1494_v53  ;;  %v1615_v13 = vld [vmem:[#allocation3 + $0x88] sm:$0xff]  ;;  %v1498_v25 = vsel %vm1496_vm7, 1.0, %v2976_v35  ;;  %v1212_v24 = vadd.f32 %v2735_v4, %v3430_v51 }
 0x28b   :  { %v1204_v8 = vadd.f32 %v3430_v51, %v1203_v43  ;;  %v1504_v17 = vmul.f32 0.2, %v1502_v12  ;;  %v2736_v14 = vpop.f32.mrb[66].mxu1  ;;  %2786 = vmatmul.mubr.msk.bf16.gmra.mrb[64].mxu0 %vm548_vm4, %v1615_v13  ;;  %vm1497_vm8 = vcmp.gt.f32.partialorder %v1495_v29, 0.5 }
 0x28c   :  { %v1206_v10 = vpop.f32.mrb[67].mxu1  ;;  %v1499_v63 = vsel %vm1497_vm8, 1.0, %v2976_v35  ;;  %v1503_v21 = vsel %vm1497_vm8, 0.0, %v1495_v29  ;;  %v1215_v16 = vadd.f32 %v2736_v14, %v3430_v51 }
 0x28d   :  { %v1506_v18 = vadd.f32 %v1504_v17, %v1204_v8  ;;  %v1207_v19 = vadd.f32 %v3430_v51, %v1206_v10  ;;  %v1500_v50 = vpack.c.bf16 %v1499_v63, %v1498_v25  ;;  %v1505_v9 = vmul.f32 0.2, %v1503_v21 }
 0x28f   :  { %vm1508_vm9 = vcmp.gt.f32.partialorder %v1506_v18, 0.5  ;;  %1501 = vst.msk [vmem:[#allocation3 + $0x98] sm:$0xff] %vm548_vm4, %v1500_v50  ;;  %v1507_v0 = vadd.f32 %v1505_v9, %v1207_v19 }
 0x290   :  { %v1514_v20 = vsel %vm1508_vm9, 0.0, %v1506_v18  ;;  %v1616_v37 = vld [vmem:[#allocation3 + $0x90] sm:$0xff]  ;;  %v1510_v27 = vsel %vm1508_vm9, 1.0, %v2976_v35 }
 0x291   :  { %v1516_v49 = vmul.f32 0.2, %v1514_v20  ;;  %vm1509_vm10 = vcmp.gt.f32.partialorder %v1507_v0, 0.5  ;;  %2789 = vmatprep.mubr.msk.bf16.mxu0 %vm548_vm4, %v1616_v37 }
 0x292   :  { %v1511_v5 = vsel %vm1509_vm10, 1.0, %v2976_v35  ;;  %v1515_v15 = vsel %vm1509_vm10, 0.0, %v1507_v0 }
 0x293   :  { %v1512_v39 = vpack.c.bf16 %v1511_v5, %v1510_v27  ;;  %v1517_v33 = vmul.f32 0.2, %v1515_v15  ;;  %v1518_v28 = vadd.f32 %v1516_v49, %v1212_v24 }
 0x295   :  { %1513 = vst.msk [vmem:[#allocation3 + $0xa0] sm:$0xff] %vm548_vm4, %v1512_v39  ;;  %v2739_v46 = vpop.f32.mrb[68].mxu1  ;;  %vm1520_vm11 = vcmp.gt.f32.partialorder %v1518_v28, 0.5  ;;  %v1519_v62 = vadd.f32 %v1517_v33, %v1215_v16 }
 0x296   :  { %v1219_v22 = vpop.f32.mrb[69].mxu1  ;;  %v1526_v7 = vsel %vm1520_vm11, 0.0, %v1518_v28  ;;  %v1617_v31 = vld [vmem:[#allocation3 + $0x98] sm:$0xff]  ;;  %v1522_v55 = vsel %vm1520_vm11, 1.0, %v2976_v35  ;;  %v1228_v34 = vadd.f32 %v2739_v46, %v3430_v51 }
 0x297   :  { %v1220_v30 = vadd.f32 %v3430_v51, %v1219_v22  ;;  %v1528_v41 = vmul.f32 0.2, %v1526_v7  ;;  %v2740_v32 = vpop.f32.mrb[70].mxu1  ;;  %2790 = vmatmul.mubr.msk.bf16.gmra.mrb[68].mxu0 %vm548_vm4, %v1617_v31  ;;  %vm1521_vm12 = vcmp.gt.f32.partialorder %v1519_v62, 0.5 }
 0x298   :  { %v1222_v54 = vpop.f32.mrb[71].mxu1  ;;  %v1523_v36 = vsel %vm1521_vm12, 1.0, %v2976_v35  ;;  %v1527_v47 = vsel %vm1521_vm12, 0.0, %v1519_v62  ;;  %v1231_v61 = vadd.f32 %v2740_v32, %v3430_v51 }
 0x299   :  { %v1530_v40 = vadd.f32 %v1528_v41, %v1220_v30  ;;  %v1223_v42 = vadd.f32 %v3430_v51, %v1222_v54  ;;  %v1524_v26 = vpack.c.bf16 %v1523_v36, %v1522_v55  ;;  %v1529_v44 = vmul.f32 0.2, %v1527_v47 }
 0x29b   :  { %vm1532_vm13 = vcmp.gt.f32.partialorder %v1530_v40, 0.5  ;;  %1525 = vst.msk [vmem:[#allocation3 + $0xa8] sm:$0xff] %vm548_vm4, %v1524_v26  ;;  %v1531_v38 = vadd.f32 %v1529_v44, %v1223_v42 }
 0x29c   :  { %v1538_v48 = vsel %vm1532_vm13, 0.0, %v1530_v40  ;;  %v1618_v56 = vld [vmem:[#allocation3 + $0xa0] sm:$0xff]  ;;  %v1534_v57 = vsel %vm1532_vm13, 1.0, %v2976_v35 }
 0x29d   :  { %v1540_v52 = vmul.f32 0.2, %v1538_v48  ;;  %vm1533_vm14 = vcmp.gt.f32.partialorder %v1531_v38, 0.5  ;;  %2793 = vmatprep.mubr.msk.bf16.mxu0 %vm548_vm4, %v1618_v56 }
 0x29e   :  { %v1535_v58 = vsel %vm1533_vm14, 1.0, %v2976_v35  ;;  %v1539_v59 = vsel %vm1533_vm14, 0.0, %v1531_v38 }
 0x29f   :  { %v1536_v60 = vpack.c.bf16 %v1535_v58, %v1534_v57  ;;  %v1541_v1 = vmul.f32 0.2, %v1539_v59  ;;  %v1542_v2 = vadd.f32 %v1540_v52, %v1228_v34 }
 0x2a1   :  { %1537 = vst.msk [vmem:[#allocation3 + $0xb0] sm:$0xff] %vm548_vm4, %v1536_v60  ;;  %v2743_v11 = vpop.f32.mrb[72].mxu1  ;;  %vm1544_vm15 = vcmp.gt.f32.partialorder %v1542_v2, 0.5  ;;  %v1543_v3 = vadd.f32 %v1541_v1, %v1231_v61 }
 0x2a2   :  { %v1235_v23 = vpop.f32.mrb[73].mxu1  ;;  %v1550_v6 = vsel %vm1544_vm15, 0.0, %v1542_v2  ;;  %v1619_v45 = vld [vmem:[#allocation3 + $0xa8] sm:$0xff]  ;;  %v1546_v43 = vsel %vm1544_vm15, 1.0, %v2976_v35  ;;  %v1244_v19 = vadd.f32 %v2743_v11, %v3430_v51 }
 0x2a3   :  { %v1236_v53 = vadd.f32 %v3430_v51, %v1235_v23  ;;  %v1552_v4 = vmul.f32 0.2, %v1550_v6  ;;  %v2744_v29 = vpop.f32.mrb[74].mxu1  ;;  %2794 = vmatmul.mubr.msk.bf16.gmra.mrb[72].mxu0 %vm548_vm4, %v1619_v45  ;;  %vm1545_vm0 = vcmp.gt.f32.partialorder %v1543_v3, 0.5  ;;  %v2325_v11 = vld [vmem:[#allocation10 + $0x8] sm:$0xff]  ;;  %v2326_v6 = vld [vmem:[#allocation10 + $0x10] sm:$0xff] }
 0x2a4   :  { %v1238_v12 = vpop.f32.mrb[75].mxu1  ;;  %v1547_v13 = vsel %vm1545_vm0, 1.0, %v2976_v35  ;;  %v1551_v8 = vsel %vm1545_vm0, 0.0, %v1543_v3  ;;  %v1247_v37 = vadd.f32 %v2744_v29, %v3430_v51  ;;  %v2327_v45 = vld [vmem:[#allocation10 + $0x18] sm:$0xff] }
 0x2a5   :  { %v1554_v17 = vadd.f32 %v1552_v4, %v1236_v53  ;;  %v1239_v14 = vadd.f32 %v3430_v51, %v1238_v12  ;;  %v1548_v25 = vpack.c.bf16 %v1547_v13, %v1546_v43  ;;  %v1553_v10 = vmul.f32 0.2, %v1551_v8  ;;  %v3603_v4 = vld [vmem:[%s3743_s6] ss:$0 sm:$0xff] }
 0x2a6   :  { %v2824_v53 = vpack.c.bf16 %v2327_v45, %v2326_v6 }
 0x2a7   :  { %vm1556_vm1 = vcmp.gt.f32.partialorder %v1554_v17, 0.5  ;;  %1549 = vst.msk [vmem:[#allocation3 + $0xb8] sm:$0xff] %vm548_vm4, %v1548_v25  ;;  %v1555_v63 = vadd.f32 %v1553_v10, %v1239_v14 }
 0x2a8   :  { %v1562_v21 = vsel %vm1556_vm1, 0.0, %v1554_v17  ;;  %v1620_v18 = vld [vmem:[#allocation3 + $0xb0] sm:$0xff]  ;;  %v1558_v9 = vsel %vm1556_vm1, 1.0, %v2976_v35 }
 0x2a9   :  { %v1564_v50 = vmul.f32 0.2, %v1562_v21  ;;  %vm1557_vm2 = vcmp.gt.f32.partialorder %v1555_v63, 0.5  ;;  %2797 = vmatprep.mubr.msk.bf16.mxu0 %vm548_vm4, %v1620_v18 }
 0x2aa   :  { %v1559_v0 = vsel %vm1557_vm2, 1.0, %v2976_v35  ;;  %v1563_v20 = vsel %vm1557_vm2, 0.0, %v1555_v63 }
 0x2ab   :  { %v1560_v24 = vpack.c.bf16 %v1559_v0, %v1558_v9  ;;  %v1565_v49 = vmul.f32 0.2, %v1563_v20  ;;  %v1566_v27 = vadd.f32 %v1564_v50, %v1244_v19 }
 0x2ad   :  { %1561 = vst.msk [vmem:[#allocation3 + $0xc0] sm:$0xff] %vm548_vm4, %v1560_v24  ;;  %v2747_v5 = vpop.f32.mrb[76].mxu1  ;;  %vm1568_vm3 = vcmp.gt.f32.partialorder %v1566_v27, 0.5  ;;  %v1567_v15 = vadd.f32 %v1565_v49, %v1247_v37 }
 0x2ae   :  { %v1251_v16 = vpop.f32.mrb[77].mxu1  ;;  %v1574_v39 = vsel %vm1568_vm3, 0.0, %v1566_v27  ;;  %v1621_v33 = vld [vmem:[#allocation3 + $0xb8] sm:$0xff]  ;;  %v1570_v22 = vsel %vm1568_vm3, 1.0, %v2976_v35  ;;  %v1260_v42 = vadd.f32 %v2747_v5, %v3430_v51 }
 0x2af   :  { %v1252_v28 = vadd.f32 %v3430_v51, %v1251_v16  ;;  %v1576_v46 = vmul.f32 0.2, %v1574_v39  ;;  %v2748_v62 = vpop.f32.mrb[78].mxu1  ;;  %2798 = vmatmul.mubr.msk.bf16.gmra.mrb[76].mxu0 %vm548_vm4, %v1621_v33  ;;  %vm1569_vm5 = vcmp.gt.f32.partialorder %v1567_v15, 0.5 }
 0x2b0   :  { %v1254_v7 = vpop.f32.mrb[79].mxu1  ;;  %v1571_v31 = vsel %vm1569_vm5, 1.0, %v2976_v35  ;;  %v1575_v30 = vsel %vm1569_vm5, 0.0, %v1567_v15  ;;  %v1263_v34 = vadd.f32 %v2748_v62, %v3430_v51 }
 0x2b1   :  { %v1578_v41 = vadd.f32 %v1576_v46, %v1252_v28  ;;  %v1255_v32 = vadd.f32 %v3430_v51, %v1254_v7  ;;  %v1572_v55 = vpack.c.bf16 %v1571_v31, %v1570_v22  ;;  %v1577_v54 = vmul.f32 0.2, %v1575_v30  ;;  %v2324_v51 = vld [vmem:[#allocation10] sm:$0xff] }
 0x2b2   :  { %v2820_v3 = vpack.c.bf16 %v2325_v11, %v2324_v51 }
 0x2b3   :  { %vm1580_vm6 = vcmp.gt.f32.partialorder %v1578_v41, 0.5  ;;  %1573 = vst.msk [vmem:[#allocation3 + $0xc8] sm:$0xff] %vm548_vm4, %v1572_v55  ;;  %v1579_v36 = vadd.f32 %v1577_v54, %v1255_v32 }
 0x2b4   :  { %v1586_v47 = vsel %vm1580_vm6, 0.0, %v1578_v41  ;;  %v1622_v40 = vld [vmem:[#allocation3 + $0xc0] sm:$0xff]  ;;  %v1582_v44 = vsel %vm1580_vm6, 1.0, %v2976_v35  ;;  %2821 = vmatprep.subr.bf16.mxu1 %v2820_v3 }
 0x2b5   :  { %v1588_v26 = vmul.f32 0.2, %v1586_v47  ;;  %vm1581_vm7 = vcmp.gt.f32.partialorder %v1579_v36, 0.5  ;;  %2801 = vmatprep.mubr.msk.bf16.mxu0 %vm548_vm4, %v1622_v40  ;;  %2823 = vmatpush3.bf16.msra.mxu1 %v2820_v3 }
 0x2b6   :  { %v1583_v38 = vsel %vm1581_vm7, 1.0, %v2976_v35  ;;  %v1587_v48 = vsel %vm1581_vm7, 0.0, %v1579_v36  ;;  %2825 = vmatprep.subr.bf16.mxu1 %v2824_v53 }
 0x2b7   :  { %v1590_v56 = vadd.f32 %v1588_v26, %v1260_v42  ;;  %v1584_v52 = vpack.c.bf16 %v1583_v38, %v1582_v44  ;;  %v1589_v57 = vmul.f32 0.2, %v1587_v48 }
 0x2b9   :  { %vm1592_vm8 = vcmp.gt.f32.partialorder %v1590_v56, 0.5  ;;  %1585 = vst.msk [vmem:[#allocation3 + $0xd0] sm:$0xff] %vm548_vm4, %v1584_v52  ;;  %v1591_v58 = vadd.f32 %v1589_v57, %v1263_v34  ;;  %2827 = vmatpush3.bf16.msra.mxu1 %v2824_v53 }
 0x2ba   :  { %v1623_v59 = vld [vmem:[#allocation3 + $0xc8] sm:$0xff]  ;;  %v1594_v61 = vsel %vm1592_vm8, 1.0, %v2976_v35 }
 0x2bb   :  { %vm1593_vm9 = vcmp.gt.f32.partialorder %v1591_v58, 0.5  ;;  %2802 = vmatmul.mubr.msk.bf16.gmra.mrb[80].mxu0 %vm548_vm4, %v1623_v59 }
 0x2bc   :  { %v1595_v60 = vsel %vm1593_vm9, 1.0, %v2976_v35 }
 0x2bd   :  { %v1596_v1 = vpack.c.bf16 %v1595_v60, %v1594_v61 }
 0x2bf   :  { %1597 = vst.msk [vmem:[#allocation3 + $0xd8] sm:$0xff] %vm548_vm4, %v1596_v1 }
 0x2c0   :  { %v1624_v2 = vld [vmem:[#allocation3 + $0xd0] sm:$0xff] }
 0x2c1   :  { %2805 = vmatprep.mubr.msk.bf16.mxu0 %vm548_vm4, %v1624_v2 }
 0x2c6   :  { %v1625_v23 = vld [vmem:[#allocation3 + $0xd8] sm:$0xff] }
 0x2c7   :  { %2806 = vmatmul.mubr.msk.bf16.gmra.mrb[84].mxu0 %vm548_vm4, %v1625_v23 }
 0x2fc   :  { %v2755_v29 = vpop.f32.mrb[32].mxu0 }
 0x2fd   :  { %v1767_v43 = vpop.f32.mrb[33].mxu0  ;;  %v1776_v25 = vadd.f32 %v2755_v29, %v3603_v4 }
 0x2fe   :  { %v1768_v12 = vadd.f32 %v3603_v4, %v1767_v43  ;;  %v2756_v13 = vpop.f32.mrb[34].mxu0 }
 0x2ff   :  { %v1770_v8 = vpop.f32.mrb[35].mxu0  ;;  %v1779_v18 = vadd.f32 %v2756_v13, %v3603_v4 }
 0x300   :  { %vm1992_vm10 = vcmp.gt.f32.partialorder %v1768_v12, 0.5  ;;  %v1771_v17 = vadd.f32 %v3603_v4, %v1770_v8 }
 0x301   :  { %v1998_v14 = vsel %vm1992_vm10, 0.0, %v1768_v12  ;;  %v1994_v9 = vsel %vm1992_vm10, 1.0, %v2976_v35 }
 0x302   :  { %v2000_v10 = vmul.f32 0.2, %v1998_v14  ;;  %vm1993_vm11 = vcmp.gt.f32.partialorder %v1771_v17, 0.5 }
 0x303   :  { %v1999_v63 = vsel %vm1993_vm11, 0.0, %v1771_v17  ;;  %v1995_v37 = vsel %vm1993_vm11, 1.0, %v2976_v35 }
 0x304   :  { %v2002_v21 = vadd.f32 %v2000_v10, %v1776_v25  ;;  %v2001_v19 = vmul.f32 0.2, %v1999_v63 }
 0x306   :  { %vm2004_vm12 = vcmp.gt.f32.partialorder %v2002_v21, 0.5  ;;  %v2003_v50 = vadd.f32 %v2001_v19, %v1779_v18 }
 0x307   :  { %v2006_v0 = vsel %vm2004_vm12, 1.0, %v2976_v35  ;;  %v2010_v49 = vsel %vm2004_vm12, 0.0, %v2002_v21 }
 0x308   :  { %v2008_v20 = vadd.f32 %v2006_v0, %v1994_v9  ;;  %vm2005_vm13 = vcmp.gt.f32.partialorder %v2003_v50, 0.5  ;;  %v2012_v33 = vmul.f32 0.2, %v2010_v49 }
 0x309   :  { %v2007_v24 = vsel %vm2005_vm13, 1.0, %v2976_v35  ;;  %v2011_v16 = vsel %vm2005_vm13, 0.0, %v2003_v50 }
 0x30a   :  { %v2009_v27 = vadd.f32 %v2007_v24, %v1995_v37  ;;  %v2759_v5 = vpop.f32.mrb[36].mxu0  ;;  %v2013_v7 = vmul.f32 0.2, %v2011_v16 }
 0x30b   :  { %v1783_v15 = vpop.f32.mrb[37].mxu0  ;;  %v1792_v32 = vadd.f32 %v2759_v5, %v3603_v4 }
 0x30c   :  { %v1784_v39 = vadd.f32 %v3603_v4, %v1783_v15  ;;  %v2760_v28 = vpop.f32.mrb[38].mxu0 }
 0x30d   :  { %v1786_v46 = vpop.f32.mrb[39].mxu0  ;;  %v1795_v40 = vadd.f32 %v2760_v28, %v3603_v4 }
 0x30e   :  { %v2014_v62 = vadd.f32 %v2012_v33, %v1784_v39  ;;  %v1787_v22 = vadd.f32 %v3603_v4, %v1786_v46 }
 0x310   :  { %vm2016_vm14 = vcmp.gt.f32.partialorder %v2014_v62, 0.5  ;;  %v2015_v31 = vadd.f32 %v2013_v7, %v1787_v22 }
 0x311   :  { %v2018_v30 = vsel %vm2016_vm14, 1.0, %v2976_v35  ;;  %v2022_v41 = vsel %vm2016_vm14, 0.0, %v2014_v62 }
 0x312   :  { %v2020_v55 = vadd.f32 %v2018_v30, %v2008_v20  ;;  %v2024_v54 = vmul.f32 0.2, %v2022_v41  ;;  %vm2017_vm15 = vcmp.gt.f32.partialorder %v2015_v31, 0.5 }
 0x313   :  { %v2019_v36 = vsel %vm2017_vm15, 1.0, %v2976_v35  ;;  %v2023_v47 = vsel %vm2017_vm15, 0.0, %v2015_v31 }
 0x314   :  { %v2021_v42 = vadd.f32 %v2019_v36, %v2009_v27  ;;  %v2025_v26 = vmul.f32 0.2, %v2023_v47  ;;  %v2026_v44 = vadd.f32 %v2024_v54, %v1792_v32 }
 0x316   :  { %v2763_v38 = vpop.f32.mrb[40].mxu0  ;;  %vm2028_vm0 = vcmp.gt.f32.partialorder %v2026_v44, 0.5  ;;  %v2027_v48 = vadd.f32 %v2025_v26, %v1795_v40 }
 0x317   :  { %v1799_v56 = vpop.f32.mrb[41].mxu0  ;;  %v2030_v34 = vsel %vm2028_vm0, 1.0, %v2976_v35  ;;  %v2034_v52 = vsel %vm2028_vm0, 0.0, %v2026_v44  ;;  %v1808_v29 = vadd.f32 %v2763_v38, %v3603_v4 }
 0x318   :  { %v1800_v57 = vadd.f32 %v3603_v4, %v1799_v56  ;;  %v2032_v58 = vadd.f32 %v2030_v34, %v2020_v55  ;;  %v2036_v59 = vmul.f32 0.2, %v2034_v52  ;;  %v2764_v61 = vpop.f32.mrb[42].mxu0  ;;  %vm2029_vm1 = vcmp.gt.f32.partialorder %v2027_v48, 0.5 }
 0x319   :  { %v1802_v60 = vpop.f32.mrb[43].mxu0  ;;  %v2031_v1 = vsel %vm2029_vm1, 1.0, %v2976_v35  ;;  %v2035_v2 = vsel %vm2029_vm1, 0.0, %v2027_v48  ;;  %v1811_v17 = vadd.f32 %v2764_v61, %v3603_v4 }
 0x31a   :  { %v2038_v51 = vadd.f32 %v2036_v59, %v1800_v57  ;;  %v1803_v11 = vadd.f32 %v3603_v4, %v1802_v60  ;;  %v2033_v3 = vadd.f32 %v2031_v1, %v2021_v42  ;;  %v2037_v23 = vmul.f32 0.2, %v2035_v2 }
 0x31c   :  { %vm2040_vm2 = vcmp.gt.f32.partialorder %v2038_v51, 0.5  ;;  %v2039_v6 = vadd.f32 %v2037_v23, %v1803_v11 }
 0x31d   :  { %v2042_v45 = vsel %vm2040_vm2, 1.0, %v2976_v35  ;;  %v2046_v53 = vsel %vm2040_vm2, 0.0, %v2038_v51 }
 0x31e   :  { %v2044_v43 = vadd.f32 %v2042_v45, %v2032_v58  ;;  %v2048_v12 = vmul.f32 0.2, %v2046_v53  ;;  %vm2041_vm3 = vcmp.gt.f32.partialorder %v2039_v6, 0.5 }
 0x31f   :  { %v2043_v13 = vsel %vm2041_vm3, 1.0, %v2976_v35  ;;  %v2047_v8 = vsel %vm2041_vm3, 0.0, %v2039_v6 }
 0x320   :  { %v2045_v14 = vadd.f32 %v2043_v13, %v2033_v3  ;;  %v2049_v25 = vmul.f32 0.2, %v2047_v8  ;;  %v2050_v10 = vadd.f32 %v2048_v12, %v1808_v29 }
 0x322   :  { %v2767_v63 = vpop.f32.mrb[44].mxu0  ;;  %vm2052_vm5 = vcmp.gt.f32.partialorder %v2050_v10, 0.5  ;;  %v2051_v21 = vadd.f32 %v2049_v25, %v1811_v17 }
 0x323   :  { %v1815_v18 = vpop.f32.mrb[45].mxu0  ;;  %v2054_v19 = vsel %vm2052_vm5, 1.0, %v2976_v35  ;;  %v2058_v50 = vsel %vm2052_vm5, 0.0, %v2050_v10  ;;  %v1824_v62 = vadd.f32 %v2767_v63, %v3603_v4 }
 0x324   :  { %v1816_v9 = vadd.f32 %v3603_v4, %v1815_v18  ;;  %v2056_v0 = vadd.f32 %v2054_v19, %v2044_v43  ;;  %v2060_v20 = vmul.f32 0.2, %v2058_v50  ;;  %v2768_v37 = vpop.f32.mrb[46].mxu0  ;;  %vm2053_vm6 = vcmp.gt.f32.partialorder %v2051_v21, 0.5 }
 0x325   :  { %v1818_v24 = vpop.f32.mrb[47].mxu0  ;;  %v2055_v49 = vsel %vm2053_vm6, 1.0, %v2976_v35  ;;  %v2059_v27 = vsel %vm2053_vm6, 0.0, %v2051_v21  ;;  %v1827_v41 = vadd.f32 %v2768_v37, %v3603_v4 }
 0x326   :  { %v2062_v5 = vadd.f32 %v2060_v20, %v1816_v9  ;;  %v1819_v15 = vadd.f32 %v3603_v4, %v1818_v24  ;;  %v2057_v16 = vadd.f32 %v2055_v49, %v2045_v14  ;;  %v2061_v39 = vmul.f32 0.2, %v2059_v27 }
 0x328   :  { %vm2064_vm7 = vcmp.gt.f32.partialorder %v2062_v5, 0.5  ;;  %v2063_v33 = vadd.f32 %v2061_v39, %v1819_v15 }
 0x329   :  { %v2066_v28 = vsel %vm2064_vm7, 1.0, %v2976_v35  ;;  %v2070_v46 = vsel %vm2064_vm7, 0.0, %v2062_v5 }
 0x32a   :  { %v2068_v22 = vadd.f32 %v2066_v28, %v2056_v0  ;;  %v2072_v7 = vmul.f32 0.2, %v2070_v46  ;;  %vm2065_vm8 = vcmp.gt.f32.partialorder %v2063_v33, 0.5 }
 0x32b   :  { %v2067_v31 = vsel %vm2065_vm8, 1.0, %v2976_v35  ;;  %v2071_v30 = vsel %vm2065_vm8, 0.0, %v2063_v33 }
 0x32c   :  { %v2069_v32 = vadd.f32 %v2067_v31, %v2057_v16  ;;  %v2073_v55 = vmul.f32 0.2, %v2071_v30  ;;  %v2074_v54 = vadd.f32 %v2072_v7, %v1824_v62 }
 0x32e   :  { %v2771_v36 = vpop.f32.mrb[48].mxu0  ;;  %vm2076_vm9 = vcmp.gt.f32.partialorder %v2074_v54, 0.5  ;;  %v2075_v47 = vadd.f32 %v2073_v55, %v1827_v41 }
 0x32f   :  { %v1831_v40 = vpop.f32.mrb[49].mxu0  ;;  %v2078_v42 = vsel %vm2076_vm9, 1.0, %v2976_v35  ;;  %v2082_v26 = vsel %vm2076_vm9, 0.0, %v2074_v54  ;;  %v1840_v11 = vadd.f32 %v2771_v36, %v3603_v4 }
 0x330   :  { %v1832_v44 = vadd.f32 %v3603_v4, %v1831_v40  ;;  %v2080_v38 = vadd.f32 %v2078_v42, %v2068_v22  ;;  %v2084_v48 = vmul.f32 0.2, %v2082_v26  ;;  %v2772_v56 = vpop.f32.mrb[50].mxu0  ;;  %vm2077_vm10 = vcmp.gt.f32.partialorder %v2075_v47, 0.5 }
 0x331   :  { %v1834_v34 = vpop.f32.mrb[51].mxu0  ;;  %v2079_v52 = vsel %vm2077_vm10, 1.0, %v2976_v35  ;;  %v2083_v57 = vsel %vm2077_vm10, 0.0, %v2075_v47  ;;  %v1843_v53 = vadd.f32 %v2772_v56, %v3603_v4 }
 0x332   :  { %v2086_v58 = vadd.f32 %v2084_v48, %v1832_v44  ;;  %v1835_v59 = vadd.f32 %v3603_v4, %v1834_v34  ;;  %v2081_v61 = vadd.f32 %v2079_v52, %v2069_v32  ;;  %v2085_v60 = vmul.f32 0.2, %v2083_v57 }
 0x334   :  { %vm2088_vm11 = vcmp.gt.f32.partialorder %v2086_v58, 0.5  ;;  %v2087_v1 = vadd.f32 %v2085_v60, %v1835_v59 }
 0x335   :  { %v2090_v2 = vsel %vm2088_vm11, 1.0, %v2976_v35  ;;  %v2094_v51 = vsel %vm2088_vm11, 0.0, %v2086_v58 }
 0x336   :  { %v2092_v3 = vadd.f32 %v2090_v2, %v2080_v38  ;;  %v2096_v23 = vmul.f32 0.2, %v2094_v51  ;;  %vm2089_vm12 = vcmp.gt.f32.partialorder %v2087_v1, 0.5 }
 0x337   :  { %v2091_v6 = vsel %vm2089_vm12, 1.0, %v2976_v35  ;;  %v2095_v45 = vsel %vm2089_vm12, 0.0, %v2087_v1 }
 0x338   :  { %v2093_v29 = vadd.f32 %v2091_v6, %v2081_v61  ;;  %v2097_v43 = vmul.f32 0.2, %v2095_v45  ;;  %v2098_v12 = vadd.f32 %v2096_v23, %v1840_v11 }
 0x33a   :  { %v2775_v13 = vpop.f32.mrb[52].mxu0  ;;  %vm2100_vm13 = vcmp.gt.f32.partialorder %v2098_v12, 0.5  ;;  %v2099_v8 = vadd.f32 %v2097_v43, %v1843_v53 }
 0x33b   :  { %v1847_v17 = vpop.f32.mrb[53].mxu0  ;;  %v2102_v14 = vsel %vm2100_vm13, 1.0, %v2976_v35  ;;  %v2106_v25 = vsel %vm2100_vm13, 0.0, %v2098_v12  ;;  %v1856_v15 = vadd.f32 %v2775_v13, %v3603_v4 }
 0x33c   :  { %v1848_v10 = vadd.f32 %v3603_v4, %v1847_v17  ;;  %v2104_v63 = vadd.f32 %v2102_v14, %v2092_v3  ;;  %v2108_v21 = vmul.f32 0.2, %v2106_v25  ;;  %v2776_v18 = vpop.f32.mrb[54].mxu0  ;;  %vm2101_vm14 = vcmp.gt.f32.partialorder %v2099_v8, 0.5 }
 0x33d   :  { %v1850_v19 = vpop.f32.mrb[55].mxu0  ;;  %v2103_v50 = vsel %vm2101_vm14, 1.0, %v2976_v35  ;;  %v2107_v9 = vsel %vm2101_vm14, 0.0, %v2099_v8  ;;  %v1859_v46 = vadd.f32 %v2776_v18, %v3603_v4 }
 0x33e   :  { %v2110_v0 = vadd.f32 %v2108_v21, %v1848_v10  ;;  %v1851_v20 = vadd.f32 %v3603_v4, %v1850_v19  ;;  %v2105_v37 = vadd.f32 %v2103_v50, %v2093_v29  ;;  %v2109_v24 = vmul.f32 0.2, %v2107_v9 }
 0x340   :  { %vm2112_vm15 = vcmp.gt.f32.partialorder %v2110_v0, 0.5  ;;  %v2111_v49 = vadd.f32 %v2109_v24, %v1851_v20 }
 0x341   :  { %v2114_v27 = vsel %vm2112_vm15, 1.0, %v2976_v35  ;;  %v2118_v5 = vsel %vm2112_vm15, 0.0, %v2110_v0 }
 0x342   :  { %v2116_v16 = vadd.f32 %v2114_v27, %v2104_v63  ;;  %v2120_v39 = vmul.f32 0.2, %v2118_v5  ;;  %vm2113_vm0 = vcmp.gt.f32.partialorder %v2111_v49, 0.5 }
 0x343   :  { %v2115_v33 = vsel %vm2113_vm0, 1.0, %v2976_v35  ;;  %v2119_v28 = vsel %vm2113_vm0, 0.0, %v2111_v49 }
 0x344   :  { %v2117_v62 = vadd.f32 %v2115_v33, %v2105_v37  ;;  %v2121_v22 = vmul.f32 0.2, %v2119_v28  ;;  %v2122_v7 = vadd.f32 %v2120_v39, %v1856_v15 }
 0x346   :  { %v2779_v31 = vpop.f32.mrb[56].mxu0  ;;  %vm2124_vm1 = vcmp.gt.f32.partialorder %v2122_v7, 0.5  ;;  %v2123_v30 = vadd.f32 %v2121_v22, %v1859_v46 }
 0x347   :  { %v1863_v41 = vpop.f32.mrb[57].mxu0  ;;  %v2126_v32 = vsel %vm2124_vm1, 1.0, %v2976_v35  ;;  %v2130_v55 = vsel %vm2124_vm1, 0.0, %v2122_v7  ;;  %v1872_v59 = vadd.f32 %v2779_v31, %v3603_v4 }
 0x348   :  { %v1864_v54 = vadd.f32 %v3603_v4, %v1863_v41  ;;  %v2128_v36 = vadd.f32 %v2126_v32, %v2116_v16  ;;  %v2132_v47 = vmul.f32 0.2, %v2130_v55  ;;  %v2780_v40 = vpop.f32.mrb[58].mxu0  ;;  %vm2125_vm2 = vcmp.gt.f32.partialorder %v2123_v30, 0.5 }
 0x349   :  { %v1866_v42 = vpop.f32.mrb[59].mxu0  ;;  %v2127_v26 = vsel %vm2125_vm2, 1.0, %v2976_v35  ;;  %v2131_v44 = vsel %vm2125_vm2, 0.0, %v2123_v30  ;;  %v1875_v51 = vadd.f32 %v2780_v40, %v3603_v4 }
 0x34a   :  { %v2134_v38 = vadd.f32 %v2132_v47, %v1864_v54  ;;  %v1867_v48 = vadd.f32 %v3603_v4, %v1866_v42  ;;  %v2129_v56 = vadd.f32 %v2127_v26, %v2117_v62  ;;  %v2133_v34 = vmul.f32 0.2, %v2131_v44 }
 0x34c   :  { %vm2136_vm3 = vcmp.gt.f32.partialorder %v2134_v38, 0.5  ;;  %v2135_v52 = vadd.f32 %v2133_v34, %v1867_v48 }
 0x34d   :  { %v2138_v57 = vsel %vm2136_vm3, 1.0, %v2976_v35  ;;  %v2142_v58 = vsel %vm2136_vm3, 0.0, %v2134_v38 }
 0x34e   :  { %v2140_v61 = vadd.f32 %v2138_v57, %v2128_v36  ;;  %v2144_v60 = vmul.f32 0.2, %v2142_v58  ;;  %vm2137_vm5 = vcmp.gt.f32.partialorder %v2135_v52, 0.5 }
 0x34f   :  { %v2139_v1 = vsel %vm2137_vm5, 1.0, %v2976_v35  ;;  %v2143_v2 = vsel %vm2137_vm5, 0.0, %v2135_v52 }
 0x350   :  { %v2141_v11 = vadd.f32 %v2139_v1, %v2129_v56  ;;  %v2145_v3 = vmul.f32 0.2, %v2143_v2  ;;  %v2146_v23 = vadd.f32 %v2144_v60, %v1872_v59 }
 0x352   :  { %v2783_v6 = vpop.f32.mrb[60].mxu0  ;;  %vm2148_vm6 = vcmp.gt.f32.partialorder %v2146_v23, 0.5  ;;  %v2147_v45 = vadd.f32 %v2145_v3, %v1875_v51 }
 0x353   :  { %v1879_v53 = vpop.f32.mrb[61].mxu0  ;;  %v2150_v29 = vsel %vm2148_vm6, 1.0, %v2976_v35  ;;  %v2154_v43 = vsel %vm2148_vm6, 0.0, %v2146_v23  ;;  %v1888_v20 = vadd.f32 %v2783_v6, %v3603_v4 }
 0x354   :  { %v1880_v12 = vadd.f32 %v3603_v4, %v1879_v53  ;;  %v2152_v13 = vadd.f32 %v2150_v29, %v2140_v61  ;;  %v2156_v8 = vmul.f32 0.2, %v2154_v43  ;;  %v2784_v17 = vpop.f32.mrb[62].mxu0  ;;  %vm2149_vm7 = vcmp.gt.f32.partialorder %v2147_v45, 0.5 }
 0x355   :  { %v1882_v14 = vpop.f32.mrb[63].mxu0  ;;  %v2151_v25 = vsel %vm2149_vm7, 1.0, %v2976_v35  ;;  %v2155_v10 = vsel %vm2149_vm7, 0.0, %v2147_v45  ;;  %v1891_v5 = vadd.f32 %v2784_v17, %v3603_v4 }
 0x356   :  { %v2158_v63 = vadd.f32 %v2156_v8, %v1880_v12  ;;  %v1883_v21 = vadd.f32 %v3603_v4, %v1882_v14  ;;  %v2153_v18 = vadd.f32 %v2151_v25, %v2141_v11  ;;  %v2157_v19 = vmul.f32 0.2, %v2155_v10 }
 0x358   :  { %vm2160_vm8 = vcmp.gt.f32.partialorder %v2158_v63, 0.5  ;;  %v2159_v50 = vadd.f32 %v2157_v19, %v1883_v21 }
 0x359   :  { %v2162_v9 = vsel %vm2160_vm8, 1.0, %v2976_v35  ;;  %v2166_v0 = vsel %vm2160_vm8, 0.0, %v2158_v63 }
 0x35a   :  { %v2164_v37 = vadd.f32 %v2162_v9, %v2152_v13  ;;  %v2168_v24 = vmul.f32 0.2, %v2166_v0  ;;  %vm2161_vm9 = vcmp.gt.f32.partialorder %v2159_v50, 0.5 }
 0x35b   :  { %v2163_v49 = vsel %vm2161_vm9, 1.0, %v2976_v35  ;;  %v2167_v27 = vsel %vm2161_vm9, 0.0, %v2159_v50 }
 0x35c   :  { %v2165_v15 = vadd.f32 %v2163_v49, %v2153_v18  ;;  %v2169_v16 = vmul.f32 0.2, %v2167_v27  ;;  %v2170_v39 = vadd.f32 %v2168_v24, %v1888_v20 }
 0x35e   :  { %v2787_v33 = vpop.f32.mrb[64].mxu0  ;;  %vm2172_vm10 = vcmp.gt.f32.partialorder %v2170_v39, 0.5  ;;  %v2171_v28 = vadd.f32 %v2169_v16, %v1891_v5 }
 0x35f   :  { %v1895_v46 = vpop.f32.mrb[65].mxu0  ;;  %v2174_v62 = vsel %vm2172_vm10, 1.0, %v2976_v35  ;;  %v2178_v22 = vsel %vm2172_vm10, 0.0, %v2170_v39  ;;  %v1904_v48 = vadd.f32 %v2787_v33, %v3603_v4 }
 0x360   :  { %v1896_v7 = vadd.f32 %v3603_v4, %v1895_v46  ;;  %v2176_v31 = vadd.f32 %v2174_v62, %v2164_v37  ;;  %v2180_v30 = vmul.f32 0.2, %v2178_v22  ;;  %v2788_v41 = vpop.f32.mrb[66].mxu0  ;;  %vm2173_vm11 = vcmp.gt.f32.partialorder %v2171_v28, 0.5 }
 0x361   :  { %v1898_v32 = vpop.f32.mrb[67].mxu0  ;;  %v2175_v55 = vsel %vm2173_vm11, 1.0, %v2976_v35  ;;  %v2179_v54 = vsel %vm2173_vm11, 0.0, %v2171_v28  ;;  %v1907_v58 = vadd.f32 %v2788_v41, %v3603_v4 }
 0x362   :  { %v2182_v36 = vadd.f32 %v2180_v30, %v1896_v7  ;;  %v1899_v47 = vadd.f32 %v3603_v4, %v1898_v32  ;;  %v2177_v40 = vadd.f32 %v2175_v55, %v2165_v15  ;;  %v2181_v42 = vmul.f32 0.2, %v2179_v54 }
 0x364   :  { %vm2184_vm12 = vcmp.gt.f32.partialorder %v2182_v36, 0.5  ;;  %v2183_v26 = vadd.f32 %v2181_v42, %v1899_v47 }
 0x365   :  { %v2186_v44 = vsel %vm2184_vm12, 1.0, %v2976_v35  ;;  %v2190_v38 = vsel %vm2184_vm12, 0.0, %v2182_v36 }
 0x366   :  { %v2188_v56 = vadd.f32 %v2186_v44, %v2176_v31  ;;  %v2192_v34 = vmul.f32 0.2, %v2190_v38  ;;  %vm2185_vm13 = vcmp.gt.f32.partialorder %v2183_v26, 0.5 }
 0x367   :  { %v2187_v52 = vsel %vm2185_vm13, 1.0, %v2976_v35  ;;  %v2191_v57 = vsel %vm2185_vm13, 0.0, %v2183_v26 }
 0x368   :  { %v2189_v59 = vadd.f32 %v2187_v52, %v2177_v40  ;;  %v2193_v61 = vmul.f32 0.2, %v2191_v57  ;;  %v2194_v60 = vadd.f32 %v2192_v34, %v1904_v48 }
 0x36a   :  { %v2791_v1 = vpop.f32.mrb[68].mxu0  ;;  %vm2196_vm14 = vcmp.gt.f32.partialorder %v2194_v60, 0.5  ;;  %v2195_v2 = vadd.f32 %v2193_v61, %v1907_v58 }
 0x36b   :  { %v1911_v51 = vpop.f32.mrb[69].mxu0  ;;  %v2198_v11 = vsel %vm2196_vm14, 1.0, %v2976_v35  ;;  %v2202_v3 = vsel %vm2196_vm14, 0.0, %v2194_v60  ;;  %v1920_v21 = vadd.f32 %v2791_v1, %v3603_v4 }
 0x36c   :  { %v1912_v23 = vadd.f32 %v3603_v4, %v1911_v51  ;;  %v2200_v6 = vadd.f32 %v2198_v11, %v2188_v56  ;;  %v2204_v45 = vmul.f32 0.2, %v2202_v3  ;;  %v2792_v53 = vpop.f32.mrb[70].mxu0  ;;  %vm2197_vm15 = vcmp.gt.f32.partialorder %v2195_v2, 0.5 }
 0x36d   :  { %v1914_v29 = vpop.f32.mrb[71].mxu0  ;;  %v2199_v43 = vsel %vm2197_vm15, 1.0, %v2976_v35  ;;  %v2203_v12 = vsel %vm2197_vm15, 0.0, %v2195_v2  ;;  %v1923_v0 = vadd.f32 %v2792_v53, %v3603_v4 }
 0x36e   :  { %v2206_v13 = vadd.f32 %v2204_v45, %v1912_v23  ;;  %v1915_v8 = vadd.f32 %v3603_v4, %v1914_v29  ;;  %v2201_v17 = vadd.f32 %v2199_v43, %v2189_v59  ;;  %v2205_v14 = vmul.f32 0.2, %v2203_v12 }
 0x370   :  { %vm2208_vm0 = vcmp.gt.f32.partialorder %v2206_v13, 0.5  ;;  %v2207_v25 = vadd.f32 %v2205_v14, %v1915_v8 }
 0x371   :  { %v2210_v10 = vsel %vm2208_vm0, 1.0, %v2976_v35  ;;  %v2214_v63 = vsel %vm2208_vm0, 0.0, %v2206_v13 }
 0x372   :  { %v2212_v18 = vadd.f32 %v2210_v10, %v2200_v6  ;;  %v2216_v19 = vmul.f32 0.2, %v2214_v63  ;;  %vm2209_vm1 = vcmp.gt.f32.partialorder %v2207_v25, 0.5 }
 0x373   :  { %v2211_v50 = vsel %vm2209_vm1, 1.0, %v2976_v35  ;;  %v2215_v9 = vsel %vm2209_vm1, 0.0, %v2207_v25 }
 0x374   :  { %v2213_v20 = vadd.f32 %v2211_v50, %v2201_v17  ;;  %v2217_v37 = vmul.f32 0.2, %v2215_v9  ;;  %v2218_v24 = vadd.f32 %v2216_v19, %v1920_v21 }
 0x376   :  { %v2795_v49 = vpop.f32.mrb[72].mxu0  ;;  %vm2220_vm2 = vcmp.gt.f32.partialorder %v2218_v24, 0.5  ;;  %v2219_v27 = vadd.f32 %v2217_v37, %v1923_v0 }
 0x377   :  { %v1927_v5 = vpop.f32.mrb[73].mxu0  ;;  %v2222_v15 = vsel %vm2220_vm2, 1.0, %v2976_v35  ;;  %v2226_v16 = vsel %vm2220_vm2, 0.0, %v2218_v24  ;;  %v1936_v47 = vadd.f32 %v2795_v49, %v3603_v4 }
 0x378   :  { %v1928_v39 = vadd.f32 %v3603_v4, %v1927_v5  ;;  %v2224_v33 = vadd.f32 %v2222_v15, %v2212_v18  ;;  %v2228_v28 = vmul.f32 0.2, %v2226_v16  ;;  %v2796_v46 = vpop.f32.mrb[74].mxu0  ;;  %vm2221_vm3 = vcmp.gt.f32.partialorder %v2219_v27, 0.5 }
 0x379   :  { %v1930_v62 = vpop.f32.mrb[75].mxu0  ;;  %v2223_v22 = vsel %vm2221_vm3, 1.0, %v2976_v35  ;;  %v2227_v7 = vsel %vm2221_vm3, 0.0, %v2219_v27  ;;  %v1939_v38 = vadd.f32 %v2796_v46, %v3603_v4 }
 0x37a   :  { %v2230_v31 = vadd.f32 %v2228_v28, %v1928_v39  ;;  %v1931_v30 = vadd.f32 %v3603_v4, %v1930_v62  ;;  %v2225_v41 = vadd.f32 %v2223_v22, %v2213_v20  ;;  %v2229_v32 = vmul.f32 0.2, %v2227_v7 }
 0x37c   :  { %vm2232_vm5 = vcmp.gt.f32.partialorder %v2230_v31, 0.5  ;;  %v2231_v55 = vadd.f32 %v2229_v32, %v1931_v30 }
 0x37d   :  { %v2234_v54 = vsel %vm2232_vm5, 1.0, %v2976_v35  ;;  %v2238_v36 = vsel %vm2232_vm5, 0.0, %v2230_v31 }
 0x37e   :  { %v2236_v40 = vadd.f32 %v2234_v54, %v2224_v33  ;;  %v2240_v42 = vmul.f32 0.2, %v2238_v36  ;;  %vm2233_vm6 = vcmp.gt.f32.partialorder %v2231_v55, 0.5 }
 0x37f   :  { %v2235_v26 = vsel %vm2233_vm6, 1.0, %v2976_v35  ;;  %v2239_v44 = vsel %vm2233_vm6, 0.0, %v2231_v55 }
 0x380   :  { %v2237_v48 = vadd.f32 %v2235_v26, %v2225_v41  ;;  %v2241_v56 = vmul.f32 0.2, %v2239_v44  ;;  %v2242_v34 = vadd.f32 %v2240_v42, %v1936_v47 }
 0x382   :  { %v2799_v52 = vpop.f32.mrb[76].mxu0  ;;  %vm2244_vm7 = vcmp.gt.f32.partialorder %v2242_v34, 0.5  ;;  %v2243_v57 = vadd.f32 %v2241_v56, %v1939_v38 }
 0x383   :  { %v1943_v58 = vpop.f32.mrb[77].mxu0  ;;  %v2246_v59 = vsel %vm2244_vm7, 1.0, %v2976_v35  ;;  %v2250_v61 = vsel %vm2244_vm7, 0.0, %v2242_v34  ;;  %v1952_v8 = vadd.f32 %v2799_v52, %v3603_v4 }
 0x384   :  { %v1944_v60 = vadd.f32 %v3603_v4, %v1943_v58  ;;  %v2248_v1 = vadd.f32 %v2246_v59, %v2236_v40  ;;  %v2252_v2 = vmul.f32 0.2, %v2250_v61  ;;  %v2800_v51 = vpop.f32.mrb[78].mxu0  ;;  %vm2245_vm8 = vcmp.gt.f32.partialorder %v2243_v57, 0.5 }
 0x385   :  { %v1946_v11 = vpop.f32.mrb[79].mxu0  ;;  %v2247_v3 = vsel %vm2245_vm8, 1.0, %v2976_v35  ;;  %v2251_v23 = vsel %vm2245_vm8, 0.0, %v2243_v57  ;;  %v1955_v63 = vadd.f32 %v2800_v51, %v3603_v4 }
 0x386   :  { %v2254_v6 = vadd.f32 %v2252_v2, %v1944_v60  ;;  %v1947_v45 = vadd.f32 %v3603_v4, %v1946_v11  ;;  %v2249_v53 = vadd.f32 %v2247_v3, %v2237_v48  ;;  %v2253_v29 = vmul.f32 0.2, %v2251_v23 }
 0x388   :  { %vm2256_vm9 = vcmp.gt.f32.partialorder %v2254_v6, 0.5  ;;  %v2255_v43 = vadd.f32 %v2253_v29, %v1947_v45 }
 0x389   :  { %v2258_v12 = vsel %vm2256_vm9, 1.0, %v2976_v35  ;;  %v2262_v13 = vsel %vm2256_vm9, 0.0, %v2254_v6 }
 0x38a   :  { %v2260_v17 = vadd.f32 %v2258_v12, %v2248_v1  ;;  %v2264_v14 = vmul.f32 0.2, %v2262_v13  ;;  %vm2257_vm10 = vcmp.gt.f32.partialorder %v2255_v43, 0.5 }
 0x38b   :  { %v2259_v25 = vsel %vm2257_vm10, 1.0, %v2976_v35  ;;  %v2263_v10 = vsel %vm2257_vm10, 0.0, %v2255_v43 }
 0x38c   :  { %v2261_v21 = vadd.f32 %v2259_v25, %v2249_v53  ;;  %v2265_v18 = vmul.f32 0.2, %v2263_v10  ;;  %v2266_v19 = vadd.f32 %v2264_v14, %v1952_v8 }
 0x38e   :  { %v2803_v50 = vpop.f32.mrb[80].mxu0  ;;  %vm2268_vm11 = vcmp.gt.f32.partialorder %v2266_v19, 0.5  ;;  %v2267_v9 = vadd.f32 %v2265_v18, %v1955_v63 }
 0x38f   :  { %v1959_v0 = vpop.f32.mrb[81].mxu0  ;;  %v2270_v20 = vsel %vm2268_vm11, 1.0, %v2976_v35  ;;  %v2274_v37 = vsel %vm2268_vm11, 0.0, %v2266_v19  ;;  %v1968_v30 = vadd.f32 %v2803_v50, %v3603_v4 }
 0x390   :  { %v1960_v24 = vadd.f32 %v3603_v4, %v1959_v0  ;;  %v2272_v49 = vadd.f32 %v2270_v20, %v2260_v17  ;;  %v2276_v27 = vmul.f32 0.2, %v2274_v37  ;;  %v2804_v5 = vpop.f32.mrb[82].mxu0  ;;  %vm2269_vm12 = vcmp.gt.f32.partialorder %v2267_v9, 0.5 }
 0x391   :  { %v1962_v15 = vpop.f32.mrb[83].mxu0  ;;  %v2271_v16 = vsel %vm2269_vm12, 1.0, %v2976_v35  ;;  %v2275_v39 = vsel %vm2269_vm12, 0.0, %v2267_v9  ;;  %v1971_v36 = vadd.f32 %v2804_v5, %v3603_v4 }
 0x392   :  { %v2278_v33 = vadd.f32 %v2276_v27, %v1960_v24  ;;  %v1963_v28 = vadd.f32 %v3603_v4, %v1962_v15  ;;  %v2273_v46 = vadd.f32 %v2271_v16, %v2261_v21  ;;  %v2277_v62 = vmul.f32 0.2, %v2275_v39 }
 0x394   :  { %vm2280_vm13 = vcmp.gt.f32.partialorder %v2278_v33, 0.5  ;;  %v2279_v22 = vadd.f32 %v2277_v62, %v1963_v28 }
 0x395   :  { %v2282_v7 = vsel %vm2280_vm13, 1.0, %v2976_v35  ;;  %v2286_v31 = vsel %vm2280_vm13, 0.0, %v2278_v33 }
 0x396   :  { %v2284_v41 = vadd.f32 %v2282_v7, %v2272_v49  ;;  %v2288_v32 = vmul.f32 0.2, %v2286_v31  ;;  %vm2281_vm14 = vcmp.gt.f32.partialorder %v2279_v22, 0.5 }
 0x397   :  { %v2283_v55 = vsel %vm2281_vm14, 1.0, %v2976_v35  ;;  %v2287_v54 = vsel %vm2281_vm14, 0.0, %v2279_v22 }
 0x398   :  { %v2285_v47 = vadd.f32 %v2283_v55, %v2273_v46  ;;  %v2289_v40 = vmul.f32 0.2, %v2287_v54  ;;  %v2290_v42 = vadd.f32 %v2288_v32, %v1968_v30 }
 0x39a   :  { %v2807_v26 = vpop.f32.mrb[84].mxu0  ;;  %vm2292_vm15 = vcmp.gt.f32.partialorder %v2290_v42, 0.5  ;;  %v2291_v44 = vadd.f32 %v2289_v40, %v1971_v36 }
 0x39b   :  { %v1975_v38 = vpop.f32.mrb[85].mxu0  ;;  %v2294_v48 = vsel %vm2292_vm15, 1.0, %v2976_v35  ;;  %v2298_v56 = vsel %vm2292_vm15, 0.0, %v2290_v42  ;;  %v1984_v45 = vadd.f32 %v2807_v26, %v3603_v4 }
 0x39c   :  { %v1976_v34 = vadd.f32 %v3603_v4, %v1975_v38  ;;  %v2296_v52 = vadd.f32 %v2294_v48, %v2284_v41  ;;  %v2300_v57 = vmul.f32 0.2, %v2298_v56  ;;  %v2808_v58 = vpop.f32.mrb[86].mxu0  ;;  %vm2293_vm0 = vcmp.gt.f32.partialorder %v2291_v44, 0.5 }
 0x39d   :  { %v1978_v59 = vpop.f32.mrb[87].mxu0  ;;  %v2295_v61 = vsel %vm2293_vm0, 1.0, %v2976_v35  ;;  %v2299_v60 = vsel %vm2293_vm0, 0.0, %v2291_v44  ;;  %v1987_v8 = vadd.f32 %v2808_v58, %v3603_v4 }
 0x39e   :  { %v2302_v1 = vadd.f32 %v2300_v57, %v1976_v34  ;;  %v1979_v2 = vadd.f32 %v3603_v4, %v1978_v59  ;;  %v2297_v51 = vadd.f32 %v2295_v61, %v2285_v47  ;;  %v2301_v11 = vmul.f32 0.2, %v2299_v60  ;;  %v2530_v4 = vld [vmem:[%s3745_s8] ss:$0 sm:$0xff] }
 0x3a0   :  { %vm2304_vm1 = vcmp.gt.f32.partialorder %v2302_v1, 0.5  ;;  %v2303_v3 = vadd.f32 %v2301_v11, %v1979_v2 }
 0x3a1   :  { %v2306_v23 = vsel %vm2304_vm1, 1.0, %v2976_v35  ;;  %v2310_v6 = vsel %vm2304_vm1, 0.0, %v2302_v1 }
 0x3a2   :  { %v2308_v53 = vadd.f32 %v2306_v23, %v2296_v52  ;;  %v2312_v29 = vmul.f32 0.2, %v2310_v6  ;;  %vm2305_vm2 = vcmp.gt.f32.partialorder %v2303_v3, 0.5 }
 0x3a3   :  { %v2307_v43 = vsel %vm2305_vm2, 1.0, %v2976_v35  ;;  %v2311_v12 = vsel %vm2305_vm2, 0.0, %v2303_v3 }
 0x3a4   :  { %v2314_v13 = vadd.f32 %v2312_v29, %v1984_v45  ;;  %v2309_v17 = vadd.f32 %v2307_v43, %v2297_v51  ;;  %v2313_v14 = vmul.f32 0.2, %v2311_v12 }
 0x3a6   :  { %vm2316_vm3 = vcmp.gt.f32.partialorder %v2314_v13, 0.5  ;;  %v2315_v25 = vadd.f32 %v2313_v14, %v1987_v8 }
 0x3a7   :  { %v2318_v10 = vsel %vm2316_vm3, 1.0, %v2976_v35 }
 0x3a8   :  { %vm2317_vm5 = vcmp.gt.f32.partialorder %v2315_v25, 0.5  ;;  %v2320_v63 = vadd.f32 %v2318_v10, %v2308_v53 }
 0x3a9   :  { %v2319_v21 = vsel %vm2317_vm5, 1.0, %v2976_v35 }
 0x3aa   :  { %v2321_v18 = vadd.f32 %v2319_v21, %v2309_v17  ;;  %v2322_v19 = vmul.f32 0.035714287, %v2320_v63 }
 0x3ac   :  { %v2323_v50 = vmul.f32 0.035714287, %v2321_v18  ;;  %2817 = vmatprep.mubr.msk.f32.mxu1 %vm548_vm4, %v2322_v19 }
 0x3ae   :  { %2818 = vmatmul.mubr.msk.f32.vlgmr.msra.gmra.mrb[80].mxu1 %vm548_vm4, %v2323_v50 }
 0x481   :  { %v2819_v9 = vpop.f32.mrb[80].mxu1 }
 0x482   :  { %v2413_v0 = vadd.f32 %v2819_v9, %v2530_v4  ;;  %v2407_v20 = vpop.f32.mrb[81].mxu1 }
 0x483   :  { %v2408_v37 = vadd.f32 %v2530_v4, %v2407_v20 }
 0x484   :  { %2417 = vst [vmem:[#allocation12 + $0x8] sm:$0xff] %v2413_v0 }
 0x485   :  { %2416 = vst [vmem:[#allocation12] sm:$0xff] %v2408_v37 }
 0x486   :  { %2949 = shalt.err (!%p2946_p8)
}
 0x487   :  { %s2950_s8 = scalar_lea.hbm %s3746_s9, 256 }
 0x488   :  { %p2951_p9 = scmp.ne.s32.totalorder %s3746_s9, %s2950_s8  ;;  %p2954_p10 = scmp.lt.u32.totalorder %s2950_s8, %s3746_s9 }
 0x48a   :  { %p2956_p11 = pnand %p2954_p10, %p2951_p9 }
 0x48c   :  { %2959 = shalt.err (!%p2956_p11)
}
 0x48d   :  { %2429 = dma.vmem_to_hbm [thread:$0]  %s2424_s28, 256, %s3746_s9, [#allocation6], %s2972_s1, %s2972_s1, %s2973_s10  }
 0x48e   :  { %2966 = dma.done.wait [#allocation6], 256  }
 0x48f   :  { %2967 = vsyncadd [#allocation6], 4294967040 }
 0x490   :  { %2433 = vsyncpa [#allocation5], 1 }
 0x491   :  { %2434 = vsyncpa [#allocation8], 1 }
 0x492   :  { %2435 = vsyncpa [#allocation11], 1 }
 0x493   :  { %2436 = vsyncpa [#allocation6], 1 }

</bundles_post_ra>
